<compile_context>
chip_gen: v6e
topology: v6e:2x2x1
jax: 0.10.0
libtpu: 0.0.40
codegen_flags: <defaults>
</compile_context>

<pallas_src>
import functools

import numpy as np
import jax
import jax.numpy as jnp
from jax.experimental import pallas as pl
from jax.experimental.pallas import tpu as pltpu

K = 7        # spatial conv kernel size
PAD = 3      # conv padding (same-size output)
KK = K * K


def _spatial_gate_kernel(x_ref, wmax_ref, wmean_ref, shift_ref, o_ref, *, W, HWp):
    """One grid step processes a (NB, C, HWp) slab of the batch.

    x_ref    : (NB, C, HWp) VMEM, caller dtype (f32 / bf16), lane-dense
    wmax_ref : (KK, HWp)    f32 VMEM   per-tap weight * validity mask (max map)
    wmean_ref: (KK, HWp)    f32 VMEM   per-tap weight * mask / C     (mean map)
    shift_ref: (1,)         f32 SMEM   folded eval-mode BN shift
    o_ref    : (NB, C, HWp) VMEM
    """
    x = x_ref[...]                                  # (NB, C, HWp)
    xf = x.astype(jnp.float32)

    # Channel-wise max / sum (1/C is folded into the mean-map weights).
    att_max = jnp.max(xf, axis=1)                   # (NB, HWp)
    att_sum = jnp.sum(xf, axis=1)                   # (NB, HWp)

    # 7x7, 2 -> 1 channel conv (stride 1, pad 3, no bias), fully unrolled.
    # Tap (dy, dx) at flat output index i reads flat input index i + dy*W + dx;
    # the wrap-around / out-of-image contributions are zeroed by the masked
    # weights, so each tap is: roll (XLU) + 2 FMAs (VPU).
    n_acc = 4
    accs = [jnp.zeros_like(att_max) for _ in range(n_acc)]
    for t in range(KK):
        dy = t // K - PAD
        dx = t % K - PAD
        shift = (-(dy * W + dx)) % HWp              # static, non-negative
        if shift == 0:
            r_max, r_sum = att_max, att_sum
        else:
            r_max = pltpu.roll(att_max, shift=shift, axis=1)
            r_sum = pltpu.roll(att_sum, shift=shift, axis=1)
        accs[t % n_acc] = (accs[t % n_acc]
                           + r_max * wmax_ref[t][None, :]
                           + r_sum * wmean_ref[t][None, :])
    acc = (accs[0] + accs[1]) + (accs[2] + accs[3])

    # Folded eval-mode BatchNorm shift, sigmoid gate, broadcast over channels.
    gate = jax.nn.sigmoid(acc + shift_ref[0])       # (NB, HWp) f32
    o_ref[...] = (xf * gate[:, None, :]).astype(o_ref.dtype)


def spatial_gate(x, conv_w, bn_gamma, bn_beta, bn_mean, bn_var, eps=1e-5,
                 *, batch_block=None, donate_input=False):
    """x: (N, C, H, W) f32 or bf16; conv_w: (1, 2, 7, 7); bn params: (1,) each.

    NOTE: donate_input=True aliases the kernel output onto the (reshaped) input
    buffer — only use it if the caller truly does not reuse `x` afterwards.
    """
    # TODO(synk): BatchNorm2d is folded in eval mode (running stats); training-
    # mode batch statistics are not implemented.
    N, C, H, W = x.shape
    HW = H * W
    HWp = pl.cdiv(HW, 128) * 128                    # lane-dense last dim
    dtype = x.dtype

    # Lane-dense layout; pad H*W up to a multiple of 128 (zeros) if needed.
    x_flat = x.reshape(N, C, HW)
    if HWp != HW:
        x_flat = jnp.pad(x_flat, ((0, 0), (0, 0), (0, HWp - HW)))

    # Fold eval-mode BatchNorm2d into the conv weights (scale) + scalar shift
    # (the conv has no bias, so conv(w*s) + shift == BN(conv(w))).
    inv_std = 1.0 / jnp.sqrt(bn_var.astype(jnp.float32) + eps)
    scale = (bn_gamma.astype(jnp.float32) * inv_std).reshape(())
    bn_shift = (bn_beta.astype(jnp.float32)
                - bn_mean.astype(jnp.float32) * scale).reshape(1)
    w = (conv_w.astype(jnp.float32) * scale).reshape(2, KK)   # [max; mean] taps

    # Per-tap zero-padding validity mask, baked into the weights (purely shape
    # dependent, built host-side). 1/C folded into the mean-map weights.
    ar = np.arange(HWp, dtype=np.int64)
    ys, xs, in_img = ar // W, ar % W, ar < HW
    rows = []
    for kh in range(K):
        dy = kh - PAD
        for kw in range(K):
            dx = kw - PAD
            rows.append(in_img & (ys + dy >= 0) & (ys + dy < H)
                        & (xs + dx >= 0) & (xs + dx < W))
    mask = jnp.asarray(np.stack(rows).astype(np.float32))     # (KK, HWp)
    w_max = w[0].reshape(KK, 1) * mask                        # (KK, HWp)
    w_mean = (w[1].reshape(KK, 1) / C) * mask                 # (KK, HWp)

    # Batch blocking: ~2 MiB input slab per step (keeps the BlockSpec pipeline
    # busy) and >=2 grid steps whenever N >= 2 (v7x megacore sharding).
    itemsize = jnp.dtype(dtype).itemsize
    per_sample = C * HWp * itemsize
    if batch_block is not None:
        nb = max(1, min(int(batch_block), N))
    else:
        nb = max(1, int((2 << 20) // max(per_sample, 1)))
        if N >= 2:
            nb = min(nb, max(1, N // 2))
    nb = min(nb, N)
    grid = (pl.cdiv(N, nb),)

    # VMEM budget: double-buffered in/out blocks + weight tables + headroom,
    # capped at v7x's 64 MiB physical VMEM.
    block_bytes = nb * C * HWp * itemsize
    wt_bytes = 2 * KK * HWp * 4
    vmem_limit = int(min(64 << 20,
                         max(32 << 20, 4 * block_bytes + 2 * wt_bytes + (4 << 20))))

    kernel = functools.partial(_spatial_gate_kernel, W=W, HWp=HWp)
    out = pl.pallas_call(
        kernel,
        out_shape=jax.ShapeDtypeStruct((N, C, HWp), dtype),
        grid=grid,
        in_specs=[
            pl.BlockSpec((nb, C, HWp), lambda n: (n, 0, 0)),
            pl.BlockSpec((KK, HWp), lambda n: (0, 0)),
            pl.BlockSpec((KK, HWp), lambda n: (0, 0)),
            pl.BlockSpec(memory_space=pltpu.MemorySpace.SMEM),   # bn shift
        ],
        out_specs=pl.BlockSpec((nb, C, HWp), lambda n: (n, 0, 0)),
        input_output_aliases=({0: 0} if donate_input else {}),
        compiler_params=pltpu.CompilerParams(
            dimension_semantics=("parallel",),
            vmem_limit_bytes=vmem_limit),
    )(x_flat, w_max, w_mean, bn_shift)

    if HWp != HW:
        out = out[:, :, :HW]
    return out.reshape(N, C, H, W)


def _reference(x, conv_w, bn_gamma, bn_beta, bn_mean, bn_var, eps=1e-5):
    att1 = jnp.max(x, axis=1, keepdims=True)
    att2 = jnp.mean(x, axis=1, keepdims=True)
    att = jnp.concatenate([att1, att2], axis=1)
    att = jax.lax.conv_general_dilated(
        att, conv_w, window_strides=(1, 1), padding=((PAD, PAD), (PAD, PAD)),
        dimension_numbers=("NCHW", "OIHW", "NCHW"))
    att = (att - bn_mean) / jnp.sqrt(bn_var + eps) * bn_gamma + bn_beta
    return x * jax.nn.sigmoid(att)


if __name__ == "__main__":
    key = jax.random.PRNGKey(0)
    kx, kw = jax.random.split(key)

    N, C, H, W = 2, 4, 16, 16
    x = jax.random.normal(kx, (N, C, H, W), dtype=jnp.float32)

    # Deterministic synthetic parameters (shapes from BasicConv(2, 1, 7, pad=3)).
    conv_w = 0.1 * jax.random.normal(kw, (1, 2, K, K), dtype=jnp.float32)
    bn_gamma = jnp.full((1,), 1.2, jnp.float32)
    bn_beta = jnp.full((1,), 0.1, jnp.float32)
    bn_mean = jnp.full((1,), 0.05, jnp.float32)
    bn_var = jnp.full((1,), 0.8, jnp.float32)

    out = spatial_gate(x, conv_w, bn_gamma, bn_beta, bn_mean, bn_var)
    out = jax.block_until_ready(out)

    ref = _reference(x, conv_w, bn_gamma, bn_beta, bn_mean, bn_var)
    assert out.shape == (N, C, H, W)
    max_err = float(jnp.max(jnp.abs(out - ref)))
    assert jnp.allclose(out, ref, atol=1e-4, rtol=1e-4), max_err

    print("KERNEL_OK")
</pallas_src>

<mosaic_0001>
module attributes {stable_mosaic.version = 11 : i64} {
  func.func @_spatial_gate_kernel(%arg0: i32, %arg1: memref<1x4x256xf32, #tpu.memory_space<vmem>>, %arg2: memref<49x256xf32, #tpu.memory_space<vmem>>, %arg3: memref<49x256xf32, #tpu.memory_space<vmem>>, %arg4: memref<1xf32, #tpu.memory_space<smem>>, %arg5: memref<1x4x256xf32, #tpu.memory_space<vmem>>) attributes {dimension_semantics = [#tpu.dimension_semantics<parallel>], iteration_bounds = array<i64: 2>, scalar_prefetch = 0 : i64, scratch_operands = 0 : i64, tpu.core_type = #tpu.core_type<tc>, window_params = [{transform_indices = @transform_0, window_bounds = array<i64: 1, 4, 256>}, {pipeline_mode = #tpu.pipeline_mode<synchronous>, transform_indices = @transform_1, window_bounds = array<i64: 49, 256>}, {pipeline_mode = #tpu.pipeline_mode<synchronous>, transform_indices = @transform_2, window_bounds = array<i64: 49, 256>}, {transform_indices = @transform_3, window_bounds = array<i64: 1>}, {transform_indices = @transform_4, window_bounds = array<i64: 1, 4, 256>}]} {
    %c0 = arith.constant 0 : index
    %c0_0 = arith.constant 0 : index
    %c0_1 = arith.constant 0 : index
    %0 = vector.load %arg1[%c0, %c0_0, %c0_1] : memref<1x4x256xf32, #tpu.memory_space<vmem>>, vector<1x4x256xf32>
    %cst = arith.constant dense<0xFF800000> : vector<1x256xf32>
    %1 = vector.multi_reduction <maximumf>, %0, %cst [1] : vector<1x4x256xf32> to vector<1x256xf32>
    %cst_2 = arith.constant dense<0.000000e+00> : vector<1x256xf32>
    %2 = vector.multi_reduction <add>, %0, %cst_2 [1] : vector<1x4x256xf32> to vector<1x256xf32>
    %cst_3 = arith.constant 0.000000e+00 : f32
    %3 = vector.broadcast %cst_3 : f32 to vector<1x256xf32>
    %cst_4 = arith.constant 0.000000e+00 : f32
    %4 = vector.broadcast %cst_4 : f32 to vector<1x256xf32>
    %cst_5 = arith.constant 0.000000e+00 : f32
    %5 = vector.broadcast %cst_5 : f32 to vector<1x256xf32>
    %cst_6 = arith.constant 0.000000e+00 : f32
    %6 = vector.broadcast %cst_6 : f32 to vector<1x256xf32>
    %c51_i32 = arith.constant 51 : i32
    %7 = tpu.dynamic_rotate %1 by %c51_i32 dim 1 : vector<1x256xf32>, i32 -> vector<1x256xf32>
    %c51_i32_7 = arith.constant 51 : i32
    %8 = tpu.dynamic_rotate %2 by %c51_i32_7 dim 1 : vector<1x256xf32>, i32 -> vector<1x256xf32>
    %c0_8 = arith.constant 0 : index
    %c0_9 = arith.constant 0 : index
    %9 = vector.load %arg2[%c0_8, %c0_9] : memref<49x256xf32, #tpu.memory_space<vmem>>, vector<1x256xf32>
    %10 = vector.shape_cast %9 : vector<1x256xf32> to vector<256xf32>
    %11 = vector.shape_cast %10 : vector<256xf32> to vector<1x256xf32>
    %12 = arith.mulf %7, %11 : vector<1x256xf32>
    %13 = arith.addf %3, %12 : vector<1x256xf32>
    %c0_10 = arith.constant 0 : index
    %c0_11 = arith.constant 0 : index
    %14 = vector.load %arg3[%c0_10, %c0_11] : memref<49x256xf32, #tpu.memory_space<vmem>>, vector<1x256xf32>
    %15 = vector.shape_cast %14 : vector<1x256xf32> to vector<256xf32>
    %16 = vector.shape_cast %15 : vector<256xf32> to vector<1x256xf32>
    %17 = arith.mulf %8, %16 : vector<1x256xf32>
    %18 = arith.addf %13, %17 : vector<1x256xf32>
    %c50_i32 = arith.constant 50 : i32
    %19 = tpu.dynamic_rotate %1 by %c50_i32 dim 1 : vector<1x256xf32>, i32 -> vector<1x256xf32>
    %c50_i32_12 = arith.constant 50 : i32
    %20 = tpu.dynamic_rotate %2 by %c50_i32_12 dim 1 : vector<1x256xf32>, i32 -> vector<1x256xf32>
    %c1 = arith.constant 1 : index
    %c0_13 = arith.constant 0 : index
    %21 = vector.load %arg2[%c1, %c0_13] : memref<49x256xf32, #tpu.memory_space<vmem>>, vector<1x256xf32>
    %22 = vector.shape_cast %21 : vector<1x256xf32> to vector<256xf32>
    %23 = vector.shape_cast %22 : vector<256xf32> to vector<1x256xf32>
    %24 = arith.mulf %19, %23 : vector<1x256xf32>
    %25 = arith.addf %4, %24 : vector<1x256xf32>
    %c1_14 = arith.constant 1 : index
    %c0_15 = arith.constant 0 : index
    %26 = vector.load %arg3[%c1_14, %c0_15] : memref<49x256xf32, #tpu.memory_space<vmem>>, vector<1x256xf32>
    %27 = vector.shape_cast %26 : vector<1x256xf32> to vector<256xf32>
    %28 = vector.shape_cast %27 : vector<256xf32> to vector<1x256xf32>
    %29 = arith.mulf %20, %28 : vector<1x256xf32>
    %30 = arith.addf %25, %29 : vector<1x256xf32>
    %c49_i32 = arith.constant 49 : i32
    %31 = tpu.dynamic_rotate %1 by %c49_i32 dim 1 : vector<1x256xf32>, i32 -> vector<1x256xf32>
    %c49_i32_16 = arith.constant 49 : i32
    %32 = tpu.dynamic_rotate %2 by %c49_i32_16 dim 1 : vector<1x256xf32>, i32 -> vector<1x256xf32>
    %c2 = arith.constant 2 : index
    %c0_17 = arith.constant 0 : index
    %33 = vector.load %arg2[%c2, %c0_17] : memref<49x256xf32, #tpu.memory_space<vmem>>, vector<1x256xf32>
    %34 = vector.shape_cast %33 : vector<1x256xf32> to vector<256xf32>
    %35 = vector.shape_cast %34 : vector<256xf32> to vector<1x256xf32>
    %36 = arith.mulf %31, %35 : vector<1x256xf32>
    %37 = arith.addf %5, %36 : vector<1x256xf32>
    %c2_18 = arith.constant 2 : index
    %c0_19 = arith.constant 0 : index
    %38 = vector.load %arg3[%c2_18, %c0_19] : memref<49x256xf32, #tpu.memory_space<vmem>>, vector<1x256xf32>
    %39 = vector.shape_cast %38 : vector<1x256xf32> to vector<256xf32>
    %40 = vector.shape_cast %39 : vector<256xf32> to vector<1x256xf32>
    %41 = arith.mulf %32, %40 : vector<1x256xf32>
    %42 = arith.addf %37, %41 : vector<1x256xf32>
    %c48_i32 = arith.constant 48 : i32
    %43 = tpu.dynamic_rotate %1 by %c48_i32 dim 1 : vector<1x256xf32>, i32 -> vector<1x256xf32>
    %c48_i32_20 = arith.constant 48 : i32
    %44 = tpu.dynamic_rotate %2 by %c48_i32_20 dim 1 : vector<1x256xf32>, i32 -> vector<1x256xf32>
    %c3 = arith.constant 3 : index
    %c0_21 = arith.constant 0 : index
    %45 = vector.load %arg2[%c3, %c0_21] : memref<49x256xf32, #tpu.memory_space<vmem>>, vector<1x256xf32>
    %46 = vector.shape_cast %45 : vector<1x256xf32> to vector<256xf32>
    %47 = vector.shape_cast %46 : vector<256xf32> to vector<1x256xf32>
    %48 = arith.mulf %43, %47 : vector<1x256xf32>
    %49 = arith.addf %6, %48 : vector<1x256xf32>
    %c3_22 = arith.constant 3 : index
    %c0_23 = arith.constant 0 : index
    %50 = vector.load %arg3[%c3_22, %c0_23] : memref<49x256xf32, #tpu.memory_space<vmem>>, vector<1x256xf32>
    %51 = vector.shape_cast %50 : vector<1x256xf32> to vector<256xf32>
    %52 = vector.shape_cast %51 : vector<256xf32> to vector<1x256xf32>
    %53 = arith.mulf %44, %52 : vector<1x256xf32>
    %54 = arith.addf %49, %53 : vector<1x256xf32>
    %c47_i32 = arith.constant 47 : i32
    %55 = tpu.dynamic_rotate %1 by %c47_i32 dim 1 : vector<1x256xf32>, i32 -> vector<1x256xf32>
    %c47_i32_24 = arith.constant 47 : i32
    %56 = tpu.dynamic_rotate %2 by %c47_i32_24 dim 1 : vector<1x256xf32>, i32 -> vector<1x256xf32>
    %c4 = arith.constant 4 : index
    %c0_25 = arith.constant 0 : index
    %57 = vector.load %arg2[%c4, %c0_25] : memref<49x256xf32, #tpu.memory_space<vmem>>, vector<1x256xf32>
    %58 = vector.shape_cast %57 : vector<1x256xf32> to vector<256xf32>
    %59 = vector.shape_cast %58 : vector<256xf32> to vector<1x256xf32>
    %60 = arith.mulf %55, %59 : vector<1x256xf32>
    %61 = arith.addf %18, %60 : vector<1x256xf32>
    %c4_26 = arith.constant 4 : index
    %c0_27 = arith.constant 0 : index
    %62 = vector.load %arg3[%c4_26, %c0_27] : memref<49x256xf32, #tpu.memory_space<vmem>>, vector<1x256xf32>
    %63 = vector.shape_cast %62 : vector<1x256xf32> to vector<256xf32>
    %64 = vector.shape_cast %63 : vector<256xf32> to vector<1x256xf32>
    %65 = arith.mulf %56, %64 : vector<1x256xf32>
    %66 = arith.addf %61, %65 : vector<1x256xf32>
    %c46_i32 = arith.constant 46 : i32
    %67 = tpu.dynamic_rotate %1 by %c46_i32 dim 1 : vector<1x256xf32>, i32 -> vector<1x256xf32>
    %c46_i32_28 = arith.constant 46 : i32
    %68 = tpu.dynamic_rotate %2 by %c46_i32_28 dim 1 : vector<1x256xf32>, i32 -> vector<1x256xf32>
    %c5 = arith.constant 5 : index
    %c0_29 = arith.constant 0 : index
    %69 = vector.load %arg2[%c5, %c0_29] : memref<49x256xf32, #tpu.memory_space<vmem>>, vector<1x256xf32>
    %70 = vector.shape_cast %69 : vector<1x256xf32> to vector<256xf32>
    %71 = vector.shape_cast %70 : vector<256xf32> to vector<1x256xf32>
    %72 = arith.mulf %67, %71 : vector<1x256xf32>
    %73 = arith.addf %30, %72 : vector<1x256xf32>
    %c5_30 = arith.constant 5 : index
    %c0_31 = arith.constant 0 : index
    %74 = vector.load %arg3[%c5_30, %c0_31] : memref<49x256xf32, #tpu.memory_space<vmem>>, vector<1x256xf32>
    %75 = vector.shape_cast %74 : vector<1x256xf32> to vector<256xf32>
    %76 = vector.shape_cast %75 : vector<256xf32> to vector<1x256xf32>
    %77 = arith.mulf %68, %76 : vector<1x256xf32>
    %78 = arith.addf %73, %77 : vector<1x256xf32>
    %c45_i32 = arith.constant 45 : i32
    %79 = tpu.dynamic_rotate %1 by %c45_i32 dim 1 : vector<1x256xf32>, i32 -> vector<1x256xf32>
    %c45_i32_32 = arith.constant 45 : i32
    %80 = tpu.dynamic_rotate %2 by %c45_i32_32 dim 1 : vector<1x256xf32>, i32 -> vector<1x256xf32>
    %c6 = arith.constant 6 : index
    %c0_33 = arith.constant 0 : index
    %81 = vector.load %arg2[%c6, %c0_33] : memref<49x256xf32, #tpu.memory_space<vmem>>, vector<1x256xf32>
    %82 = vector.shape_cast %81 : vector<1x256xf32> to vector<256xf32>
    %83 = vector.shape_cast %82 : vector<256xf32> to vector<1x256xf32>
    %84 = arith.mulf %79, %83 : vector<1x256xf32>
    %85 = arith.addf %42, %84 : vector<1x256xf32>
    %c6_34 = arith.constant 6 : index
    %c0_35 = arith.constant 0 : index
    %86 = vector.load %arg3[%c6_34, %c0_35] : memref<49x256xf32, #tpu.memory_space<vmem>>, vector<1x256xf32>
    %87 = vector.shape_cast %86 : vector<1x256xf32> to vector<256xf32>
    %88 = vector.shape_cast %87 : vector<256xf32> to vector<1x256xf32>
    %89 = arith.mulf %80, %88 : vector<1x256xf32>
    %90 = arith.addf %85, %89 : vector<1x256xf32>
    %c35_i32 = arith.constant 35 : i32
    %91 = tpu.dynamic_rotate %1 by %c35_i32 dim 1 : vector<1x256xf32>, i32 -> vector<1x256xf32>
    %c35_i32_36 = arith.constant 35 : i32
    %92 = tpu.dynamic_rotate %2 by %c35_i32_36 dim 1 : vector<1x256xf32>, i32 -> vector<1x256xf32>
    %c7 = arith.constant 7 : index
    %c0_37 = arith.constant 0 : index
    %93 = vector.load %arg2[%c7, %c0_37] : memref<49x256xf32, #tpu.memory_space<vmem>>, vector<1x256xf32>
    %94 = vector.shape_cast %93 : vector<1x256xf32> to vector<256xf32>
    %95 = vector.shape_cast %94 : vector<256xf32> to vector<1x256xf32>
    %96 = arith.mulf %91, %95 : vector<1x256xf32>
    %97 = arith.addf %54, %96 : vector<1x256xf32>
    %c7_38 = arith.constant 7 : index
    %c0_39 = arith.constant 0 : index
    %98 = vector.load %arg3[%c7_38, %c0_39] : memref<49x256xf32, #tpu.memory_space<vmem>>, vector<1x256xf32>
    %99 = vector.shape_cast %98 : vector<1x256xf32> to vector<256xf32>
    %100 = vector.shape_cast %99 : vector<256xf32> to vector<1x256xf32>
    %101 = arith.mulf %92, %100 : vector<1x256xf32>
    %102 = arith.addf %97, %101 : vector<1x256xf32>
    %c34_i32 = arith.constant 34 : i32
    %103 = tpu.dynamic_rotate %1 by %c34_i32 dim 1 : vector<1x256xf32>, i32 -> vector<1x256xf32>
    %c34_i32_40 = arith.constant 34 : i32
    %104 = tpu.dynamic_rotate %2 by %c34_i32_40 dim 1 : vector<1x256xf32>, i32 -> vector<1x256xf32>
    %c8 = arith.constant 8 : index
    %c0_41 = arith.constant 0 : index
    %105 = vector.load %arg2[%c8, %c0_41] : memref<49x256xf32, #tpu.memory_space<vmem>>, vector<1x256xf32>
    %106 = vector.shape_cast %105 : vector<1x256xf32> to vector<256xf32>
    %107 = vector.shape_cast %106 : vector<256xf32> to vector<1x256xf32>
    %108 = arith.mulf %103, %107 : vector<1x256xf32>
    %109 = arith.addf %66, %108 : vector<1x256xf32>
    %c8_42 = arith.constant 8 : index
    %c0_43 = arith.constant 0 : index
    %110 = vector.load %arg3[%c8_42, %c0_43] : memref<49x256xf32, #tpu.memory_space<vmem>>, vector<1x256xf32>
    %111 = vector.shape_cast %110 : vector<1x256xf32> to vector<256xf32>
    %112 = vector.shape_cast %111 : vector<256xf32> to vector<1x256xf32>
    %113 = arith.mulf %104, %112 : vector<1x256xf32>
    %114 = arith.addf %109, %113 : vector<1x256xf32>
    %c33_i32 = arith.constant 33 : i32
    %115 = tpu.dynamic_rotate %1 by %c33_i32 dim 1 : vector<1x256xf32>, i32 -> vector<1x256xf32>
    %c33_i32_44 = arith.constant 33 : i32
    %116 = tpu.dynamic_rotate %2 by %c33_i32_44 dim 1 : vector<1x256xf32>, i32 -> vector<1x256xf32>
    %c9 = arith.constant 9 : index
    %c0_45 = arith.constant 0 : index
    %117 = vector.load %arg2[%c9, %c0_45] : memref<49x256xf32, #tpu.memory_space<vmem>>, vector<1x256xf32>
    %118 = vector.shape_cast %117 : vector<1x256xf32> to vector<256xf32>
    %119 = vector.shape_cast %118 : vector<256xf32> to vector<1x256xf32>
    %120 = arith.mulf %115, %119 : vector<1x256xf32>
    %121 = arith.addf %78, %120 : vector<1x256xf32>
    %c9_46 = arith.constant 9 : index
    %c0_47 = arith.constant 0 : index
    %122 = vector.load %arg3[%c9_46, %c0_47] : memref<49x256xf32, #tpu.memory_space<vmem>>, vector<1x256xf32>
    %123 = vector.shape_cast %122 : vector<1x256xf32> to vector<256xf32>
    %124 = vector.shape_cast %123 : vector<256xf32> to vector<1x256xf32>
    %125 = arith.mulf %116, %124 : vector<1x256xf32>
    %126 = arith.addf %121, %125 : vector<1x256xf32>
    %c32_i32 = arith.constant 32 : i32
    %127 = tpu.dynamic_rotate %1 by %c32_i32 dim 1 : vector<1x256xf32>, i32 -> vector<1x256xf32>
    %c32_i32_48 = arith.constant 32 : i32
    %128 = tpu.dynamic_rotate %2 by %c32_i32_48 dim 1 : vector<1x256xf32>, i32 -> vector<1x256xf32>
    %c10 = arith.constant 10 : index
    %c0_49 = arith.constant 0 : index
    %129 = vector.load %arg2[%c10, %c0_49] : memref<49x256xf32, #tpu.memory_space<vmem>>, vector<1x256xf32>
    %130 = vector.shape_cast %129 : vector<1x256xf32> to vector<256xf32>
    %131 = vector.shape_cast %130 : vector<256xf32> to vector<1x256xf32>
    %132 = arith.mulf %127, %131 : vector<1x256xf32>
    %133 = arith.addf %90, %132 : vector<1x256xf32>
    %c10_50 = arith.constant 10 : index
    %c0_51 = arith.constant 0 : index
    %134 = vector.load %arg3[%c10_50, %c0_51] : memref<49x256xf32, #tpu.memory_space<vmem>>, vector<1x256xf32>
    %135 = vector.shape_cast %134 : vector<1x256xf32> to vector<256xf32>
    %136 = vector.shape_cast %135 : vector<256xf32> to vector<1x256xf32>
    %137 = arith.mulf %128, %136 : vector<1x256xf32>
    %138 = arith.addf %133, %137 : vector<1x256xf32>
    %c31_i32 = arith.constant 31 : i32
    %139 = tpu.dynamic_rotate %1 by %c31_i32 dim 1 : vector<1x256xf32>, i32 -> vector<1x256xf32>
    %c31_i32_52 = arith.constant 31 : i32
    %140 = tpu.dynamic_rotate %2 by %c31_i32_52 dim 1 : vector<1x256xf32>, i32 -> vector<1x256xf32>
    %c11 = arith.constant 11 : index
    %c0_53 = arith.constant 0 : index
    %141 = vector.load %arg2[%c11, %c0_53] : memref<49x256xf32, #tpu.memory_space<vmem>>, vector<1x256xf32>
    %142 = vector.shape_cast %141 : vector<1x256xf32> to vector<256xf32>
    %143 = vector.shape_cast %142 : vector<256xf32> to vector<1x256xf32>
    %144 = arith.mulf %139, %143 : vector<1x256xf32>
    %145 = arith.addf %102, %144 : vector<1x256xf32>
    %c11_54 = arith.constant 11 : index
    %c0_55 = arith.constant 0 : index
    %146 = vector.load %arg3[%c11_54, %c0_55] : memref<49x256xf32, #tpu.memory_space<vmem>>, vector<1x256xf32>
    %147 = vector.shape_cast %146 : vector<1x256xf32> to vector<256xf32>
    %148 = vector.shape_cast %147 : vector<256xf32> to vector<1x256xf32>
    %149 = arith.mulf %140, %148 : vector<1x256xf32>
    %150 = arith.addf %145, %149 : vector<1x256xf32>
    %c30_i32 = arith.constant 30 : i32
    %151 = tpu.dynamic_rotate %1 by %c30_i32 dim 1 : vector<1x256xf32>, i32 -> vector<1x256xf32>
    %c30_i32_56 = arith.constant 30 : i32
    %152 = tpu.dynamic_rotate %2 by %c30_i32_56 dim 1 : vector<1x256xf32>, i32 -> vector<1x256xf32>
    %c12 = arith.constant 12 : index
    %c0_57 = arith.constant 0 : index
    %153 = vector.load %arg2[%c12, %c0_57] : memref<49x256xf32, #tpu.memory_space<vmem>>, vector<1x256xf32>
    %154 = vector.shape_cast %153 : vector<1x256xf32> to vector<256xf32>
    %155 = vector.shape_cast %154 : vector<256xf32> to vector<1x256xf32>
    %156 = arith.mulf %151, %155 : vector<1x256xf32>
    %157 = arith.addf %114, %156 : vector<1x256xf32>
    %c12_58 = arith.constant 12 : index
    %c0_59 = arith.constant 0 : index
    %158 = vector.load %arg3[%c12_58, %c0_59] : memref<49x256xf32, #tpu.memory_space<vmem>>, vector<1x256xf32>
    %159 = vector.shape_cast %158 : vector<1x256xf32> to vector<256xf32>
    %160 = vector.shape_cast %159 : vector<256xf32> to vector<1x256xf32>
    %161 = arith.mulf %152, %160 : vector<1x256xf32>
    %162 = arith.addf %157, %161 : vector<1x256xf32>
    %c29_i32 = arith.constant 29 : i32
    %163 = tpu.dynamic_rotate %1 by %c29_i32 dim 1 : vector<1x256xf32>, i32 -> vector<1x256xf32>
    %c29_i32_60 = arith.constant 29 : i32
    %164 = tpu.dynamic_rotate %2 by %c29_i32_60 dim 1 : vector<1x256xf32>, i32 -> vector<1x256xf32>
    %c13 = arith.constant 13 : index
    %c0_61 = arith.constant 0 : index
    %165 = vector.load %arg2[%c13, %c0_61] : memref<49x256xf32, #tpu.memory_space<vmem>>, vector<1x256xf32>
    %166 = vector.shape_cast %165 : vector<1x256xf32> to vector<256xf32>
    %167 = vector.shape_cast %166 : vector<256xf32> to vector<1x256xf32>
    %168 = arith.mulf %163, %167 : vector<1x256xf32>
    %169 = arith.addf %126, %168 : vector<1x256xf32>
    %c13_62 = arith.constant 13 : index
    %c0_63 = arith.constant 0 : index
    %170 = vector.load %arg3[%c13_62, %c0_63] : memref<49x256xf32, #tpu.memory_space<vmem>>, vector<1x256xf32>
    %171 = vector.shape_cast %170 : vector<1x256xf32> to vector<256xf32>
    %172 = vector.shape_cast %171 : vector<256xf32> to vector<1x256xf32>
    %173 = arith.mulf %164, %172 : vector<1x256xf32>
    %174 = arith.addf %169, %173 : vector<1x256xf32>
    %c19_i32 = arith.constant 19 : i32
    %175 = tpu.dynamic_rotate %1 by %c19_i32 dim 1 : vector<1x256xf32>, i32 -> vector<1x256xf32>
    %c19_i32_64 = arith.constant 19 : i32
    %176 = tpu.dynamic_rotate %2 by %c19_i32_64 dim 1 : vector<1x256xf32>, i32 -> vector<1x256xf32>
    %c14 = arith.constant 14 : index
    %c0_65 = arith.constant 0 : index
    %177 = vector.load %arg2[%c14, %c0_65] : memref<49x256xf32, #tpu.memory_space<vmem>>, vector<1x256xf32>
    %178 = vector.shape_cast %177 : vector<1x256xf32> to vector<256xf32>
    %179 = vector.shape_cast %178 : vector<256xf32> to vector<1x256xf32>
    %180 = arith.mulf %175, %179 : vector<1x256xf32>
    %181 = arith.addf %138, %180 : vector<1x256xf32>
    %c14_66 = arith.constant 14 : index
    %c0_67 = arith.constant 0 : index
    %182 = vector.load %arg3[%c14_66, %c0_67] : memref<49x256xf32, #tpu.memory_space<vmem>>, vector<1x256xf32>
    %183 = vector.shape_cast %182 : vector<1x256xf32> to vector<256xf32>
    %184 = vector.shape_cast %183 : vector<256xf32> to vector<1x256xf32>
    %185 = arith.mulf %176, %184 : vector<1x256xf32>
    %186 = arith.addf %181, %185 : vector<1x256xf32>
    %c18_i32 = arith.constant 18 : i32
    %187 = tpu.dynamic_rotate %1 by %c18_i32 dim 1 : vector<1x256xf32>, i32 -> vector<1x256xf32>
    %c18_i32_68 = arith.constant 18 : i32
    %188 = tpu.dynamic_rotate %2 by %c18_i32_68 dim 1 : vector<1x256xf32>, i32 -> vector<1x256xf32>
    %c15 = arith.constant 15 : index
    %c0_69 = arith.constant 0 : index
    %189 = vector.load %arg2[%c15, %c0_69] : memref<49x256xf32, #tpu.memory_space<vmem>>, vector<1x256xf32>
    %190 = vector.shape_cast %189 : vector<1x256xf32> to vector<256xf32>
    %191 = vector.shape_cast %190 : vector<256xf32> to vector<1x256xf32>
    %192 = arith.mulf %187, %191 : vector<1x256xf32>
    %193 = arith.addf %150, %192 : vector<1x256xf32>
    %c15_70 = arith.constant 15 : index
    %c0_71 = arith.constant 0 : index
    %194 = vector.load %arg3[%c15_70, %c0_71] : memref<49x256xf32, #tpu.memory_space<vmem>>, vector<1x256xf32>
    %195 = vector.shape_cast %194 : vector<1x256xf32> to vector<256xf32>
    %196 = vector.shape_cast %195 : vector<256xf32> to vector<1x256xf32>
    %197 = arith.mulf %188, %196 : vector<1x256xf32>
    %198 = arith.addf %193, %197 : vector<1x256xf32>
    %c17_i32 = arith.constant 17 : i32
    %199 = tpu.dynamic_rotate %1 by %c17_i32 dim 1 : vector<1x256xf32>, i32 -> vector<1x256xf32>
    %c17_i32_72 = arith.constant 17 : i32
    %200 = tpu.dynamic_rotate %2 by %c17_i32_72 dim 1 : vector<1x256xf32>, i32 -> vector<1x256xf32>
    %c16 = arith.constant 16 : index
    %c0_73 = arith.constant 0 : index
    %201 = vector.load %arg2[%c16, %c0_73] : memref<49x256xf32, #tpu.memory_space<vmem>>, vector<1x256xf32>
    %202 = vector.shape_cast %201 : vector<1x256xf32> to vector<256xf32>
    %203 = vector.shape_cast %202 : vector<256xf32> to vector<1x256xf32>
    %204 = arith.mulf %199, %203 : vector<1x256xf32>
    %205 = arith.addf %162, %204 : vector<1x256xf32>
    %c16_74 = arith.constant 16 : index
    %c0_75 = arith.constant 0 : index
    %206 = vector.load %arg3[%c16_74, %c0_75] : memref<49x256xf32, #tpu.memory_space<vmem>>, vector<1x256xf32>
    %207 = vector.shape_cast %206 : vector<1x256xf32> to vector<256xf32>
    %208 = vector.shape_cast %207 : vector<256xf32> to vector<1x256xf32>
    %209 = arith.mulf %200, %208 : vector<1x256xf32>
    %210 = arith.addf %205, %209 : vector<1x256xf32>
    %c16_i32 = arith.constant 16 : i32
    %211 = tpu.dynamic_rotate %1 by %c16_i32 dim 1 : vector<1x256xf32>, i32 -> vector<1x256xf32>
    %c16_i32_76 = arith.constant 16 : i32
    %212 = tpu.dynamic_rotate %2 by %c16_i32_76 dim 1 : vector<1x256xf32>, i32 -> vector<1x256xf32>
    %c17 = arith.constant 17 : index
    %c0_77 = arith.constant 0 : index
    %213 = vector.load %arg2[%c17, %c0_77] : memref<49x256xf32, #tpu.memory_space<vmem>>, vector<1x256xf32>
    %214 = vector.shape_cast %213 : vector<1x256xf32> to vector<256xf32>
    %215 = vector.shape_cast %214 : vector<256xf32> to vector<1x256xf32>
    %216 = arith.mulf %211, %215 : vector<1x256xf32>
    %217 = arith.addf %174, %216 : vector<1x256xf32>
    %c17_78 = arith.constant 17 : index
    %c0_79 = arith.constant 0 : index
    %218 = vector.load %arg3[%c17_78, %c0_79] : memref<49x256xf32, #tpu.memory_space<vmem>>, vector<1x256xf32>
    %219 = vector.shape_cast %218 : vector<1x256xf32> to vector<256xf32>
    %220 = vector.shape_cast %219 : vector<256xf32> to vector<1x256xf32>
    %221 = arith.mulf %212, %220 : vector<1x256xf32>
    %222 = arith.addf %217, %221 : vector<1x256xf32>
    %c15_i32 = arith.constant 15 : i32
    %223 = tpu.dynamic_rotate %1 by %c15_i32 dim 1 : vector<1x256xf32>, i32 -> vector<1x256xf32>
    %c15_i32_80 = arith.constant 15 : i32
    %224 = tpu.dynamic_rotate %2 by %c15_i32_80 dim 1 : vector<1x256xf32>, i32 -> vector<1x256xf32>
    %c18 = arith.constant 18 : index
    %c0_81 = arith.constant 0 : index
    %225 = vector.load %arg2[%c18, %c0_81] : memref<49x256xf32, #tpu.memory_space<vmem>>, vector<1x256xf32>
    %226 = vector.shape_cast %225 : vector<1x256xf32> to vector<256xf32>
    %227 = vector.shape_cast %226 : vector<256xf32> to vector<1x256xf32>
    %228 = arith.mulf %223, %227 : vector<1x256xf32>
    %229 = arith.addf %186, %228 : vector<1x256xf32>
    %c18_82 = arith.constant 18 : index
    %c0_83 = arith.constant 0 : index
    %230 = vector.load %arg3[%c18_82, %c0_83] : memref<49x256xf32, #tpu.memory_space<vmem>>, vector<1x256xf32>
    %231 = vector.shape_cast %230 : vector<1x256xf32> to vector<256xf32>
    %232 = vector.shape_cast %231 : vector<256xf32> to vector<1x256xf32>
    %233 = arith.mulf %224, %232 : vector<1x256xf32>
    %234 = arith.addf %229, %233 : vector<1x256xf32>
    %c14_i32 = arith.constant 14 : i32
    %235 = tpu.dynamic_rotate %1 by %c14_i32 dim 1 : vector<1x256xf32>, i32 -> vector<1x256xf32>
    %c14_i32_84 = arith.constant 14 : i32
    %236 = tpu.dynamic_rotate %2 by %c14_i32_84 dim 1 : vector<1x256xf32>, i32 -> vector<1x256xf32>
    %c19 = arith.constant 19 : index
    %c0_85 = arith.constant 0 : index
    %237 = vector.load %arg2[%c19, %c0_85] : memref<49x256xf32, #tpu.memory_space<vmem>>, vector<1x256xf32>
    %238 = vector.shape_cast %237 : vector<1x256xf32> to vector<256xf32>
    %239 = vector.shape_cast %238 : vector<256xf32> to vector<1x256xf32>
    %240 = arith.mulf %235, %239 : vector<1x256xf32>
    %241 = arith.addf %198, %240 : vector<1x256xf32>
    %c19_86 = arith.constant 19 : index
    %c0_87 = arith.constant 0 : index
    %242 = vector.load %arg3[%c19_86, %c0_87] : memref<49x256xf32, #tpu.memory_space<vmem>>, vector<1x256xf32>
    %243 = vector.shape_cast %242 : vector<1x256xf32> to vector<256xf32>
    %244 = vector.shape_cast %243 : vector<256xf32> to vector<1x256xf32>
    %245 = arith.mulf %236, %244 : vector<1x256xf32>
    %246 = arith.addf %241, %245 : vector<1x256xf32>
    %c13_i32 = arith.constant 13 : i32
    %247 = tpu.dynamic_rotate %1 by %c13_i32 dim 1 : vector<1x256xf32>, i32 -> vector<1x256xf32>
    %c13_i32_88 = arith.constant 13 : i32
    %248 = tpu.dynamic_rotate %2 by %c13_i32_88 dim 1 : vector<1x256xf32>, i32 -> vector<1x256xf32>
    %c20 = arith.constant 20 : index
    %c0_89 = arith.constant 0 : index
    %249 = vector.load %arg2[%c20, %c0_89] : memref<49x256xf32, #tpu.memory_space<vmem>>, vector<1x256xf32>
    %250 = vector.shape_cast %249 : vector<1x256xf32> to vector<256xf32>
    %251 = vector.shape_cast %250 : vector<256xf32> to vector<1x256xf32>
    %252 = arith.mulf %247, %251 : vector<1x256xf32>
    %253 = arith.addf %210, %252 : vector<1x256xf32>
    %c20_90 = arith.constant 20 : index
    %c0_91 = arith.constant 0 : index
    %254 = vector.load %arg3[%c20_90, %c0_91] : memref<49x256xf32, #tpu.memory_space<vmem>>, vector<1x256xf32>
    %255 = vector.shape_cast %254 : vector<1x256xf32> to vector<256xf32>
    %256 = vector.shape_cast %255 : vector<256xf32> to vector<1x256xf32>
    %257 = arith.mulf %248, %256 : vector<1x256xf32>
    %258 = arith.addf %253, %257 : vector<1x256xf32>
    %c3_i32 = arith.constant 3 : i32
    %259 = tpu.dynamic_rotate %1 by %c3_i32 dim 1 : vector<1x256xf32>, i32 -> vector<1x256xf32>
    %c3_i32_92 = arith.constant 3 : i32
    %260 = tpu.dynamic_rotate %2 by %c3_i32_92 dim 1 : vector<1x256xf32>, i32 -> vector<1x256xf32>
    %c21 = arith.constant 21 : index
    %c0_93 = arith.constant 0 : index
    %261 = vector.load %arg2[%c21, %c0_93] : memref<49x256xf32, #tpu.memory_space<vmem>>, vector<1x256xf32>
    %262 = vector.shape_cast %261 : vector<1x256xf32> to vector<256xf32>
    %263 = vector.shape_cast %262 : vector<256xf32> to vector<1x256xf32>
    %264 = arith.mulf %259, %263 : vector<1x256xf32>
    %265 = arith.addf %222, %264 : vector<1x256xf32>
    %c21_94 = arith.constant 21 : index
    %c0_95 = arith.constant 0 : index
    %266 = vector.load %arg3[%c21_94, %c0_95] : memref<49x256xf32, #tpu.memory_space<vmem>>, vector<1x256xf32>
    %267 = vector.shape_cast %266 : vector<1x256xf32> to vector<256xf32>
    %268 = vector.shape_cast %267 : vector<256xf32> to vector<1x256xf32>
    %269 = arith.mulf %260, %268 : vector<1x256xf32>
    %270 = arith.addf %265, %269 : vector<1x256xf32>
    %c2_i32 = arith.constant 2 : i32
    %271 = tpu.dynamic_rotate %1 by %c2_i32 dim 1 : vector<1x256xf32>, i32 -> vector<1x256xf32>
    %c2_i32_96 = arith.constant 2 : i32
    %272 = tpu.dynamic_rotate %2 by %c2_i32_96 dim 1 : vector<1x256xf32>, i32 -> vector<1x256xf32>
    %c22 = arith.constant 22 : index
    %c0_97 = arith.constant 0 : index
    %273 = vector.load %arg2[%c22, %c0_97] : memref<49x256xf32, #tpu.memory_space<vmem>>, vector<1x256xf32>
    %274 = vector.shape_cast %273 : vector<1x256xf32> to vector<256xf32>
    %275 = vector.shape_cast %274 : vector<256xf32> to vector<1x256xf32>
    %276 = arith.mulf %271, %275 : vector<1x256xf32>
    %277 = arith.addf %234, %276 : vector<1x256xf32>
    %c22_98 = arith.constant 22 : index
    %c0_99 = arith.constant 0 : index
    %278 = vector.load %arg3[%c22_98, %c0_99] : memref<49x256xf32, #tpu.memory_space<vmem>>, vector<1x256xf32>
    %279 = vector.shape_cast %278 : vector<1x256xf32> to vector<256xf32>
    %280 = vector.shape_cast %279 : vector<256xf32> to vector<1x256xf32>
    %281 = arith.mulf %272, %280 : vector<1x256xf32>
    %282 = arith.addf %277, %281 : vector<1x256xf32>
    %c1_i32 = arith.constant 1 : i32
    %283 = tpu.dynamic_rotate %1 by %c1_i32 dim 1 : vector<1x256xf32>, i32 -> vector<1x256xf32>
    %c1_i32_100 = arith.constant 1 : i32
    %284 = tpu.dynamic_rotate %2 by %c1_i32_100 dim 1 : vector<1x256xf32>, i32 -> vector<1x256xf32>
    %c23 = arith.constant 23 : index
    %c0_101 = arith.constant 0 : index
    %285 = vector.load %arg2[%c23, %c0_101] : memref<49x256xf32, #tpu.memory_space<vmem>>, vector<1x256xf32>
    %286 = vector.shape_cast %285 : vector<1x256xf32> to vector<256xf32>
    %287 = vector.shape_cast %286 : vector<256xf32> to vector<1x256xf32>
    %288 = arith.mulf %283, %287 : vector<1x256xf32>
    %289 = arith.addf %246, %288 : vector<1x256xf32>
    %c23_102 = arith.constant 23 : index
    %c0_103 = arith.constant 0 : index
    %290 = vector.load %arg3[%c23_102, %c0_103] : memref<49x256xf32, #tpu.memory_space<vmem>>, vector<1x256xf32>
    %291 = vector.shape_cast %290 : vector<1x256xf32> to vector<256xf32>
    %292 = vector.shape_cast %291 : vector<256xf32> to vector<1x256xf32>
    %293 = arith.mulf %284, %292 : vector<1x256xf32>
    %294 = arith.addf %289, %293 : vector<1x256xf32>
    %c24 = arith.constant 24 : index
    %c0_104 = arith.constant 0 : index
    %295 = vector.load %arg2[%c24, %c0_104] : memref<49x256xf32, #tpu.memory_space<vmem>>, vector<1x256xf32>
    %296 = vector.shape_cast %295 : vector<1x256xf32> to vector<256xf32>
    %297 = vector.shape_cast %296 : vector<256xf32> to vector<1x256xf32>
    %298 = arith.mulf %1, %297 : vector<1x256xf32>
    %299 = arith.addf %258, %298 : vector<1x256xf32>
    %c24_105 = arith.constant 24 : index
    %c0_106 = arith.constant 0 : index
    %300 = vector.load %arg3[%c24_105, %c0_106] : memref<49x256xf32, #tpu.memory_space<vmem>>, vector<1x256xf32>
    %301 = vector.shape_cast %300 : vector<1x256xf32> to vector<256xf32>
    %302 = vector.shape_cast %301 : vector<256xf32> to vector<1x256xf32>
    %303 = arith.mulf %2, %302 : vector<1x256xf32>
    %304 = arith.addf %299, %303 : vector<1x256xf32>
    %c255_i32 = arith.constant 255 : i32
    %305 = tpu.dynamic_rotate %1 by %c255_i32 dim 1 : vector<1x256xf32>, i32 -> vector<1x256xf32>
    %c255_i32_107 = arith.constant 255 : i32
    %306 = tpu.dynamic_rotate %2 by %c255_i32_107 dim 1 : vector<1x256xf32>, i32 -> vector<1x256xf32>
    %c25 = arith.constant 25 : index
    %c0_108 = arith.constant 0 : index
    %307 = vector.load %arg2[%c25, %c0_108] : memref<49x256xf32, #tpu.memory_space<vmem>>, vector<1x256xf32>
    %308 = vector.shape_cast %307 : vector<1x256xf32> to vector<256xf32>
    %309 = vector.shape_cast %308 : vector<256xf32> to vector<1x256xf32>
    %310 = arith.mulf %305, %309 : vector<1x256xf32>
    %311 = arith.addf %270, %310 : vector<1x256xf32>
    %c25_109 = arith.constant 25 : index
    %c0_110 = arith.constant 0 : index
    %312 = vector.load %arg3[%c25_109, %c0_110] : memref<49x256xf32, #tpu.memory_space<vmem>>, vector<1x256xf32>
    %313 = vector.shape_cast %312 : vector<1x256xf32> to vector<256xf32>
    %314 = vector.shape_cast %313 : vector<256xf32> to vector<1x256xf32>
    %315 = arith.mulf %306, %314 : vector<1x256xf32>
    %316 = arith.addf %311, %315 : vector<1x256xf32>
    %c254_i32 = arith.constant 254 : i32
    %317 = tpu.dynamic_rotate %1 by %c254_i32 dim 1 : vector<1x256xf32>, i32 -> vector<1x256xf32>
    %c254_i32_111 = arith.constant 254 : i32
    %318 = tpu.dynamic_rotate %2 by %c254_i32_111 dim 1 : vector<1x256xf32>, i32 -> vector<1x256xf32>
    %c26 = arith.constant 26 : index
    %c0_112 = arith.constant 0 : index
    %319 = vector.load %arg2[%c26, %c0_112] : memref<49x256xf32, #tpu.memory_space<vmem>>, vector<1x256xf32>
    %320 = vector.shape_cast %319 : vector<1x256xf32> to vector<256xf32>
    %321 = vector.shape_cast %320 : vector<256xf32> to vector<1x256xf32>
    %322 = arith.mulf %317, %321 : vector<1x256xf32>
    %323 = arith.addf %282, %322 : vector<1x256xf32>
    %c26_113 = arith.constant 26 : index
    %c0_114 = arith.constant 0 : index
    %324 = vector.load %arg3[%c26_113, %c0_114] : memref<49x256xf32, #tpu.memory_space<vmem>>, vector<1x256xf32>
    %325 = vector.shape_cast %324 : vector<1x256xf32> to vector<256xf32>
    %326 = vector.shape_cast %325 : vector<256xf32> to vector<1x256xf32>
    %327 = arith.mulf %318, %326 : vector<1x256xf32>
    %328 = arith.addf %323, %327 : vector<1x256xf32>
    %c253_i32 = arith.constant 253 : i32
    %329 = tpu.dynamic_rotate %1 by %c253_i32 dim 1 : vector<1x256xf32>, i32 -> vector<1x256xf32>
    %c253_i32_115 = arith.constant 253 : i32
    %330 = tpu.dynamic_rotate %2 by %c253_i32_115 dim 1 : vector<1x256xf32>, i32 -> vector<1x256xf32>
    %c27 = arith.constant 27 : index
    %c0_116 = arith.constant 0 : index
    %331 = vector.load %arg2[%c27, %c0_116] : memref<49x256xf32, #tpu.memory_space<vmem>>, vector<1x256xf32>
    %332 = vector.shape_cast %331 : vector<1x256xf32> to vector<256xf32>
    %333 = vector.shape_cast %332 : vector<256xf32> to vector<1x256xf32>
    %334 = arith.mulf %329, %333 : vector<1x256xf32>
    %335 = arith.addf %294, %334 : vector<1x256xf32>
    %c27_117 = arith.constant 27 : index
    %c0_118 = arith.constant 0 : index
    %336 = vector.load %arg3[%c27_117, %c0_118] : memref<49x256xf32, #tpu.memory_space<vmem>>, vector<1x256xf32>
    %337 = vector.shape_cast %336 : vector<1x256xf32> to vector<256xf32>
    %338 = vector.shape_cast %337 : vector<256xf32> to vector<1x256xf32>
    %339 = arith.mulf %330, %338 : vector<1x256xf32>
    %340 = arith.addf %335, %339 : vector<1x256xf32>
    %c243_i32 = arith.constant 243 : i32
    %341 = tpu.dynamic_rotate %1 by %c243_i32 dim 1 : vector<1x256xf32>, i32 -> vector<1x256xf32>
    %c243_i32_119 = arith.constant 243 : i32
    %342 = tpu.dynamic_rotate %2 by %c243_i32_119 dim 1 : vector<1x256xf32>, i32 -> vector<1x256xf32>
    %c28 = arith.constant 28 : index
    %c0_120 = arith.constant 0 : index
    %343 = vector.load %arg2[%c28, %c0_120] : memref<49x256xf32, #tpu.memory_space<vmem>>, vector<1x256xf32>
    %344 = vector.shape_cast %343 : vector<1x256xf32> to vector<256xf32>
    %345 = vector.shape_cast %344 : vector<256xf32> to vector<1x256xf32>
    %346 = arith.mulf %341, %345 : vector<1x256xf32>
    %347 = arith.addf %304, %346 : vector<1x256xf32>
    %c28_121 = arith.constant 28 : index
    %c0_122 = arith.constant 0 : index
    %348 = vector.load %arg3[%c28_121, %c0_122] : memref<49x256xf32, #tpu.memory_space<vmem>>, vector<1x256xf32>
    %349 = vector.shape_cast %348 : vector<1x256xf32> to vector<256xf32>
    %350 = vector.shape_cast %349 : vector<256xf32> to vector<1x256xf32>
    %351 = arith.mulf %342, %350 : vector<1x256xf32>
    %352 = arith.addf %347, %351 : vector<1x256xf32>
    %c242_i32 = arith.constant 242 : i32
    %353 = tpu.dynamic_rotate %1 by %c242_i32 dim 1 : vector<1x256xf32>, i32 -> vector<1x256xf32>
    %c242_i32_123 = arith.constant 242 : i32
    %354 = tpu.dynamic_rotate %2 by %c242_i32_123 dim 1 : vector<1x256xf32>, i32 -> vector<1x256xf32>
    %c29 = arith.constant 29 : index
    %c0_124 = arith.constant 0 : index
    %355 = vector.load %arg2[%c29, %c0_124] : memref<49x256xf32, #tpu.memory_space<vmem>>, vector<1x256xf32>
    %356 = vector.shape_cast %355 : vector<1x256xf32> to vector<256xf32>
    %357 = vector.shape_cast %356 : vector<256xf32> to vector<1x256xf32>
    %358 = arith.mulf %353, %357 : vector<1x256xf32>
    %359 = arith.addf %316, %358 : vector<1x256xf32>
    %c29_125 = arith.constant 29 : index
    %c0_126 = arith.constant 0 : index
    %360 = vector.load %arg3[%c29_125, %c0_126] : memref<49x256xf32, #tpu.memory_space<vmem>>, vector<1x256xf32>
    %361 = vector.shape_cast %360 : vector<1x256xf32> to vector<256xf32>
    %362 = vector.shape_cast %361 : vector<256xf32> to vector<1x256xf32>
    %363 = arith.mulf %354, %362 : vector<1x256xf32>
    %364 = arith.addf %359, %363 : vector<1x256xf32>
    %c241_i32 = arith.constant 241 : i32
    %365 = tpu.dynamic_rotate %1 by %c241_i32 dim 1 : vector<1x256xf32>, i32 -> vector<1x256xf32>
    %c241_i32_127 = arith.constant 241 : i32
    %366 = tpu.dynamic_rotate %2 by %c241_i32_127 dim 1 : vector<1x256xf32>, i32 -> vector<1x256xf32>
    %c30 = arith.constant 30 : index
    %c0_128 = arith.constant 0 : index
    %367 = vector.load %arg2[%c30, %c0_128] : memref<49x256xf32, #tpu.memory_space<vmem>>, vector<1x256xf32>
    %368 = vector.shape_cast %367 : vector<1x256xf32> to vector<256xf32>
    %369 = vector.shape_cast %368 : vector<256xf32> to vector<1x256xf32>
    %370 = arith.mulf %365, %369 : vector<1x256xf32>
    %371 = arith.addf %328, %370 : vector<1x256xf32>
    %c30_129 = arith.constant 30 : index
    %c0_130 = arith.constant 0 : index
    %372 = vector.load %arg3[%c30_129, %c0_130] : memref<49x256xf32, #tpu.memory_space<vmem>>, vector<1x256xf32>
    %373 = vector.shape_cast %372 : vector<1x256xf32> to vector<256xf32>
    %374 = vector.shape_cast %373 : vector<256xf32> to vector<1x256xf32>
    %375 = arith.mulf %366, %374 : vector<1x256xf32>
    %376 = arith.addf %371, %375 : vector<1x256xf32>
    %c240_i32 = arith.constant 240 : i32
    %377 = tpu.dynamic_rotate %1 by %c240_i32 dim 1 : vector<1x256xf32>, i32 -> vector<1x256xf32>
    %c240_i32_131 = arith.constant 240 : i32
    %378 = tpu.dynamic_rotate %2 by %c240_i32_131 dim 1 : vector<1x256xf32>, i32 -> vector<1x256xf32>
    %c31 = arith.constant 31 : index
    %c0_132 = arith.constant 0 : index
    %379 = vector.load %arg2[%c31, %c0_132] : memref<49x256xf32, #tpu.memory_space<vmem>>, vector<1x256xf32>
    %380 = vector.shape_cast %379 : vector<1x256xf32> to vector<256xf32>
    %381 = vector.shape_cast %380 : vector<256xf32> to vector<1x256xf32>
    %382 = arith.mulf %377, %381 : vector<1x256xf32>
    %383 = arith.addf %340, %382 : vector<1x256xf32>
    %c31_133 = arith.constant 31 : index
    %c0_134 = arith.constant 0 : index
    %384 = vector.load %arg3[%c31_133, %c0_134] : memref<49x256xf32, #tpu.memory_space<vmem>>, vector<1x256xf32>
    %385 = vector.shape_cast %384 : vector<1x256xf32> to vector<256xf32>
    %386 = vector.shape_cast %385 : vector<256xf32> to vector<1x256xf32>
    %387 = arith.mulf %378, %386 : vector<1x256xf32>
    %388 = arith.addf %383, %387 : vector<1x256xf32>
    %c239_i32 = arith.constant 239 : i32
    %389 = tpu.dynamic_rotate %1 by %c239_i32 dim 1 : vector<1x256xf32>, i32 -> vector<1x256xf32>
    %c239_i32_135 = arith.constant 239 : i32
    %390 = tpu.dynamic_rotate %2 by %c239_i32_135 dim 1 : vector<1x256xf32>, i32 -> vector<1x256xf32>
    %c32 = arith.constant 32 : index
    %c0_136 = arith.constant 0 : index
    %391 = vector.load %arg2[%c32, %c0_136] : memref<49x256xf32, #tpu.memory_space<vmem>>, vector<1x256xf32>
    %392 = vector.shape_cast %391 : vector<1x256xf32> to vector<256xf32>
    %393 = vector.shape_cast %392 : vector<256xf32> to vector<1x256xf32>
    %394 = arith.mulf %389, %393 : vector<1x256xf32>
    %395 = arith.addf %352, %394 : vector<1x256xf32>
    %c32_137 = arith.constant 32 : index
    %c0_138 = arith.constant 0 : index
    %396 = vector.load %arg3[%c32_137, %c0_138] : memref<49x256xf32, #tpu.memory_space<vmem>>, vector<1x256xf32>
    %397 = vector.shape_cast %396 : vector<1x256xf32> to vector<256xf32>
    %398 = vector.shape_cast %397 : vector<256xf32> to vector<1x256xf32>
    %399 = arith.mulf %390, %398 : vector<1x256xf32>
    %400 = arith.addf %395, %399 : vector<1x256xf32>
    %c238_i32 = arith.constant 238 : i32
    %401 = tpu.dynamic_rotate %1 by %c238_i32 dim 1 : vector<1x256xf32>, i32 -> vector<1x256xf32>
    %c238_i32_139 = arith.constant 238 : i32
    %402 = tpu.dynamic_rotate %2 by %c238_i32_139 dim 1 : vector<1x256xf32>, i32 -> vector<1x256xf32>
    %c33 = arith.constant 33 : index
    %c0_140 = arith.constant 0 : index
    %403 = vector.load %arg2[%c33, %c0_140] : memref<49x256xf32, #tpu.memory_space<vmem>>, vector<1x256xf32>
    %404 = vector.shape_cast %403 : vector<1x256xf32> to vector<256xf32>
    %405 = vector.shape_cast %404 : vector<256xf32> to vector<1x256xf32>
    %406 = arith.mulf %401, %405 : vector<1x256xf32>
    %407 = arith.addf %364, %406 : vector<1x256xf32>
    %c33_141 = arith.constant 33 : index
    %c0_142 = arith.constant 0 : index
    %408 = vector.load %arg3[%c33_141, %c0_142] : memref<49x256xf32, #tpu.memory_space<vmem>>, vector<1x256xf32>
    %409 = vector.shape_cast %408 : vector<1x256xf32> to vector<256xf32>
    %410 = vector.shape_cast %409 : vector<256xf32> to vector<1x256xf32>
    %411 = arith.mulf %402, %410 : vector<1x256xf32>
    %412 = arith.addf %407, %411 : vector<1x256xf32>
    %c237_i32 = arith.constant 237 : i32
    %413 = tpu.dynamic_rotate %1 by %c237_i32 dim 1 : vector<1x256xf32>, i32 -> vector<1x256xf32>
    %c237_i32_143 = arith.constant 237 : i32
    %414 = tpu.dynamic_rotate %2 by %c237_i32_143 dim 1 : vector<1x256xf32>, i32 -> vector<1x256xf32>
    %c34 = arith.constant 34 : index
    %c0_144 = arith.constant 0 : index
    %415 = vector.load %arg2[%c34, %c0_144] : memref<49x256xf32, #tpu.memory_space<vmem>>, vector<1x256xf32>
    %416 = vector.shape_cast %415 : vector<1x256xf32> to vector<256xf32>
    %417 = vector.shape_cast %416 : vector<256xf32> to vector<1x256xf32>
    %418 = arith.mulf %413, %417 : vector<1x256xf32>
    %419 = arith.addf %376, %418 : vector<1x256xf32>
    %c34_145 = arith.constant 34 : index
    %c0_146 = arith.constant 0 : index
    %420 = vector.load %arg3[%c34_145, %c0_146] : memref<49x256xf32, #tpu.memory_space<vmem>>, vector<1x256xf32>
    %421 = vector.shape_cast %420 : vector<1x256xf32> to vector<256xf32>
    %422 = vector.shape_cast %421 : vector<256xf32> to vector<1x256xf32>
    %423 = arith.mulf %414, %422 : vector<1x256xf32>
    %424 = arith.addf %419, %423 : vector<1x256xf32>
    %c227_i32 = arith.constant 227 : i32
    %425 = tpu.dynamic_rotate %1 by %c227_i32 dim 1 : vector<1x256xf32>, i32 -> vector<1x256xf32>
    %c227_i32_147 = arith.constant 227 : i32
    %426 = tpu.dynamic_rotate %2 by %c227_i32_147 dim 1 : vector<1x256xf32>, i32 -> vector<1x256xf32>
    %c35 = arith.constant 35 : index
    %c0_148 = arith.constant 0 : index
    %427 = vector.load %arg2[%c35, %c0_148] : memref<49x256xf32, #tpu.memory_space<vmem>>, vector<1x256xf32>
    %428 = vector.shape_cast %427 : vector<1x256xf32> to vector<256xf32>
    %429 = vector.shape_cast %428 : vector<256xf32> to vector<1x256xf32>
    %430 = arith.mulf %425, %429 : vector<1x256xf32>
    %431 = arith.addf %388, %430 : vector<1x256xf32>
    %c35_149 = arith.constant 35 : index
    %c0_150 = arith.constant 0 : index
    %432 = vector.load %arg3[%c35_149, %c0_150] : memref<49x256xf32, #tpu.memory_space<vmem>>, vector<1x256xf32>
    %433 = vector.shape_cast %432 : vector<1x256xf32> to vector<256xf32>
    %434 = vector.shape_cast %433 : vector<256xf32> to vector<1x256xf32>
    %435 = arith.mulf %426, %434 : vector<1x256xf32>
    %436 = arith.addf %431, %435 : vector<1x256xf32>
    %c226_i32 = arith.constant 226 : i32
    %437 = tpu.dynamic_rotate %1 by %c226_i32 dim 1 : vector<1x256xf32>, i32 -> vector<1x256xf32>
    %c226_i32_151 = arith.constant 226 : i32
    %438 = tpu.dynamic_rotate %2 by %c226_i32_151 dim 1 : vector<1x256xf32>, i32 -> vector<1x256xf32>
    %c36 = arith.constant 36 : index
    %c0_152 = arith.constant 0 : index
    %439 = vector.load %arg2[%c36, %c0_152] : memref<49x256xf32, #tpu.memory_space<vmem>>, vector<1x256xf32>
    %440 = vector.shape_cast %439 : vector<1x256xf32> to vector<256xf32>
    %441 = vector.shape_cast %440 : vector<256xf32> to vector<1x256xf32>
    %442 = arith.mulf %437, %441 : vector<1x256xf32>
    %443 = arith.addf %400, %442 : vector<1x256xf32>
    %c36_153 = arith.constant 36 : index
    %c0_154 = arith.constant 0 : index
    %444 = vector.load %arg3[%c36_153, %c0_154] : memref<49x256xf32, #tpu.memory_space<vmem>>, vector<1x256xf32>
    %445 = vector.shape_cast %444 : vector<1x256xf32> to vector<256xf32>
    %446 = vector.shape_cast %445 : vector<256xf32> to vector<1x256xf32>
    %447 = arith.mulf %438, %446 : vector<1x256xf32>
    %448 = arith.addf %443, %447 : vector<1x256xf32>
    %c225_i32 = arith.constant 225 : i32
    %449 = tpu.dynamic_rotate %1 by %c225_i32 dim 1 : vector<1x256xf32>, i32 -> vector<1x256xf32>
    %c225_i32_155 = arith.constant 225 : i32
    %450 = tpu.dynamic_rotate %2 by %c225_i32_155 dim 1 : vector<1x256xf32>, i32 -> vector<1x256xf32>
    %c37 = arith.constant 37 : index
    %c0_156 = arith.constant 0 : index
    %451 = vector.load %arg2[%c37, %c0_156] : memref<49x256xf32, #tpu.memory_space<vmem>>, vector<1x256xf32>
    %452 = vector.shape_cast %451 : vector<1x256xf32> to vector<256xf32>
    %453 = vector.shape_cast %452 : vector<256xf32> to vector<1x256xf32>
    %454 = arith.mulf %449, %453 : vector<1x256xf32>
    %455 = arith.addf %412, %454 : vector<1x256xf32>
    %c37_157 = arith.constant 37 : index
    %c0_158 = arith.constant 0 : index
    %456 = vector.load %arg3[%c37_157, %c0_158] : memref<49x256xf32, #tpu.memory_space<vmem>>, vector<1x256xf32>
    %457 = vector.shape_cast %456 : vector<1x256xf32> to vector<256xf32>
    %458 = vector.shape_cast %457 : vector<256xf32> to vector<1x256xf32>
    %459 = arith.mulf %450, %458 : vector<1x256xf32>
    %460 = arith.addf %455, %459 : vector<1x256xf32>
    %c224_i32 = arith.constant 224 : i32
    %461 = tpu.dynamic_rotate %1 by %c224_i32 dim 1 : vector<1x256xf32>, i32 -> vector<1x256xf32>
    %c224_i32_159 = arith.constant 224 : i32
    %462 = tpu.dynamic_rotate %2 by %c224_i32_159 dim 1 : vector<1x256xf32>, i32 -> vector<1x256xf32>
    %c38 = arith.constant 38 : index
    %c0_160 = arith.constant 0 : index
    %463 = vector.load %arg2[%c38, %c0_160] : memref<49x256xf32, #tpu.memory_space<vmem>>, vector<1x256xf32>
    %464 = vector.shape_cast %463 : vector<1x256xf32> to vector<256xf32>
    %465 = vector.shape_cast %464 : vector<256xf32> to vector<1x256xf32>
    %466 = arith.mulf %461, %465 : vector<1x256xf32>
    %467 = arith.addf %424, %466 : vector<1x256xf32>
    %c38_161 = arith.constant 38 : index
    %c0_162 = arith.constant 0 : index
    %468 = vector.load %arg3[%c38_161, %c0_162] : memref<49x256xf32, #tpu.memory_space<vmem>>, vector<1x256xf32>
    %469 = vector.shape_cast %468 : vector<1x256xf32> to vector<256xf32>
    %470 = vector.shape_cast %469 : vector<256xf32> to vector<1x256xf32>
    %471 = arith.mulf %462, %470 : vector<1x256xf32>
    %472 = arith.addf %467, %471 : vector<1x256xf32>
    %c223_i32 = arith.constant 223 : i32
    %473 = tpu.dynamic_rotate %1 by %c223_i32 dim 1 : vector<1x256xf32>, i32 -> vector<1x256xf32>
    %c223_i32_163 = arith.constant 223 : i32
    %474 = tpu.dynamic_rotate %2 by %c223_i32_163 dim 1 : vector<1x256xf32>, i32 -> vector<1x256xf32>
    %c39 = arith.constant 39 : index
    %c0_164 = arith.constant 0 : index
    %475 = vector.load %arg2[%c39, %c0_164] : memref<49x256xf32, #tpu.memory_space<vmem>>, vector<1x256xf32>
    %476 = vector.shape_cast %475 : vector<1x256xf32> to vector<256xf32>
    %477 = vector.shape_cast %476 : vector<256xf32> to vector<1x256xf32>
    %478 = arith.mulf %473, %477 : vector<1x256xf32>
    %479 = arith.addf %436, %478 : vector<1x256xf32>
    %c39_165 = arith.constant 39 : index
    %c0_166 = arith.constant 0 : index
    %480 = vector.load %arg3[%c39_165, %c0_166] : memref<49x256xf32, #tpu.memory_space<vmem>>, vector<1x256xf32>
    %481 = vector.shape_cast %480 : vector<1x256xf32> to vector<256xf32>
    %482 = vector.shape_cast %481 : vector<256xf32> to vector<1x256xf32>
    %483 = arith.mulf %474, %482 : vector<1x256xf32>
    %484 = arith.addf %479, %483 : vector<1x256xf32>
    %c222_i32 = arith.constant 222 : i32
    %485 = tpu.dynamic_rotate %1 by %c222_i32 dim 1 : vector<1x256xf32>, i32 -> vector<1x256xf32>
    %c222_i32_167 = arith.constant 222 : i32
    %486 = tpu.dynamic_rotate %2 by %c222_i32_167 dim 1 : vector<1x256xf32>, i32 -> vector<1x256xf32>
    %c40 = arith.constant 40 : index
    %c0_168 = arith.constant 0 : index
    %487 = vector.load %arg2[%c40, %c0_168] : memref<49x256xf32, #tpu.memory_space<vmem>>, vector<1x256xf32>
    %488 = vector.shape_cast %487 : vector<1x256xf32> to vector<256xf32>
    %489 = vector.shape_cast %488 : vector<256xf32> to vector<1x256xf32>
    %490 = arith.mulf %485, %489 : vector<1x256xf32>
    %491 = arith.addf %448, %490 : vector<1x256xf32>
    %c40_169 = arith.constant 40 : index
    %c0_170 = arith.constant 0 : index
    %492 = vector.load %arg3[%c40_169, %c0_170] : memref<49x256xf32, #tpu.memory_space<vmem>>, vector<1x256xf32>
    %493 = vector.shape_cast %492 : vector<1x256xf32> to vector<256xf32>
    %494 = vector.shape_cast %493 : vector<256xf32> to vector<1x256xf32>
    %495 = arith.mulf %486, %494 : vector<1x256xf32>
    %496 = arith.addf %491, %495 : vector<1x256xf32>
    %c221_i32 = arith.constant 221 : i32
    %497 = tpu.dynamic_rotate %1 by %c221_i32 dim 1 : vector<1x256xf32>, i32 -> vector<1x256xf32>
    %c221_i32_171 = arith.constant 221 : i32
    %498 = tpu.dynamic_rotate %2 by %c221_i32_171 dim 1 : vector<1x256xf32>, i32 -> vector<1x256xf32>
    %c41 = arith.constant 41 : index
    %c0_172 = arith.constant 0 : index
    %499 = vector.load %arg2[%c41, %c0_172] : memref<49x256xf32, #tpu.memory_space<vmem>>, vector<1x256xf32>
    %500 = vector.shape_cast %499 : vector<1x256xf32> to vector<256xf32>
    %501 = vector.shape_cast %500 : vector<256xf32> to vector<1x256xf32>
    %502 = arith.mulf %497, %501 : vector<1x256xf32>
    %503 = arith.addf %460, %502 : vector<1x256xf32>
    %c41_173 = arith.constant 41 : index
    %c0_174 = arith.constant 0 : index
    %504 = vector.load %arg3[%c41_173, %c0_174] : memref<49x256xf32, #tpu.memory_space<vmem>>, vector<1x256xf32>
    %505 = vector.shape_cast %504 : vector<1x256xf32> to vector<256xf32>
    %506 = vector.shape_cast %505 : vector<256xf32> to vector<1x256xf32>
    %507 = arith.mulf %498, %506 : vector<1x256xf32>
    %508 = arith.addf %503, %507 : vector<1x256xf32>
    %c211_i32 = arith.constant 211 : i32
    %509 = tpu.dynamic_rotate %1 by %c211_i32 dim 1 : vector<1x256xf32>, i32 -> vector<1x256xf32>
    %c211_i32_175 = arith.constant 211 : i32
    %510 = tpu.dynamic_rotate %2 by %c211_i32_175 dim 1 : vector<1x256xf32>, i32 -> vector<1x256xf32>
    %c42 = arith.constant 42 : index
    %c0_176 = arith.constant 0 : index
    %511 = vector.load %arg2[%c42, %c0_176] : memref<49x256xf32, #tpu.memory_space<vmem>>, vector<1x256xf32>
    %512 = vector.shape_cast %511 : vector<1x256xf32> to vector<256xf32>
    %513 = vector.shape_cast %512 : vector<256xf32> to vector<1x256xf32>
    %514 = arith.mulf %509, %513 : vector<1x256xf32>
    %515 = arith.addf %472, %514 : vector<1x256xf32>
    %c42_177 = arith.constant 42 : index
    %c0_178 = arith.constant 0 : index
    %516 = vector.load %arg3[%c42_177, %c0_178] : memref<49x256xf32, #tpu.memory_space<vmem>>, vector<1x256xf32>
    %517 = vector.shape_cast %516 : vector<1x256xf32> to vector<256xf32>
    %518 = vector.shape_cast %517 : vector<256xf32> to vector<1x256xf32>
    %519 = arith.mulf %510, %518 : vector<1x256xf32>
    %520 = arith.addf %515, %519 : vector<1x256xf32>
    %c210_i32 = arith.constant 210 : i32
    %521 = tpu.dynamic_rotate %1 by %c210_i32 dim 1 : vector<1x256xf32>, i32 -> vector<1x256xf32>
    %c210_i32_179 = arith.constant 210 : i32
    %522 = tpu.dynamic_rotate %2 by %c210_i32_179 dim 1 : vector<1x256xf32>, i32 -> vector<1x256xf32>
    %c43 = arith.constant 43 : index
    %c0_180 = arith.constant 0 : index
    %523 = vector.load %arg2[%c43, %c0_180] : memref<49x256xf32, #tpu.memory_space<vmem>>, vector<1x256xf32>
    %524 = vector.shape_cast %523 : vector<1x256xf32> to vector<256xf32>
    %525 = vector.shape_cast %524 : vector<256xf32> to vector<1x256xf32>
    %526 = arith.mulf %521, %525 : vector<1x256xf32>
    %527 = arith.addf %484, %526 : vector<1x256xf32>
    %c43_181 = arith.constant 43 : index
    %c0_182 = arith.constant 0 : index
    %528 = vector.load %arg3[%c43_181, %c0_182] : memref<49x256xf32, #tpu.memory_space<vmem>>, vector<1x256xf32>
    %529 = vector.shape_cast %528 : vector<1x256xf32> to vector<256xf32>
    %530 = vector.shape_cast %529 : vector<256xf32> to vector<1x256xf32>
    %531 = arith.mulf %522, %530 : vector<1x256xf32>
    %532 = arith.addf %527, %531 : vector<1x256xf32>
    %c209_i32 = arith.constant 209 : i32
    %533 = tpu.dynamic_rotate %1 by %c209_i32 dim 1 : vector<1x256xf32>, i32 -> vector<1x256xf32>
    %c209_i32_183 = arith.constant 209 : i32
    %534 = tpu.dynamic_rotate %2 by %c209_i32_183 dim 1 : vector<1x256xf32>, i32 -> vector<1x256xf32>
    %c44 = arith.constant 44 : index
    %c0_184 = arith.constant 0 : index
    %535 = vector.load %arg2[%c44, %c0_184] : memref<49x256xf32, #tpu.memory_space<vmem>>, vector<1x256xf32>
    %536 = vector.shape_cast %535 : vector<1x256xf32> to vector<256xf32>
    %537 = vector.shape_cast %536 : vector<256xf32> to vector<1x256xf32>
    %538 = arith.mulf %533, %537 : vector<1x256xf32>
    %539 = arith.addf %496, %538 : vector<1x256xf32>
    %c44_185 = arith.constant 44 : index
    %c0_186 = arith.constant 0 : index
    %540 = vector.load %arg3[%c44_185, %c0_186] : memref<49x256xf32, #tpu.memory_space<vmem>>, vector<1x256xf32>
    %541 = vector.shape_cast %540 : vector<1x256xf32> to vector<256xf32>
    %542 = vector.shape_cast %541 : vector<256xf32> to vector<1x256xf32>
    %543 = arith.mulf %534, %542 : vector<1x256xf32>
    %544 = arith.addf %539, %543 : vector<1x256xf32>
    %c208_i32 = arith.constant 208 : i32
    %545 = tpu.dynamic_rotate %1 by %c208_i32 dim 1 : vector<1x256xf32>, i32 -> vector<1x256xf32>
    %c208_i32_187 = arith.constant 208 : i32
    %546 = tpu.dynamic_rotate %2 by %c208_i32_187 dim 1 : vector<1x256xf32>, i32 -> vector<1x256xf32>
    %c45 = arith.constant 45 : index
    %c0_188 = arith.constant 0 : index
    %547 = vector.load %arg2[%c45, %c0_188] : memref<49x256xf32, #tpu.memory_space<vmem>>, vector<1x256xf32>
    %548 = vector.shape_cast %547 : vector<1x256xf32> to vector<256xf32>
    %549 = vector.shape_cast %548 : vector<256xf32> to vector<1x256xf32>
    %550 = arith.mulf %545, %549 : vector<1x256xf32>
    %551 = arith.addf %508, %550 : vector<1x256xf32>
    %c45_189 = arith.constant 45 : index
    %c0_190 = arith.constant 0 : index
    %552 = vector.load %arg3[%c45_189, %c0_190] : memref<49x256xf32, #tpu.memory_space<vmem>>, vector<1x256xf32>
    %553 = vector.shape_cast %552 : vector<1x256xf32> to vector<256xf32>
    %554 = vector.shape_cast %553 : vector<256xf32> to vector<1x256xf32>
    %555 = arith.mulf %546, %554 : vector<1x256xf32>
    %556 = arith.addf %551, %555 : vector<1x256xf32>
    %c207_i32 = arith.constant 207 : i32
    %557 = tpu.dynamic_rotate %1 by %c207_i32 dim 1 : vector<1x256xf32>, i32 -> vector<1x256xf32>
    %c207_i32_191 = arith.constant 207 : i32
    %558 = tpu.dynamic_rotate %2 by %c207_i32_191 dim 1 : vector<1x256xf32>, i32 -> vector<1x256xf32>
    %c46 = arith.constant 46 : index
    %c0_192 = arith.constant 0 : index
    %559 = vector.load %arg2[%c46, %c0_192] : memref<49x256xf32, #tpu.memory_space<vmem>>, vector<1x256xf32>
    %560 = vector.shape_cast %559 : vector<1x256xf32> to vector<256xf32>
    %561 = vector.shape_cast %560 : vector<256xf32> to vector<1x256xf32>
    %562 = arith.mulf %557, %561 : vector<1x256xf32>
    %563 = arith.addf %520, %562 : vector<1x256xf32>
    %c46_193 = arith.constant 46 : index
    %c0_194 = arith.constant 0 : index
    %564 = vector.load %arg3[%c46_193, %c0_194] : memref<49x256xf32, #tpu.memory_space<vmem>>, vector<1x256xf32>
    %565 = vector.shape_cast %564 : vector<1x256xf32> to vector<256xf32>
    %566 = vector.shape_cast %565 : vector<256xf32> to vector<1x256xf32>
    %567 = arith.mulf %558, %566 : vector<1x256xf32>
    %568 = arith.addf %563, %567 : vector<1x256xf32>
    %c206_i32 = arith.constant 206 : i32
    %569 = tpu.dynamic_rotate %1 by %c206_i32 dim 1 : vector<1x256xf32>, i32 -> vector<1x256xf32>
    %c206_i32_195 = arith.constant 206 : i32
    %570 = tpu.dynamic_rotate %2 by %c206_i32_195 dim 1 : vector<1x256xf32>, i32 -> vector<1x256xf32>
    %c47 = arith.constant 47 : index
    %c0_196 = arith.constant 0 : index
    %571 = vector.load %arg2[%c47, %c0_196] : memref<49x256xf32, #tpu.memory_space<vmem>>, vector<1x256xf32>
    %572 = vector.shape_cast %571 : vector<1x256xf32> to vector<256xf32>
    %573 = vector.shape_cast %572 : vector<256xf32> to vector<1x256xf32>
    %574 = arith.mulf %569, %573 : vector<1x256xf32>
    %575 = arith.addf %532, %574 : vector<1x256xf32>
    %c47_197 = arith.constant 47 : index
    %c0_198 = arith.constant 0 : index
    %576 = vector.load %arg3[%c47_197, %c0_198] : memref<49x256xf32, #tpu.memory_space<vmem>>, vector<1x256xf32>
    %577 = vector.shape_cast %576 : vector<1x256xf32> to vector<256xf32>
    %578 = vector.shape_cast %577 : vector<256xf32> to vector<1x256xf32>
    %579 = arith.mulf %570, %578 : vector<1x256xf32>
    %580 = arith.addf %575, %579 : vector<1x256xf32>
    %c205_i32 = arith.constant 205 : i32
    %581 = tpu.dynamic_rotate %1 by %c205_i32 dim 1 : vector<1x256xf32>, i32 -> vector<1x256xf32>
    %c205_i32_199 = arith.constant 205 : i32
    %582 = tpu.dynamic_rotate %2 by %c205_i32_199 dim 1 : vector<1x256xf32>, i32 -> vector<1x256xf32>
    %c48 = arith.constant 48 : index
    %c0_200 = arith.constant 0 : index
    %583 = vector.load %arg2[%c48, %c0_200] : memref<49x256xf32, #tpu.memory_space<vmem>>, vector<1x256xf32>
    %584 = vector.shape_cast %583 : vector<1x256xf32> to vector<256xf32>
    %585 = vector.shape_cast %584 : vector<256xf32> to vector<1x256xf32>
    %586 = arith.mulf %581, %585 : vector<1x256xf32>
    %587 = arith.addf %544, %586 : vector<1x256xf32>
    %c48_201 = arith.constant 48 : index
    %c0_202 = arith.constant 0 : index
    %588 = vector.load %arg3[%c48_201, %c0_202] : memref<49x256xf32, #tpu.memory_space<vmem>>, vector<1x256xf32>
    %589 = vector.shape_cast %588 : vector<1x256xf32> to vector<256xf32>
    %590 = vector.shape_cast %589 : vector<256xf32> to vector<1x256xf32>
    %591 = arith.mulf %582, %590 : vector<1x256xf32>
    %592 = arith.addf %587, %591 : vector<1x256xf32>
    %593 = arith.addf %592, %556 : vector<1x256xf32>
    %594 = arith.addf %568, %580 : vector<1x256xf32>
    %595 = arith.addf %593, %594 : vector<1x256xf32>
    %c0_203 = arith.constant 0 : index
    %596 = memref.load %arg4[%c0_203] : memref<1xf32, #tpu.memory_space<smem>>
    %597 = vector.broadcast %596 : f32 to vector<1x256xf32>
    %598 = arith.addf %595, %597 : vector<1x256xf32>
    %599 = arith.negf %598 : vector<1x256xf32>
    %600 = math.exp %599 : vector<1x256xf32>
    %cst_204 = arith.constant 1.000000e+00 : f32
    %601 = vector.broadcast %cst_204 : f32 to vector<1x256xf32>
    %602 = arith.addf %601, %600 : vector<1x256xf32>
    %603 = arith.divf %601, %602 : vector<1x256xf32>
    %604 = vector.shape_cast %603 : vector<1x256xf32> to vector<1x1x256xf32>
    %605 = vector.broadcast %604 : vector<1x1x256xf32> to vector<1x4x256xf32>
    %606 = arith.mulf %0, %605 : vector<1x4x256xf32>
    %c0_205 = arith.constant 0 : index
    %c0_206 = arith.constant 0 : index
    %c0_207 = arith.constant 0 : index
    %607 = vector.load %arg5[%c0_205, %c0_206, %c0_207] : memref<1x4x256xf32, #tpu.memory_space<vmem>>, vector<1x4x256xf32>
    tpu.vector_store %arg5[%c0_205, %c0_206, %c0_207], %606 {strides = array<i32>} : memref<1x4x256xf32, #tpu.memory_space<vmem>>, vector<1x4x256xf32>,
    return
  }
  func.func @transform_0(%arg0: i32) -> (i32, i32, i32) {
    %c0_i32 = arith.constant 0 : i32
    %c0_i32_0 = arith.constant 0 : i32
    %c0_i32_1 = arith.constant 0 : i32
    return %arg0, %c0_i32, %c0_i32_0 : i32, i32, i32
  }
  func.func @transform_1(%arg0: i32) -> (i32, i32) {
    %c0_i32 = arith.constant 0 : i32
    %c0_i32_0 = arith.constant 0 : i32
    %c0_i32_1 = arith.constant 0 : i32
    return %c0_i32, %c0_i32_0 : i32, i32
  }
  func.func @transform_2(%arg0: i32) -> (i32, i32) {
    %c0_i32 = arith.constant 0 : i32
    %c0_i32_0 = arith.constant 0 : i32
    %c0_i32_1 = arith.constant 0 : i32
    return %c0_i32, %c0_i32_0 : i32, i32
  }
  func.func @transform_3(%arg0: i32) -> i32 {
    %c0_i32 = arith.constant 0 : i32
    %c0_i32_0 = arith.constant 0 : i32
    return %c0_i32 : i32
  }
  func.func @transform_4(%arg0: i32) -> (i32, i32, i32) {
    %c0_i32 = arith.constant 0 : i32
    %c0_i32_0 = arith.constant 0 : i32
    %c0_i32_1 = arith.constant 0 : i32
    return %arg0, %c0_i32, %c0_i32_0 : i32, i32, i32
  }
}

</mosaic_0001>

<bundles_post_ra>
// kernel: tpu_custom_call.1
= control target key start
LH: loop header
LB: loop body
LE: loop exit
PB: predicated region body
PF: predicated region fallthrough
CT: control target
= control target key end

     0   :  { %s5494_s0 = inlined_call_operand.hbm [shape: f32[2,4,256], index: 0, kind: input, shape index: {}]   ;;  %s5495_s1 = inlined_call_operand.hbm [shape: f32[49,256], index: 1, kind: input, shape index: {}]   ;;  %s5496_s2 = inlined_call_operand.hbm [shape: f32[49,256], index: 2, kind: input, shape index: {}]   ;;  %s5497_s3 = inlined_call_operand.<no memory space> [shape: f32[1], index: 3, kind: input, shape index: {}]   ;;  %s5498_s4 = inlined_call_operand.hbm [shape: f32[2,4,256], index: 4, kind: output, shape index: {}]  }
   0x1   :  { %9 = sst [smem:[#allocation2]] %s5497_s3 }
   0x2   :  { %10 = vsyncpa [#allocation4], 0 }
   0x3   :  { %12 = vsyncpa [#allocation4 + $0x1], 0 }
   0x4   :  { %13 = vsyncpa [#allocation7], 0 }
   0x5   :  { %14 = vsyncpa [#allocation5], 0 }
   0x6   :  { %16 = vsyncpa [#allocation5 + $0x1], 0  ;;  %s3088_s17 = smov 0   ;;  %s3090_s18 = smov 0  }
   0x7   :  { %s3092_s19 = smov 0   ;;  %s3094_s20 = smov 0  }
   0x8 LB: > { %s3109_s3 = sadd.s32 4294967295, %s3004_s20   ;;  %s2707_s21 = sadd.s32 4294967294, %s3004_s20   ;;  %s3004_s20 = sphi %s3094_s20, %s5916_s20   ;;  %s3000_s19 = sphi %s3092_s19, %s5915_s19   ;;  %s2996_s18 = sphi %s3090_s18, %s5914_s18   ;;  %s2992_s17 = sphi %s3088_s17, %s5913_s17  }
   0x9   : > { %p42_p0 = scmp.ne.s32.totalorder %s2996_s18, %s2992_s17  ;;  %p5499_p1 = scmp.eq.s32.totalorder %s3109_s3, 0 }
   0xa   : > { %p135_p3 = scmp.eq.s32.totalorder %s2707_s21, 1  ;;  %p2708_p5 = scmp.ge.s32.totalorder %s3004_s20, 1 }
   0xb   : > { %p3118_p4 = por %p5499_p1, %p42_p0  ;;  %p142_p7 = scmp.lt.s32.totalorder %s3004_s20, 3 }
   0xc   : > { %p3123_p6 = por %p135_p3, %p42_p0  ;;  %s3006_s25 = smov [#allocation6]  }
   0xd   : > { %s5614_s22 = scalar_select %p3118_p4, 1, 0 }
   0xe   : > { %s5615_s23 = scalar_select %p3123_p6, 1, 0 }
   0xf   : > { %p3128_p8 = pnand %p2708_p5, %p142_p7  ;;  %s154_s26 = sshll.u32 %s3006_s25, 4  ;;  %s155_s26 = int_to_ptr.vmem [resolvable:$true] %s154_s26 }
  0x10   : > { %s3007_s28 = smov [#allocation8]   ;;  %s2867_s30 = scalar_lea.vmem %s155_s26, 1792 }
  0x11   : > { %s5616_s24 = scalar_select %p3128_p8, 1, 0 }
  0x12   : > { %p2741_p9 = pneg %p3128_p8  ;;  %s167_s29 = sshll.u32 %s3007_s28, 4  ;;  %s168_s29 = int_to_ptr.vmem [resolvable:$true] %s167_s29 }
  0x13   : > { %p2868_p13 = scmp.ne.s32.totalorder %s155_s26, %s2867_s30  ;;  %p2875_p5 = scmp.lt.s32.totalorder %s155_s26, %s155_s26 }
  0x14   : > { %p3137_p11 = pnand %p2741_p9, %p5499_p1  ;;  %p2876_p7 = scmp.lt.s32.totalorder %s2867_s30, %s2867_s30 }
  0x16   : > { %p2858_p12 = pneg %p3137_p11  ;;  %p2877_p10 = por %p2876_p7, %p2875_p5 }
  0x18   : > { %p2870_p0 = pnand %p2868_p13, %p2858_p12 }
  0x1a   : > { %p2871_p3 = pneg %p2870_p0 }
  0x1c   : > { %p2878_p9 = pnand %p2877_p10, %p2871_p3 }
  0x1e   : > { %2881 = shalt.err (!%p2878_p9)
}
  0x1f   : > { %s3008_s5 = smov 256   ;;  %s3009_s6 = smov 16  }
  0x20   : > { %2744 = dma.hbm_to_vmem [thread:$0]  (!%p3137_p11), %s5495_s1, 1792, %s155_s26, [#allocation7], %s3008_s5, %s3008_s5, %s3009_s6  }
  0x21   : > { %s2893_s9 = scalar_lea.vmem %s168_s29, 1792  ;;  %p2901_p2 = scmp.lt.s32.totalorder %s168_s29, %s168_s29 }
  0x22   : > { %p2894_p1 = scmp.ne.s32.totalorder %s168_s29, %s2893_s9  ;;  %p2902_p6 = scmp.lt.s32.totalorder %s2893_s9, %s2893_s9 }
  0x24   : > { %p2896_p13 = pnand %p2894_p1, %p2858_p12  ;;  %p2903_p5 = por %p2902_p6, %p2901_p2 }
  0x26   : > { %p2897_p0 = pneg %p2896_p13 }
  0x28   : > { %p2904_p10 = pnand %p2903_p5, %p2897_p0 }
  0x2a   : > { %2907 = shalt.err (!%p2904_p10)
}
  0x2b   : > { %2747 = dma.hbm_to_vmem [thread:$0]  (!%p3137_p11), %s5496_s2, 1792, %s168_s29, [#allocation7], %s3008_s5, %s3008_s5, %s3009_s6  }
  0x2c   : > { %s3160_s12 = sadd.s32 1, %s3004_s20   ;;  %s29_s13 = sadd.s32 1, %s3000_s19 }
  0x2d   : > { %s26_s14 = ssub.s32 %s3004_s20, %s3160_s12  ;;  %p36_p1 = scmp.ne.s32.totalorder %s3000_s19, %s2996_s18 }
  0x2e   : > { %p27_p2 = scmp.eq.s32.totalorder %s26_s14, 0  ;;  %p37_p6 = scmp.eq.s32.totalorder %s3004_s20, 0 }
  0x2f   : > { %p5618_p12 = scmp.eq.s32.totalorder %s3109_s3, 1  ;;  %p2758_p7 = scmp.lt.s32.totalorder %s3004_s20, 2 }
  0x30   : > { %s3176_s16 = scalar_select %p27_p2, %s3000_s19, %s29_s13  }
  0x31   : > { %p3170_p3 = por %p5618_p12, %p36_p1  ;;  %p38_p9 = por %p37_p6, %p36_p1 }
  0x32   : > { %s184_s21 = sand.u32 1, %s3000_s19   ;;  %s2727_s26 = sshll.u32 %s3004_s20, 7 }
  0x33   : > { %s5619_s15 = scalar_select %p3170_p3, 1, 0 }
  0x34   : > { %s2712_s25 = sshll.u32 %s184_s21, 3  ;;  %s3183_s29 = scalar_lea.hbm %s5494_s0, %s2727_s26 }
  0x35   : > { %s188_s30 = scalar_lea.vmem [#allocation3], %s2712_s25  ;;  %p3185_p11 = pnand %p2758_p7, %p38_p9 }
  0x36   : > { %s196_s5 = sshll.u32 %s188_s30, 4  ;;  %s185_s7 = scalar_lea.sflag [#allocation4], %s184_s21  ;;  %s197_s5 = int_to_ptr.vmem [resolvable:$true] %s196_s5 }
  0x37   : > { %s2908_s8 = scalar_lea.hbm %s3183_s29, 128  ;;  %p2910_p0 = pneg %p3185_p11 }
  0x38   : > { %p2909_p13 = scmp.ne.s32.totalorder %s3183_s29, %s2908_s8  ;;  %s2913_s11 = scalar_lea.hbm %s5494_s0, 256 }
  0x39   : > { %p2914_p1 = scmp.lt.s32.totalorder %s3183_s29, %s5494_s0  ;;  %p2915_p2 = scmp.lt.s32.totalorder %s2913_s11, %s2908_s8 }
  0x3a   : > { %p2911_p5 = pnand %p2910_p0, %p2909_p13 }
  0x3b   : > { %p2916_p6 = por %p2915_p2, %p2914_p1 }
  0x3c   : > { %p2912_p10 = pneg %p2911_p5 }
  0x3e   : > { %p2917_p12 = pnand %p2916_p6, %p2912_p10 }
  0x40   : > { %2920 = shalt.err (!%p2917_p12)
}
  0x41   : > { %s2921_s25 = scalar_lea.vmem %s197_s5, 128  ;;  %s3010_s21 = smov [#allocation3]  }
  0x42   : > { %p2922_p7 = scmp.ne.s32.totalorder %s197_s5, %s2921_s25  ;;  %s2926_s26 = sshll.u32 %s3010_s21, 4  ;;  %s2927_s26 = int_to_ptr.vmem [resolvable:$false] %s2926_s26 }
  0x43   : > { %s2928_s27 = scalar_lea.vmem %s2927_s26, 256  ;;  %p2929_p13 = scmp.lt.s32.totalorder %s197_s5, %s2927_s26 }
  0x44   : > { %p2924_p9 = pnand %p2922_p7, %p2910_p0  ;;  %p2930_p5 = scmp.lt.s32.totalorder %s2928_s27, %s2921_s25 }
  0x46   : > { %p2925_p3 = pneg %p2924_p9  ;;  %p2931_p4 = por %p2930_p5, %p2929_p13 }
  0x48   : > { %p2932_p8 = pnand %p2931_p4, %p2925_p3 }
  0x4a   : > { %2935 = shalt.err (!%p2932_p8)
}
  0x4b   : > { %2751 = dma.hbm_to_vmem [thread:$0]  (!%p3185_p11), %s3183_s29, 128, %s197_s5, %s185_s7  }
  0x4c   : > { %p5621_p10 = scmp.ne.s32.totalorder %s5616_s24, 0 }
  0x4e   : > { %205 = sbr.rel (%p5621_p10) target bundleno = 682 (0x2aa), region = 36 }
  0x53   : > { %s3206_s28 = sand.u32 1, %s2996_s18   ;;  %p5622_p4 = scmp.ne.s32.totalorder %s5614_s22, 0 }
  0x54   : > { %s2716_s30 = sshll.u32 %s3206_s28, 3  ;;  %s208_s8 = scalar_lea.sflag [#allocation4], %s3206_s28 }
  0x55   : > { %s3212_s9 = scalar_lea.vmem [#allocation3], %s2716_s30 }
  0x56   : > { %2979 = dma.done.wait (%p5622_p4), %s208_s8, 128  }
  0x57   : > { %2981 = vsyncadd (%p5622_p4), %s208_s8, 4294967168  ;;  %p5623_p8 = scmp.eq.s32.totalorder %s3109_s3, 0 }
  0x59   : > { %2983 = dma.done.wait (%p5623_p8), [#allocation7], 3584   ;;  %p5624_p3 = pmov %p5623_p8 }
  0x5a   : > { %vm248_vm0 = vcmask 1043456   ;;  %v244_v0 = vld [vmem:[%s3212_s9] sm:$0xff]  ;;  %s3011_s22 = smov 51   ;;  %s3012_s24 = smov 50  }
  0x5b   : > { %2985 = vsyncadd (%p5624_p3), [#allocation7], 4294963712  ;;  %v263_v1 = vsel %vm248_vm0, %v244_v0, 0.0  ;;  %v249_v2 = vsel %vm248_vm0, %v244_v0, -inf  ;;  %v246_v3 = vcombine.high %v244_v0, %v244_v0  ;;  %s3013_s29 = smov 49   ;;  %s3014_s5 = smov 48  }
  0x5c   : > { %v264_v4 = vrot.slane %v263_v1, 4  ;;  %v250_v5 = vrot.slane %v249_v2, 4  ;;  %s3015_s6 = smov 47   ;;  %s3016_s7 = smov 46  }
  0x5d   : > { %v270_v6 = vsel %vm248_vm0, %v246_v3, 0.0  ;;  %v256_v7 = vsel %vm248_vm0, %v246_v3, -inf  ;;  %s3017_s10 = smov 45   ;;  %s3018_s11 = smov 35  }
  0x5e   : > { %v265_v8 = vadd.f32 %v264_v4, %v263_v1  ;;  %v251_v9 = vmax.f32 %v249_v2, %v250_v5  ;;  %v271_v10 = vrot.slane %v270_v6, 4  ;;  %v257_v11 = vrot.slane %v256_v7, 4  ;;  %s3019_s13 = smov 34   ;;  %s3020_s14 = smov 33  }
  0x5f   : > { %s3021_s25 = smov 32   ;;  %s3022_s21 = smov 31  }
  0x60   : > { %v266_v12 = vrot.slane %v265_v8, 2  ;;  %v252_v13 = vrot.slane %v251_v9, 2  ;;  %v272_v14 = vadd.f32 %v271_v10, %v270_v6  ;;  %v258_v15 = vmax.f32 %v256_v7, %v257_v11  ;;  %s3023_s26 = smov 30   ;;  %s3024_s27 = smov 29  }
  0x61   : > { %s3025_s8 = smov 19   ;;  %p5910_p0 = scmp.ne.s32.totalorder %s5619_s15, 0 }
  0x62   : > { %v267_v16 = vadd.f32 %v266_v12, %v265_v8  ;;  %v253_v17 = vmax.f32 %v251_v9, %v252_v13  ;;  %v273_v18 = vrot.slane %v272_v14, 2  ;;  %v259_v19 = vrot.slane %v258_v15, 2 }
  0x64   : > { %v268_v20 = vrot.slane %v267_v16, 1  ;;  %v254_v21 = vrot.slane %v253_v17, 1  ;;  %v274_v22 = vadd.f32 %v273_v18, %v272_v14  ;;  %v260_v23 = vmax.f32 %v258_v15, %v259_v19 }
  0x65   : > { %v281_v14 = vlaneseq }
  0x66   : > { %v3223_v24 = vadd.f32 %v268_v20, %v267_v16  ;;  %v3225_v25 = vmax.f32 %v253_v17, %v254_v21  ;;  %v275_v26 = vrot.slane %v274_v22, 1  ;;  %v261_v28 = vrot.slane %v260_v23, 1 }
  0x67   : > { %v295_v17 = vshrl.u32 %v281_v14, 7 }
  0x68   : > { %286 = vrot.lane.b32.xlu1 %v3223_v24, %s3011_s22  ;;  %277 = vrot.lane.b32.xlu0 %v3225_v25, %s3011_s22  ;;  %v3229_v27 = vadd.f32 %v275_v26, %v274_v22  ;;  %v3233_v29 = vmax.f32 %v260_v23, %v261_v28  ;;  %v3449_v22 = vld [vmem:[#allocation8] ss:$8 sm:$0x3]  ;;  %v3451_v23 = vld [vmem:[#allocation6 + $0x1] ss:$8 sm:$0x3] }
  0x69   : > { %v3444_v20 = vsub.s32 0, %v295_v17  ;;  %v3446_v21 = vsub.s32 1, %v295_v17  ;;  %v3466_v17 = vand.u32 127, %v281_v14  ;;  %v3481_v14 = vld [vmem:[#allocation6 + $0x4] ss:$8 sm:$0x3] }
  0x6b   : > { %vm283_vm1 = vcmp.lt.s32.totalorder %v3466_v17, 51  ;;  %vm328_vm2 = vcmp.lt.s32.totalorder %v3466_v17, 50  ;;  %vm375_vm3 = vcmp.lt.s32.totalorder %v3466_v17, 49  ;;  %vm469_vm4 = vcmp.lt.s32.totalorder %v3466_v17, 47 }
  0x6c   : > { %324 = vrot.lane.b32.xlu0 %v3225_v25, %s3012_s24  ;;  %288 = vrot.lane.b32.xlu1 %v3229_v27, %s3011_s22  ;;  %vm422_vm5 = vcmp.lt.s32.totalorder %v3466_v17, 48  ;;  %vm516_vm6 = vcmp.lt.s32.totalorder %v3466_v17, 46  ;;  %vm563_vm7 = vcmp.lt.s32.totalorder %v3466_v17, 45  ;;  %vm610_vm8 = vcmp.lt.s32.totalorder %v3466_v17, 35 }
  0x6d   : > { %vm657_vm9 = vcmp.lt.s32.totalorder %v3466_v17, 34  ;;  %vm704_vm10 = vcmp.lt.s32.totalorder %v3466_v17, 33  ;;  %vm751_vm11 = vcmp.lt.s32.totalorder %v3466_v17, 32  ;;  %vm798_vm12 = vcmp.lt.s32.totalorder %v3466_v17, 31 }
  0x6e   : > { %vm845_vm13 = vcmp.lt.s32.totalorder %v3466_v17, 30  ;;  %vm892_vm14 = vcmp.lt.s32.totalorder %v3466_v17, 29  ;;  %vm939_vm15 = vcmp.lt.s32.totalorder %v3466_v17, 19  ;;  %vm986_vm0 = vcmp.lt.s32.totalorder %v3466_v17, 18 }
  0x70   : > { %331 = vrot.lane.b32.xlu0 %v3223_v24, %s3012_s24  ;;  %326 = vrot.lane.b32.xlu1 %v3233_v29, %s3012_s24 }
  0x74   : > { %371 = vrot.lane.b32.xlu0 %v3225_v25, %s3013_s29  ;;  %333 = vrot.lane.b32.xlu1 %v3229_v27, %s3012_s24  ;;  %s3027_s24 = smov 17  }
  0x78   : > { %378 = vrot.lane.b32.xlu0 %v3223_v24, %s3013_s29  ;;  %373 = vrot.lane.b32.xlu1 %v3233_v29, %s3013_s29 }
  0x7c   : > { %380 = vrot.lane.b32.xlu1 %v3229_v27, %s3013_s29  ;;  %279 = vrot.lane.b32.xlu0 %v3233_v29, %s3011_s22  ;;  %s3026_s22 = smov 18   ;;  %s3028_s29 = smov 16  }
  0x80   : > { %420 = vrot.lane.b32.xlu1 %v3233_v29, %s3014_s5  ;;  %418 = vrot.lane.b32.xlu0 %v3225_v25, %s3014_s5 }
  0x84   : > { %427 = vrot.lane.b32.xlu1 %v3229_v27, %s3014_s5  ;;  %425 = vrot.lane.b32.xlu0 %v3223_v24, %s3014_s5  ;;  %s3029_s5 = smov 15  }
  0x88   : > { %467 = vrot.lane.b32.xlu1 %v3233_v29, %s3015_s6  ;;  %465 = vrot.lane.b32.xlu0 %v3225_v25, %s3015_s6 }
  0x8c   : > { %474 = vrot.lane.b32.xlu1 %v3229_v27, %s3015_s6  ;;  %472 = vrot.lane.b32.xlu0 %v3223_v24, %s3015_s6  ;;  %s3030_s6 = smov 14  }
  0x90   : > { %514 = vrot.lane.b32.xlu1 %v3233_v29, %s3016_s7  ;;  %512 = vrot.lane.b32.xlu0 %v3225_v25, %s3016_s7 }
  0x94   : > { %521 = vrot.lane.b32.xlu1 %v3229_v27, %s3016_s7  ;;  %519 = vrot.lane.b32.xlu0 %v3223_v24, %s3016_s7  ;;  %s3031_s7 = smov 13  }
  0x98   : > { %561 = vrot.lane.b32.xlu1 %v3233_v29, %s3017_s10  ;;  %559 = vrot.lane.b32.xlu0 %v3225_v25, %s3017_s10 }
  0x9c   : > { %568 = vrot.lane.b32.xlu1 %v3229_v27, %s3017_s10  ;;  %566 = vrot.lane.b32.xlu0 %v3223_v24, %s3017_s10  ;;  %s3032_s10 = smov 3  }
  0xa0   : > { %608 = vrot.lane.b32.xlu1 %v3233_v29, %s3018_s11  ;;  %606 = vrot.lane.b32.xlu0 %v3225_v25, %s3018_s11 }
  0xa4   : > { %615 = vrot.lane.b32.xlu1 %v3229_v27, %s3018_s11  ;;  %613 = vrot.lane.b32.xlu0 %v3223_v24, %s3018_s11  ;;  %s3033_s11 = smov 2  }
  0xa8   : > { %655 = vrot.lane.b32.xlu1 %v3233_v29, %s3019_s13  ;;  %653 = vrot.lane.b32.xlu0 %v3225_v25, %s3019_s13 }
  0xac   : > { %662 = vrot.lane.b32.xlu1 %v3229_v27, %s3019_s13  ;;  %660 = vrot.lane.b32.xlu0 %v3223_v24, %s3019_s13  ;;  %s3034_s13 = smov 1  }
  0xb0   : > { %702 = vrot.lane.b32.xlu1 %v3233_v29, %s3020_s14  ;;  %700 = vrot.lane.b32.xlu0 %v3225_v25, %s3020_s14 }
  0xb4   : > { %709 = vrot.lane.b32.xlu1 %v3229_v27, %s3020_s14  ;;  %707 = vrot.lane.b32.xlu0 %v3223_v24, %s3020_s14  ;;  %s3035_s14 = smov 127  }
  0xb8   : > { %749 = vrot.lane.b32.xlu1 %v3233_v29, %s3021_s25  ;;  %747 = vrot.lane.b32.xlu0 %v3225_v25, %s3021_s25 }
  0xbc   : > { %756 = vrot.lane.b32.xlu1 %v3229_v27, %s3021_s25  ;;  %754 = vrot.lane.b32.xlu0 %v3223_v24, %s3021_s25  ;;  %s3036_s25 = smov 126  }
  0xc0   : > { %796 = vrot.lane.b32.xlu1 %v3233_v29, %s3022_s21  ;;  %794 = vrot.lane.b32.xlu0 %v3225_v25, %s3022_s21 }
  0xc4   : > { %803 = vrot.lane.b32.xlu1 %v3229_v27, %s3022_s21  ;;  %801 = vrot.lane.b32.xlu0 %v3223_v24, %s3022_s21  ;;  %s3037_s21 = smov 125  }
  0xc8   : > { %843 = vrot.lane.b32.xlu1 %v3233_v29, %s3023_s26  ;;  %841 = vrot.lane.b32.xlu0 %v3225_v25, %s3023_s26 }
  0xcc   : > { %850 = vrot.lane.b32.xlu1 %v3229_v27, %s3023_s26  ;;  %848 = vrot.lane.b32.xlu0 %v3223_v24, %s3023_s26  ;;  %s3038_s26 = smov 115  }
  0xd0   : > { %890 = vrot.lane.b32.xlu1 %v3233_v29, %s3024_s27  ;;  %888 = vrot.lane.b32.xlu0 %v3225_v25, %s3024_s27 }
  0xd4   : > { %897 = vrot.lane.b32.xlu1 %v3229_v27, %s3024_s27  ;;  %895 = vrot.lane.b32.xlu0 %v3223_v24, %s3024_s27  ;;  %s3039_s27 = smov 114  }
  0xd8   : > { %937 = vrot.lane.b32.xlu1 %v3233_v29, %s3025_s8  ;;  %935 = vrot.lane.b32.xlu0 %v3225_v25, %s3025_s8 }
  0xda   : > { %v3289_v30 = vpop.permute.xlu1 %286  ;;  %v3291_v31 = vpop.permute.xlu0 %277 }
  0xdc   : > { %944 = vrot.lane.b32.xlu1 %v3229_v27, %s3025_s8  ;;  %942 = vrot.lane.b32.xlu0 %v3223_v24, %s3025_s8  ;;  %s3040_s8 = smov 113  }
  0xde   : > { %v3295_v32 = vpop.permute.xlu0 %324  ;;  %v3297_v33 = vpop.permute.xlu1 %288 }
  0xe0   : > { %984 = vrot.lane.b32.xlu1 %v3233_v29, %s3026_s22  ;;  %982 = vrot.lane.b32.xlu0 %v3225_v25, %s3026_s22 }
  0xe2   : > { %v3301_v34 = vpop.permute.xlu0 %331  ;;  %v3303_v35 = vpop.permute.xlu1 %326 }
  0xe4   : > { %991 = vrot.lane.b32.xlu1 %v3229_v27, %s3026_s22  ;;  %989 = vrot.lane.b32.xlu0 %v3223_v24, %s3026_s22  ;;  %s3041_s22 = smov 112  }
  0xe6   : > { %v3307_v36 = vpop.permute.xlu0 %371  ;;  %v3309_v37 = vpop.permute.xlu1 %333 }
  0xe8   : > { %1031 = vrot.lane.b32.xlu1 %v3233_v29, %s3027_s24  ;;  %1029 = vrot.lane.b32.xlu0 %v3225_v25, %s3027_s24 }
  0xea   : > { %v3313_v38 = vpop.permute.xlu0 %378  ;;  %v3315_v39 = vpop.permute.xlu1 %373 }
  0xec   : > { %1038 = vrot.lane.b32.xlu1 %v3229_v27, %s3027_s24  ;;  %1036 = vrot.lane.b32.xlu0 %v3223_v24, %s3027_s24  ;;  %s3042_s24 = smov 111  }
  0xee   : > { %v3319_v40 = vpop.permute.xlu1 %380  ;;  %v3321_v41 = vpop.permute.xlu0 %279 }
  0xf0   : > { %1078 = vrot.lane.b32.xlu1 %v3233_v29, %s3028_s29  ;;  %1076 = vrot.lane.b32.xlu0 %v3225_v25, %s3028_s29 }
  0xf2   : > { %v3325_v42 = vpop.permute.xlu1 %420  ;;  %v3327_v43 = vpop.permute.xlu0 %418 }
  0xf4   : > { %1085 = vrot.lane.b32.xlu1 %v3229_v27, %s3028_s29  ;;  %1083 = vrot.lane.b32.xlu0 %v3223_v24, %s3028_s29  ;;  %s3043_s29 = smov 110  }
  0xf6   : > { %v3331_v44 = vpop.permute.xlu1 %427  ;;  %v3333_v45 = vpop.permute.xlu0 %425 }
  0xf8   : > { %1125 = vrot.lane.b32.xlu1 %v3233_v29, %s3029_s5  ;;  %1123 = vrot.lane.b32.xlu0 %v3225_v25, %s3029_s5 }
  0xfa   : > { %v3337_v46 = vpop.permute.xlu1 %467  ;;  %v3339_v47 = vpop.permute.xlu0 %465 }
  0xfc   : > { %1132 = vrot.lane.b32.xlu1 %v3229_v27, %s3029_s5  ;;  %1130 = vrot.lane.b32.xlu0 %v3223_v24, %s3029_s5  ;;  %s3044_s5 = smov 109  }
  0xfe   : > { %v3343_v48 = vpop.permute.xlu1 %474  ;;  %v3345_v49 = vpop.permute.xlu0 %472 }
 0x100   : > { %1172 = vrot.lane.b32.xlu1 %v3233_v29, %s3030_s6  ;;  %1170 = vrot.lane.b32.xlu0 %v3225_v25, %s3030_s6 }
 0x102   : > { %v3349_v50 = vpop.permute.xlu1 %514  ;;  %v3351_v51 = vpop.permute.xlu0 %512 }
 0x104   : > { %1179 = vrot.lane.b32.xlu1 %v3229_v27, %s3030_s6  ;;  %1177 = vrot.lane.b32.xlu0 %v3223_v24, %s3030_s6  ;;  %s3045_s6 = smov 99  }
 0x106   : > { %v3355_v52 = vpop.permute.xlu1 %521  ;;  %v3357_v53 = vpop.permute.xlu0 %519 }
 0x108   : > { %1219 = vrot.lane.b32.xlu1 %v3233_v29, %s3031_s7  ;;  %1217 = vrot.lane.b32.xlu0 %v3225_v25, %s3031_s7 }
 0x10a   : > { %v3361_v54 = vpop.permute.xlu1 %561  ;;  %v3363_v55 = vpop.permute.xlu0 %559 }
 0x10c   : > { %1226 = vrot.lane.b32.xlu1 %v3229_v27, %s3031_s7  ;;  %1224 = vrot.lane.b32.xlu0 %v3223_v24, %s3031_s7  ;;  %s3046_s7 = smov 98  }
 0x10e   : > { %v3367_v56 = vpop.permute.xlu1 %568  ;;  %v3369_v57 = vpop.permute.xlu0 %566 }
 0x110   : > { %1266 = vrot.lane.b32.xlu1 %v3233_v29, %s3032_s10  ;;  %1264 = vrot.lane.b32.xlu0 %v3225_v25, %s3032_s10 }
 0x112   : > { %v3373_v58 = vpop.permute.xlu1 %608  ;;  %v3375_v59 = vpop.permute.xlu0 %606 }
 0x114   : > { %1273 = vrot.lane.b32.xlu1 %v3229_v27, %s3032_s10  ;;  %1271 = vrot.lane.b32.xlu0 %v3223_v24, %s3032_s10  ;;  %s3047_s10 = smov 97  }
 0x116   : > { %v3379_v60 = vpop.permute.xlu1 %615  ;;  %v3381_v61 = vpop.permute.xlu0 %613 }
 0x117   : > { %5625 = vst [vmem:[#allocation13_spill] sm:$0xff] %v3379_v60  ;;  %5626 = vst [vmem:[#allocation14_spill] sm:$0xff] %v3381_v61  ;;  %v291_v60 = vsel %vm283_vm1, %v3297_v33, %v3289_v30 }
 0x118   : > { %1313 = vrot.lane.b32.xlu1 %v3233_v29, %s3033_s11  ;;  %1311 = vrot.lane.b32.xlu0 %v3225_v25, %s3033_s11 }
 0x11a   : > { %v3385_v62 = vpop.permute.xlu1 %655  ;;  %v3387_v63 = vpop.permute.xlu0 %653 }
 0x11b   : > { %5627 = vst [vmem:[#allocation15_spill] sm:$0xff] %v3385_v62  ;;  %5628 = vst [vmem:[#allocation16_spill] sm:$0xff] %v3387_v63  ;;  %v3552_v63 = vld [vmem:[#allocation8 + $0x10] ss:$8 sm:$0x3] }
 0x11c   : > { %1320 = vrot.lane.b32.xlu1 %v3229_v27, %s3033_s11  ;;  %1318 = vrot.lane.b32.xlu0 %v3223_v24, %s3033_s11  ;;  %5657 = vst [vmem:[#allocation45_spill] sm:$0xff] %v3552_v63  ;;  %v3554_v62 = vld [vmem:[#allocation6 + $0x11] ss:$8 sm:$0x3]  ;;  %s3048_s11 = smov 96  }
 0x11d   : > { %5658 = vst [vmem:[#allocation46_spill] sm:$0xff] %v3554_v62  ;;  %v3608_v63 = vld [vmem:[#allocation6 + $0x14] ss:$8 sm:$0x3] }
 0x11e   : > { %v3391_v0 = vpop.permute.xlu1 %662  ;;  %v3393_v1 = vpop.permute.xlu0 %660  ;;  %5666 = vst [vmem:[#allocation54_spill] sm:$0xff] %v3608_v63  ;;  %v3622_v62 = vld [vmem:[#allocation8 + $0x15] ss:$8 sm:$0x3] }
 0x11f   : > { %5629 = vst [vmem:[#allocation17_spill] sm:$0xff] %v3391_v0  ;;  %5630 = vst [vmem:[#allocation18_spill] sm:$0xff] %v3393_v1  ;;  %v3662_v63 = vld [vmem:[#allocation8 + $0x17] ss:$8 sm:$0x3] }
 0x120   : > { %1360 = vrot.lane.b32.xlu1 %v3233_v29, %s3034_s13  ;;  %1358 = vrot.lane.b32.xlu0 %v3225_v25, %s3034_s13  ;;  %5667 = vst [vmem:[#allocation55_spill] sm:$0xff] %v3622_v62  ;;  %5673 = vst [vmem:[#allocation61_spill] sm:$0xff] %v3662_v63  ;;  %v3710_v62 = vld [vmem:[#allocation6 + $0x21] ss:$8 sm:$0x3]  ;;  %v329_v63 = vsel %vm328_vm2, %v3295_v32, %v3303_v35 }
 0x121   : > { %5677 = vst [vmem:[#allocation65_spill] sm:$0xff] %v3710_v62 }
 0x122   : > { %v3397_v2 = vpop.permute.xlu1 %702  ;;  %v3399_v3 = vpop.permute.xlu0 %700 }
 0x123   : > { %5631 = vst [vmem:[#allocation19_spill] sm:$0xff] %v3397_v2  ;;  %5632 = vst [vmem:[#allocation20_spill] sm:$0xff] %v3399_v3  ;;  %v3536_v3 = vld [vmem:[#allocation8 + $0x7] ss:$8 sm:$0x3] }
 0x124   : > { %1367 = vrot.lane.b32.xlu1 %v3229_v27, %s3034_s13  ;;  %1365 = vrot.lane.b32.xlu0 %v3223_v24, %s3034_s13  ;;  %5653 = vst [vmem:[#allocation41_spill] sm:$0xff] %v3536_v3  ;;  %v3538_v2 = vld [vmem:[#allocation6 + $0x10] ss:$8 sm:$0x3]  ;;  %s3049_s13 = smov 95  }
 0x125   : > { %5654 = vst [vmem:[#allocation42_spill] sm:$0xff] %v3538_v2  ;;  %v3610_v2 = vld [vmem:[#allocation8 + $0x14] ss:$8 sm:$0x3] }
 0x126   : > { %v3403_v4 = vpop.permute.xlu1 %709  ;;  %v3405_v5 = vpop.permute.xlu0 %707 }
 0x127   : > { %5633 = vst [vmem:[#allocation21_spill] sm:$0xff] %v3403_v4  ;;  %5634 = vst [vmem:[#allocation22_spill] sm:$0xff] %v3405_v5  ;;  %v3509_v5 = vld [vmem:[#allocation6 + $0x6] ss:$8 sm:$0x3] }
 0x128   : > { %1441 = vrot.lane.b32.xlu1 %v3233_v29, %s3035_s14  ;;  %1439 = vrot.lane.b32.xlu0 %v3225_v25, %s3035_s14  ;;  %v3523_v4 = vld [vmem:[#allocation6 + $0x7] ss:$8 sm:$0x3] }
 0x129   : > { %5652 = vst [vmem:[#allocation40_spill] sm:$0xff] %v3523_v4  ;;  %v3591_v4 = vld [vmem:[#allocation6 + $0x13] ss:$8 sm:$0x3] }
 0x12a   : > { %v3409_v6 = vpop.permute.xlu1 %749  ;;  %v3411_v7 = vpop.permute.xlu0 %747  ;;  %5662 = vst [vmem:[#allocation50_spill] sm:$0xff] %v3591_v4 }
 0x12b   : > { %5635 = vst [vmem:[#allocation23_spill] sm:$0xff] %v3409_v6  ;;  %5636 = vst [vmem:[#allocation24_spill] sm:$0xff] %v3411_v7  ;;  %v3495_v7 = vld [vmem:[#allocation8 + $0x4] ss:$8 sm:$0x3] }
 0x12c   : > { %1448 = vrot.lane.b32.xlu1 %v3229_v27, %s3035_s14  ;;  %1446 = vrot.lane.b32.xlu0 %v3223_v24, %s3035_s14  ;;  %v3497_v6 = vld [vmem:[#allocation6 + $0x5] ss:$8 sm:$0x3]  ;;  %s3050_s14 = smov 94  }
 0x12e   : > { %v3415_v8 = vpop.permute.xlu1 %756  ;;  %v3417_v9 = vpop.permute.xlu0 %754 }
 0x12f   : > { %5637 = vst [vmem:[#allocation25_spill] sm:$0xff] %v3415_v8  ;;  %5638 = vst [vmem:[#allocation26_spill] sm:$0xff] %v3417_v9  ;;  %v3479_v8 = vld [vmem:[#allocation8 + $0x3] ss:$8 sm:$0x3] }
 0x130   : > { %1488 = vrot.lane.b32.xlu1 %v3233_v29, %s3036_s25  ;;  %1486 = vrot.lane.b32.xlu0 %v3225_v25, %s3036_s25  ;;  %v3634_v9 = vld [vmem:[#allocation6 + $0x16] ss:$8 sm:$0x3] }
 0x131   : > { %5668 = vst [vmem:[#allocation56_spill] sm:$0xff] %v3634_v9  ;;  %v335_v9 = vsel %vm328_vm2, %v3301_v34, %v3309_v37 }
 0x132   : > { %v3421_v10 = vpop.permute.xlu1 %796  ;;  %v3423_v11 = vpop.permute.xlu0 %794 }
 0x133   : > { %5639 = vst [vmem:[#allocation27_spill] sm:$0xff] %v3421_v10  ;;  %5640 = vst [vmem:[#allocation28_spill] sm:$0xff] %v3423_v11 }
 0x134   : > { %1495 = vrot.lane.b32.xlu1 %v3229_v27, %s3036_s25  ;;  %1493 = vrot.lane.b32.xlu0 %v3223_v24, %s3036_s25  ;;  %s3051_s25 = smov 93  }
 0x136   : > { %v3427_v12 = vpop.permute.xlu1 %803  ;;  %v3429_v13 = vpop.permute.xlu0 %801 }
 0x137   : > { %5641 = vst [vmem:[#allocation29_spill] sm:$0xff] %v3427_v12  ;;  %5642 = vst [vmem:[#allocation30_spill] sm:$0xff] %v3429_v13  ;;  %v3468_v13 = vld [vmem:[#allocation6 + $0x3] ss:$8 sm:$0x3] }
 0x138   : > { %1535 = vrot.lane.b32.xlu1 %v3233_v29, %s3037_s21  ;;  %1533 = vrot.lane.b32.xlu0 %v3225_v25, %s3037_s21  ;;  %v3507_v12 = vld [vmem:[#allocation8 + $0x5] ss:$8 sm:$0x3] }
 0x13a   : > { %v3433_v15 = vpop.permute.xlu1 %843  ;;  %v3435_v16 = vpop.permute.xlu0 %841 }
 0x13b   : > { %5643 = vst [vmem:[#allocation31_spill] sm:$0xff] %v3433_v15  ;;  %5644 = vst [vmem:[#allocation32_spill] sm:$0xff] %v3435_v16  ;;  %v3461_v16 = vld [vmem:[#allocation8 + $0x2] ss:$8 sm:$0x3] }
 0x13c   : > { %1542 = vrot.lane.b32.xlu1 %v3229_v27, %s3037_s21  ;;  %1540 = vrot.lane.b32.xlu0 %v3223_v24, %s3037_s21  ;;  %v3463_v15 = vld [vmem:[#allocation6] ss:$8 sm:$0x3]  ;;  %s3052_s21 = smov 83  }
 0x13e   : > { %v3439_v18 = vpop.permute.xlu1 %850  ;;  %v3441_v19 = vpop.permute.xlu0 %848 }
 0x13f   : > { %5645 = vst [vmem:[#allocation33_spill] sm:$0xff] %v3439_v18  ;;  %5646 = vst [vmem:[#allocation34_spill] sm:$0xff] %v3441_v19  ;;  %v3457_v18 = vld [vmem:[#allocation8 + $0x1] ss:$8 sm:$0x3] }
 0x140   : > { %1582 = vrot.lane.b32.xlu1 %v3233_v29, %s3038_s26  ;;  %1580 = vrot.lane.b32.xlu0 %v3225_v25, %s3038_s26  ;;  %v3459_v19 = vld [vmem:[#allocation6 + $0x2] ss:$8 sm:$0x3] }
 0x142   : > { %v3453_v26 = vpop.permute.xlu1 %890  ;;  %v3455_v28 = vpop.permute.xlu0 %888 }
 0x143   : > { %5647 = vst [vmem:[#allocation35_spill] sm:$0xff] %v3453_v26  ;;  %5648 = vst [vmem:[#allocation36_spill] sm:$0xff] %v3455_v28  ;;  %v3567_v28 = vld [vmem:[#allocation6 + $0x12] ss:$8 sm:$0x3] }
 0x144   : > { %1589 = vrot.lane.b32.xlu1 %v3229_v27, %s3038_s26  ;;  %1587 = vrot.lane.b32.xlu0 %v3223_v24, %s3038_s26  ;;  %5660 = vst [vmem:[#allocation48_spill] sm:$0xff] %v3567_v28  ;;  %v3579_v26 = vld [vmem:[#allocation8 + $0x12] ss:$8 sm:$0x3]  ;;  %s3053_s26 = smov 82  }
 0x145   : > { %5661 = vst [vmem:[#allocation49_spill] sm:$0xff] %v3579_v26  ;;  %v3636_v26 = vld [vmem:[#allocation8 + $0x16] ss:$8 sm:$0x3] }
 0x146   : > { %v3483_v11 = vpop.permute.xlu1 %897  ;;  %v3485_v10 = vpop.permute.xlu0 %895  ;;  %5669 = vst [vmem:[#allocation57_spill] sm:$0xff] %v3636_v26  ;;  %v290_v26 = vsel %vm283_vm1, %v3289_v30, %v3297_v33  ;;  %v330_v30 = vsel %vm328_vm2, %v3303_v35, %v3295_v32  ;;  %v383_v35 = vsel %vm375_vm3, %v3319_v40, %v3313_v38 }
 0x147   : > { %5649 = vst [vmem:[#allocation37_spill] sm:$0xff] %v3483_v11  ;;  %5650 = vst [vmem:[#allocation38_spill] sm:$0xff] %v3485_v10  ;;  %v3521_v11 = vld [vmem:[#allocation8 + $0x6] ss:$8 sm:$0x3] }
 0x148   : > { %1629 = vrot.lane.b32.xlu1 %v3233_v29, %s3039_s27  ;;  %5651 = vst [vmem:[#allocation39_spill] sm:$0xff] %v3521_v11  ;;  %1627 = vrot.lane.b32.xlu0 %v3225_v25, %s3039_s27  ;;  %v3593_v10 = vld [vmem:[#allocation8 + $0x13] ss:$8 sm:$0x3] }
 0x149   : > { %5663 = vst [vmem:[#allocation51_spill] sm:$0xff] %v3593_v10  ;;  %v3650_v10 = vld [vmem:[#allocation6 + $0x17] ss:$8 sm:$0x3] }
 0x14a   : > { %v3540_v1 = vpop.permute.xlu1 %937  ;;  %v3542_v0 = vpop.permute.xlu0 %935  ;;  %5671 = vst [vmem:[#allocation59_spill] sm:$0xff] %v3650_v10 }
 0x14b   : > { %5655 = vst [vmem:[#allocation43_spill] sm:$0xff] %v3540_v1  ;;  %5656 = vst [vmem:[#allocation44_spill] sm:$0xff] %v3542_v0  ;;  %v3565_v1 = vld [vmem:[#allocation8 + $0x11] ss:$8 sm:$0x3] }
 0x14c   : > { %5659 = vst [vmem:[#allocation47_spill] sm:$0xff] %v3565_v1  ;;  %1636 = vrot.lane.b32.xlu1 %v3229_v27, %s3039_s27  ;;  %1634 = vrot.lane.b32.xlu0 %v3223_v24, %s3039_s27  ;;  %v3620_v0 = vld [vmem:[#allocation6 + $0x15] ss:$8 sm:$0x3]  ;;  %v336_v1 = vsel %vm328_vm2, %v3309_v37, %v3301_v34  ;;  %vm1080_vm2 = vcmp.lt.s32.totalorder %v3466_v17, 16  ;;  %s3054_s27 = smov 81  }
 0x14d   : > { %v3737_v34 = vld [vmem:[#allocation8 + $0x21] ss:$8 sm:$0x3]  ;;  %v3770_v37 = vld [vmem:[#allocation6 + $0x22] ss:$8 sm:$0x3] }
 0x14e   : > { %v3595_v3 = vpop.permute.xlu1 %944  ;;  %v3597_v11 = vpop.permute.xlu0 %942 }
 0x14f   : > { %5664 = vst [vmem:[#allocation52_spill] sm:$0xff] %v3595_v3  ;;  %5665 = vst [vmem:[#allocation53_spill] sm:$0xff] %v3597_v11  ;;  %v3675_v3 = vld [vmem:[#allocation6 + $0x20] ss:$8 sm:$0x3] }
 0x150   : > { %1676 = vrot.lane.b32.xlu1 %v3233_v29, %s3040_s8  ;;  %1674 = vrot.lane.b32.xlu0 %v3225_v25, %s3040_s8  ;;  %5674 = vst [vmem:[#allocation62_spill] sm:$0xff] %v3675_v3  ;;  %v3677_v11 = vld [vmem:[#allocation8 + $0x20] ss:$8 sm:$0x3]  ;;  %v5681_v3 = vrot.slane %v3457_v18, %v3446_v21 }
 0x151   : > { %5675 = vst [vmem:[#allocation63_spill] sm:$0xff] %v3677_v11 }
 0x152   : > { %v3648_v61 = vpop.permute.xlu1 %984  ;;  %v3652_v4 = vpop.permute.xlu0 %982  ;;  %v368_v32 = vmul.f32 %v5681_v3, %v335_v9  ;;  %v377_v3 = vsel %vm375_vm3, %v3315_v39, %v3307_v36  ;;  %v382_v9 = vsel %vm375_vm3, %v3313_v38, %v3319_v40 }
 0x153   : > { %5670 = vst [vmem:[#allocation58_spill] sm:$0xff] %v3648_v61  ;;  %5672 = vst [vmem:[#allocation60_spill] sm:$0xff] %v3652_v4  ;;  %v5678_v4 = vrot.slane %v3449_v22, %v3444_v20 }
 0x154   : > { %1683 = vrot.lane.b32.xlu1 %v3229_v27, %s3040_s8  ;;  %1681 = vrot.lane.b32.xlu0 %v3223_v24, %s3040_s8  ;;  %s3055_s8 = smov 80  }
 0x155   : > { %v3725_v28 = vmul.f32 %v5678_v4, %v291_v60  ;;  %v5680_v60 = vrot.slane %v3449_v22, %v3446_v21 }
 0x156   : > { %v3702_v61 = vpop.permute.xlu1 %991  ;;  %v3708_v10 = vpop.permute.xlu0 %989 }
 0x157   : > { %5676 = vst [vmem:[#allocation64_spill] sm:$0xff] %v3708_v10  ;;  %v5679_v10 = vrot.slane %v3457_v18, %v3444_v20  ;;  %v321_v4 = vmul.f32 %v5680_v60, %v290_v26  ;;  %v5684_v60 = vrot.slane %v3461_v16, %v3444_v20 }
 0x158   : > { %1723 = vrot.lane.b32.xlu1 %v3233_v29, %s3041_s22  ;;  %1721 = vrot.lane.b32.xlu0 %v3225_v25, %s3041_s22 }
 0x159   : > { %v367_v33 = vmul.f32 %v5679_v10, %v336_v1  ;;  %v5682_v10 = vrot.slane %v3451_v23, %v3444_v20  ;;  %v376_v1 = vsel %vm375_vm3, %v3307_v36, %v3315_v39  ;;  %v414_v62 = vmul.f32 %v5684_v60, %v383_v35 }
 0x15a   : > { %v3764_v18 = vpop.permute.xlu1 %1031  ;;  %v3766_v26 = vpop.permute.xlu0 %1029  ;;  %v285_v36 = vsel %vm283_vm1, %v3321_v41, %v3291_v31  ;;  %v5686_v35 = vrot.slane %v3461_v16, %v3446_v21  ;;  %v430_v16 = vsel %vm422_vm5, %v3331_v44, %v3333_v45  ;;  %vm1127_vm3 = vcmp.lt.s32.totalorder %v3466_v17, 15 }
 0x15b   : > { %v350_v22 = vmul.f32 %v5682_v10, %v330_v30  ;;  %v5683_v30 = vrot.slane %v3451_v23, %v3446_v21  ;;  %v5685_v23 = vrot.slane %v3459_v19, %v3444_v20 }
 0x15c   : > { %1730 = vrot.lane.b32.xlu1 %v3229_v27, %s3041_s22  ;;  %1728 = vrot.lane.b32.xlu0 %v3223_v24, %s3041_s22  ;;  %s3056_s22 = smov 79  }
 0x15d   : > { %v351_v10 = vmul.f32 %v5683_v30, %v329_v63  ;;  %v3783_v11 = vadd.f32 %v367_v33, %v350_v22  ;;  %v284_v63 = vsel %vm283_vm1, %v3291_v31, %v3321_v41  ;;  %v397_v33 = vmul.f32 %v5685_v23, %v377_v3  ;;  %v3808_v30 = vld [vmem:[#allocation8 + $0x22] ss:$8 sm:$0x3] }
 0x15e   : > { %v415_v22 = vmul.f32 %v5686_v35, %v382_v9  ;;  %v5687_v31 = vrot.slane %v3459_v19, %v3446_v21  ;;  %v3821_v3 = vpop.permute.xlu1 %1038  ;;  %v3823_v9 = vpop.permute.xlu0 %1036  ;;  %v5688_v19 = vrot.slane %v3463_v15, %v3444_v20  ;;  %v5689_v23 = vrot.slane %v3463_v15, %v3446_v21 }
 0x15f   : > { %v3797_v39 = vadd.f32 %v368_v32, %v351_v10  ;;  %v429_v32 = vsel %vm422_vm5, %v3333_v45, %v3331_v44  ;;  %v470_v44 = vsel %vm469_vm4, %v3339_v47, %v3337_v46  ;;  %v471_v45 = vsel %vm469_vm4, %v3337_v46, %v3339_v47 }
 0x160   : > { %v398_v41 = vmul.f32 %v5687_v31, %v376_v1  ;;  %v304_v1 = vmul.f32 %v5688_v19, %v285_v36  ;;  %v305_v35 = vmul.f32 %v5689_v23, %v284_v63  ;;  %v3842_v31 = vadd.f32 %v414_v62, %v397_v33  ;;  %1770 = vrot.lane.b32.xlu1 %v3233_v29, %s3042_s24  ;;  %v3853_v19 = vld [vmem:[#allocation6 + $0x23] ss:$8 sm:$0x3] }
 0x161   : > { %v424_v15 = vsel %vm422_vm5, %v3325_v42, %v3327_v43  ;;  %5690 = vst [vmem:[#allocation66_spill] sm:$0xff] %v3853_v19  ;;  %v423_v47 = vsel %vm422_vm5, %v3327_v43, %v3325_v42  ;;  %v5691_v62 = vrot.slane %v3479_v8, %v3444_v20  ;;  %v5692_v23 = vrot.slane %v3479_v8, %v3446_v21 }
 0x162   : > { %v3855_v46 = vadd.f32 %v415_v22, %v398_v41  ;;  %1768 = vrot.lane.b32.xlu0 %v3225_v25, %s3042_s24  ;;  %v5693_v36 = vrot.slane %v3481_v14, %v3444_v20  ;;  %v5694_v41 = vrot.slane %v3481_v14, %v3446_v21  ;;  %v476_v42 = vsel %vm469_vm4, %v3345_v49, %v3343_v48  ;;  %v3883_v8 = vpop.permute.xlu1 %1078 }
 0x163   : > { %v461_v33 = vmul.f32 %v5691_v62, %v430_v16  ;;  %v462_v63 = vmul.f32 %v5692_v23, %v429_v32  ;;  %v477_v43 = vsel %vm469_vm4, %v3343_v48, %v3345_v49  ;;  %v3885_v32 = vld [vmem:[#allocation8 + $0x23] ss:$8 sm:$0x3]  ;;  %v322_v16 = vadd.f32 %v3725_v28, %v304_v1  ;;  %v5721_v62 = vld [vmem:[#allocation16_spill] sm:$0xff] }
 0x164   : > { %v491_v22 = vmul.f32 %v5693_v36, %v471_v45  ;;  %v492_v40 = vmul.f32 %v5694_v41, %v470_v44  ;;  %5695 = vst [vmem:[#allocation67_spill] sm:$0xff] %v3885_v32  ;;  %v323_v14 = vadd.f32 %v321_v4, %v305_v35  ;;  %v5696_v44 = vrot.slane %v3468_v13, %v3444_v20  ;;  %v3891_v36 = vpop.permute.xlu0 %1076  ;;  %v3923_v41 = vld [vmem:[#allocation8 + $0x24] ss:$8 sm:$0x3] }
 0x165   : > { %v5697_v48 = vrot.slane %v3468_v13, %v3446_v21  ;;  %v517_v23 = vsel %vm516_vm6, %v3351_v51, %v3349_v50  ;;  %v518_v28 = vsel %vm516_vm6, %v3349_v50, %v3351_v51  ;;  %1777 = vrot.lane.b32.xlu1 %v3229_v27, %s3042_s24  ;;  %v5698_v1 = vrot.slane %v3495_v7, %v3444_v20 }
 0x166   : > { %v444_v45 = vmul.f32 %v5696_v44, %v424_v15  ;;  %v5699_v35 = vrot.slane %v3495_v7, %v3446_v21  ;;  %1775 = vrot.lane.b32.xlu0 %v3223_v24, %s3042_s24  ;;  %5701 = vst [vmem:[#allocation69_spill] sm:$0xff] %v3923_v41  ;;  %v493_v7 = vadd.f32 %v491_v22, %v322_v16  ;;  %vm1033_vm1 = vcmp.lt.s32.totalorder %v3466_v17, 17  ;;  %s3057_s24 = smov 78  }
 0x167   : > { %v445_v49 = vmul.f32 %v5697_v48, %v423_v47  ;;  %v508_v13 = vmul.f32 %v5698_v1, %v477_v43  ;;  %v3921_v47 = vld [vmem:[#allocation6 + $0x24] ss:$8 sm:$0x3]  ;;  %v3929_v48 = vpop.permute.xlu1 %1085  ;;  %v3931_v1 = vld [vmem:[#allocation6 + $0x30] ss:$8 sm:$0x3]  ;;  %v5704_v51 = vrot.slane %v3497_v6, %v3446_v21 }
 0x168   : > { %v509_v15 = vmul.f32 %v5699_v35, %v476_v42  ;;  %5700 = vst [vmem:[#allocation68_spill] sm:$0xff] %v3921_v47  ;;  %v3925_v44 = vadd.f32 %v461_v33, %v444_v45  ;;  %v494_v42 = vadd.f32 %v492_v40, %v323_v14  ;;  %5702 = vst [vmem:[#allocation70_spill] sm:$0xff] %v3931_v1  ;;  %v3947_v33 = vpop.permute.xlu0 %1083  ;;  %v3959_v45 = vld [vmem:[#allocation6 + $0x25] ss:$8 sm:$0x3]  ;;  %vm1268_vm4 = vcmp.lt.s32.totalorder %v3466_v17, 3 }
 0x169   : > { %v3927_v43 = vadd.f32 %v462_v63, %v445_v49  ;;  %v5703_v35 = vrot.slane %v3497_v6, %v3444_v20  ;;  %v539_v4 = vmul.f32 %v5704_v51, %v517_v23  ;;  %v523_v63 = vsel %vm516_vm6, %v3357_v53, %v3355_v52  ;;  %1817 = vrot.lane.b32.xlu1 %v3233_v29, %s3043_s29  ;;  %v3998_v49 = vld [vmem:[#allocation6 + $0x26] ss:$8 sm:$0x3]  ;;  %v4114_v1 = vld [vmem:[#allocation8 + $0x27] ss:$8 sm:$0x3] }
 0x16a   : > { %v524_v40 = vsel %vm516_vm6, %v3355_v52, %v3357_v53  ;;  %v3961_v52 = vadd.f32 %v508_v13, %v493_v7  ;;  %v3963_v53 = vadd.f32 %v509_v15, %v494_v42  ;;  %1815 = vrot.lane.b32.xlu0 %v3225_v25, %s3043_s29  ;;  %v5706_v51 = vrot.slane %v3507_v12, %v3444_v20  ;;  %v5712_v6 = vld [vmem:[#allocation39_spill] sm:$0xff]  ;;  %v5754_v47 = vld [vmem:[#allocation28_spill] sm:$0xff] }
 0x16b   : > { %v538_v50 = vmul.f32 %v5703_v35, %v518_v28  ;;  %v3971_v28 = vld [vmem:[#allocation8 + $0x25] ss:$8 sm:$0x3]  ;;  %v5707_v13 = vrot.slane %v3507_v12, %v3446_v21  ;;  %v564_v7 = vsel %vm563_vm7, %v3363_v55, %v3361_v54  ;;  %v565_v42 = vsel %vm563_vm7, %v3361_v54, %v3363_v55  ;;  %v3988_v23 = vpop.permute.xlu1 %1125  ;;  %5708 = vst [vmem:[#allocation72_spill] sm:$0xff] %v3998_v49 }
 0x16c   : > { %5705 = vst [vmem:[#allocation71_spill] sm:$0xff] %v3971_v28  ;;  %v555_v35 = vmul.f32 %v5706_v51, %v524_v40  ;;  %v541_v51 = vadd.f32 %v539_v4, %v3797_v39  ;;  %v3992_v12 = vpop.permute.xlu0 %1123  ;;  %v570_v54 = vsel %vm563_vm7, %v3369_v57, %v3367_v56  ;;  %v571_v55 = vsel %vm563_vm7, %v3367_v56, %v3369_v57 }
 0x16d   : > { %v556_v15 = vmul.f32 %v5707_v13, %v523_v63  ;;  %v540_v40 = vadd.f32 %v538_v50, %v3783_v11  ;;  %1862 = vrot.lane.b32.xlu1 %v3225_v25, %s3044_s5  ;;  %v5709_v4 = vrot.slane %v3509_v5, %v3444_v20  ;;  %v5710_v14 = vrot.slane %v3509_v5, %v3446_v21  ;;  %v5717_v11 = vld [vmem:[#allocation40_spill] sm:$0xff] }
 0x16e   : > { %v611_v56 = vsel %vm610_vm8, %v3375_v59, %v3373_v58  ;;  %v612_v57 = vsel %vm610_vm8, %v3373_v58, %v3375_v59  ;;  %1822 = vrot.lane.b32.xlu0 %v3223_v24, %s3043_s29  ;;  %v5713_v58 = vrot.slane %v5712_v6, %v3444_v20  ;;  %vm1174_vm5 = vcmp.lt.s32.totalorder %v3466_v17, 14 }
 0x16f   : > { %v585_v50 = vmul.f32 %v5709_v4, %v565_v42  ;;  %v586_v16 = vmul.f32 %v5710_v14, %v564_v7  ;;  %v4030_v22 = vadd.f32 %v555_v35, %v540_v40  ;;  %v4032_v42 = vadd.f32 %v556_v15, %v541_v51  ;;  %v4034_v4 = vpop.permute.xlu1 %1132  ;;  %v4040_v7 = vld [vmem:[#allocation8 + $0x26] ss:$8 sm:$0x3] }
 0x170   : > { %5711 = vst [vmem:[#allocation73_spill] sm:$0xff] %v4040_v7  ;;  %v602_v59 = vmul.f32 %v5713_v58, %v571_v55  ;;  %v5714_v35 = vrot.slane %v5712_v6, %v3446_v21  ;;  %v5715_v15 = vld [vmem:[#allocation13_spill] sm:$0xff]  ;;  %v5716_v51 = vld [vmem:[#allocation14_spill] sm:$0xff]  ;;  %v4057_v5 = vpop.permute.xlu0 %1130  ;;  %v5718_v55 = vrot.slane %v5717_v11, %v3444_v20  ;;  %v5719_v6 = vrot.slane %v5717_v11, %v3446_v21 }
 0x171   : > { %v617_v39 = vsel %vm610_vm8, %v5716_v51, %v5715_v15  ;;  %v618_v14 = vsel %vm610_vm8, %v5715_v15, %v5716_v51  ;;  %1909 = vrot.lane.b32.xlu1 %v3225_v25, %s3045_s6  ;;  %v588_v11 = vadd.f32 %v586_v16, %v3855_v46  ;;  %v5726_v46 = vld [vmem:[#allocation17_spill] sm:$0xff]  ;;  %v5727_v16 = vld [vmem:[#allocation18_spill] sm:$0xff]  ;;  %5731 = vst [vmem:[#allocation13_spill] sm:$0xff] %v4114_v1  ;;  %vm1362_vm6 = vcmp.lt.s32.totalorder %v3466_v17, 1 }
 0x172   : > { %v603_v40 = vmul.f32 %v5714_v35, %v570_v54  ;;  %v632_v58 = vmul.f32 %v5718_v55, %v612_v57  ;;  %v633_v54 = vmul.f32 %v5719_v6, %v611_v56  ;;  %v5720_v35 = vld [vmem:[#allocation15_spill] sm:$0xff]  ;;  %v587_v57 = vadd.f32 %v585_v50, %v3842_v31  ;;  %1864 = vrot.lane.b32.xlu0 %v3233_v29, %s3044_s5  ;;  %v5723_v55 = vld [vmem:[#allocation41_spill] sm:$0xff] }
 0x173   : > { %v658_v13 = vsel %vm657_vm9, %v5721_v62, %v5720_v35  ;;  %v659_v15 = vsel %vm657_vm9, %v5720_v35, %v5721_v62  ;;  %v4084_v62 = vld [vmem:[#allocation6 + $0x27] ss:$8 sm:$0x3]  ;;  %v5724_v6 = vrot.slane %v5723_v55, %v3444_v20  ;;  %v5725_v31 = vrot.slane %v5723_v55, %v3446_v21  ;;  %v4100_v56 = vpop.permute.xlu1 %1172 }
 0x174   : > { %5722 = vst [vmem:[#allocation39_spill] sm:$0xff] %v4084_v62  ;;  %v664_v63 = vsel %vm657_vm9, %v5727_v16, %v5726_v46  ;;  %v665_v51 = vsel %vm657_vm9, %v5726_v46, %v5727_v16  ;;  %v4102_v38 = vadd.f32 %v602_v59, %v587_v57  ;;  %v4104_v10 = vadd.f32 %v603_v40, %v588_v11  ;;  %v4112_v60 = vpop.permute.xlu0 %1170  ;;  %v5753_v62 = vld [vmem:[#allocation27_spill] sm:$0xff] }
 0x175   : > { %v649_v35 = vmul.f32 %v5724_v6, %v618_v14  ;;  %v650_v50 = vmul.f32 %v5725_v31, %v617_v39  ;;  %v5728_v14 = vld [vmem:[#allocation42_spill] sm:$0xff]  ;;  %v634_v46 = vadd.f32 %v632_v58, %v3925_v44  ;;  %v635_v16 = vadd.f32 %v633_v54, %v3927_v43  ;;  %1956 = vrot.lane.b32.xlu1 %v3225_v25, %s3046_s7  ;;  %v5736_v58 = vld [vmem:[#allocation19_spill] sm:$0xff]  ;;  %v5737_v54 = vld [vmem:[#allocation20_spill] sm:$0xff] }
 0x176   : > { %v5729_v55 = vrot.slane %v5728_v14, %v3444_v20  ;;  %v5730_v6 = vrot.slane %v5728_v14, %v3446_v21  ;;  %v705_v14 = vsel %vm704_vm10, %v5737_v54, %v5736_v58  ;;  %1911 = vrot.lane.b32.xlu0 %v3233_v29, %s3045_s6  ;;  %vm1315_vm7 = vcmp.lt.s32.totalorder %v3466_v17, 2 }
 0x177   : > { %vm1443_vm8 = vcmp.lt.s32.totalorder %v3466_v17, 127  ;;  %vm1221_vm9 = vcmp.lt.s32.totalorder %v3466_v17, 13 }
 0x178   : > { %v679_v39 = vmul.f32 %v5729_v55, %v659_v15  ;;  %v680_v31 = vmul.f32 %v5730_v6, %v658_v13  ;;  %v4124_v15 = vld [vmem:[#allocation6 + $0x31] ss:$8 sm:$0x3]  ;;  %v706_v55 = vsel %vm704_vm10, %v5736_v58, %v5737_v54  ;;  %v4142_v6 = vadd.f32 %v649_v35, %v634_v46  ;;  %v4157_v35 = vpop.permute.xlu0 %1177 }
 0x179   : > { %5732 = vst [vmem:[#allocation14_spill] sm:$0xff] %v4124_v15  ;;  %v5733_v13 = vld [vmem:[#allocation45_spill] sm:$0xff]  ;;  %5740 = vst [vmem:[#allocation16_spill] sm:$0xff] %v4157_v35  ;;  %v5742_v54 = vld [vmem:[#allocation46_spill] sm:$0xff]  ;;  %1824 = vrot.lane.b32.xlu1 %v3229_v27, %s3043_s29  ;;  %s3058_s29 = smov 77  }
 0x17a   : > { %v5734_v57 = vrot.slane %v5733_v13, %v3444_v20  ;;  %v5735_v44 = vrot.slane %v5733_v13, %v3446_v21  ;;  %v681_v40 = vadd.f32 %v679_v39, %v3961_v52  ;;  %v682_v58 = vadd.f32 %v680_v31, %v3963_v53  ;;  %v5745_v39 = vld [vmem:[#allocation21_spill] sm:$0xff]  ;;  %v5746_v31 = vld [vmem:[#allocation22_spill] sm:$0xff]  ;;  %1958 = vrot.lane.b32.xlu0 %v3233_v29, %s3046_s7 }
 0x17b   : > { %v5743_v13 = vrot.slane %v5742_v54, %v3444_v20  ;;  %v5744_v52 = vrot.slane %v5742_v54, %v3446_v21  ;;  %v711_v59 = vsel %vm704_vm10, %v5746_v31, %v5745_v39  ;;  %v712_v46 = vsel %vm704_vm10, %v5745_v39, %v5746_v31  ;;  %v5748_v39 = vld [vmem:[#allocation24_spill] sm:$0xff]  ;;  %v5770_v15 = vld [vmem:[#allocation49_spill] sm:$0xff] }
 0x17c   : > { %v696_v11 = vmul.f32 %v5734_v57, %v665_v51  ;;  %v697_v43 = vmul.f32 %v5735_v44, %v664_v63  ;;  %v4144_v51 = vadd.f32 %v650_v50, %v635_v16  ;;  %v4146_v57 = vpop.permute.xlu1 %1179  ;;  %v4152_v44 = vld [vmem:[#allocation8 + $0x31] ss:$8 sm:$0x3]  ;;  %v4163_v16 = vld [vmem:[#allocation6 + $0x32] ss:$8 sm:$0x3]  ;;  %v5771_v28 = vrot.slane %v5770_v15, %v3444_v20 }
 0x17d   : > { %5738 = vst [vmem:[#allocation40_spill] sm:$0xff] %v4146_v57  ;;  %5739 = vst [vmem:[#allocation15_spill] sm:$0xff] %v4152_v44  ;;  %v726_v63 = vmul.f32 %v5743_v13, %v706_v55  ;;  %v727_v53 = vmul.f32 %v5744_v52, %v705_v14  ;;  %v5747_v52 = vld [vmem:[#allocation23_spill] sm:$0xff]  ;;  %1871 = vrot.lane.b32.xlu1 %v3229_v27, %s3044_s5  ;;  %v5804_v35 = vld [vmem:[#allocation57_spill] sm:$0xff]  ;;  %vm1490_vm10 = vcmp.lt.s32.totalorder %v3466_v17, 126 }
 0x17e   : > { %5741 = vst [vmem:[#allocation41_spill] sm:$0xff] %v4163_v16  ;;  %v4182_v55 = vadd.f32 %v696_v11, %v681_v40  ;;  %v4184_v13 = vadd.f32 %v697_v43, %v682_v58  ;;  %v752_v31 = vsel %vm751_vm11, %v5748_v39, %v5747_v52  ;;  %v753_v40 = vsel %vm751_vm11, %v5747_v52, %v5748_v39  ;;  %v5750_v14 = vld [vmem:[#allocation47_spill] sm:$0xff]  ;;  %v4221_v58 = vpop.permute.xlu0 %1217 }
 0x17f   : > { %v5751_v54 = vrot.slane %v5750_v14, %v3444_v20  ;;  %v5752_v41 = vrot.slane %v5750_v14, %v3446_v21  ;;  %v799_v52 = vsel %vm798_vm12, %v5754_v47, %v5753_v62  ;;  %v800_v39 = vsel %vm798_vm12, %v5753_v62, %v5754_v47  ;;  %5755 = vst [vmem:[#allocation18_spill] sm:$0xff] %v4221_v58  ;;  %v4223_v43 = vld [vmem:[#allocation8 + $0x32] ss:$8 sm:$0x3]  ;;  %v5758_v14 = vld [vmem:[#allocation26_spill] sm:$0xff] }
 0x180   : > { %v4200_v11 = vpop.permute.xlu1 %1219  ;;  %5756 = vst [vmem:[#allocation42_spill] sm:$0xff] %v4223_v43  ;;  %v5759_v62 = vld [vmem:[#allocation48_spill] sm:$0xff]  ;;  %1869 = vrot.lane.b32.xlu0 %v3223_v24, %s3044_s5  ;;  %v5805_v57 = vrot.slane %v5804_v35, %v3444_v20  ;;  %s2573_s5 = sld [smem:[#allocation2]] }
 0x181   : > { %5749 = vst [vmem:[#allocation17_spill] sm:$0xff] %v4200_v11  ;;  %v743_v50 = vmul.f32 %v5751_v54, %v712_v46  ;;  %v744_v1 = vmul.f32 %v5752_v41, %v711_v59  ;;  %v728_v46 = vadd.f32 %v726_v63, %v4030_v22  ;;  %v729_v41 = vadd.f32 %v727_v53, %v4032_v42  ;;  %v5757_v59 = vld [vmem:[#allocation25_spill] sm:$0xff]  ;;  %v5763_v53 = vld [vmem:[#allocation30_spill] sm:$0xff]  ;;  %v4268_v44 = vld [vmem:[#allocation8 + $0x33] ss:$8 sm:$0x3] }
 0x182   : > { %v758_v54 = vsel %vm751_vm11, %v5758_v14, %v5757_v59  ;;  %v759_v47 = vsel %vm751_vm11, %v5757_v59, %v5758_v14  ;;  %v5760_v16 = vrot.slane %v5759_v62, %v3444_v20  ;;  %v5761_v22 = vrot.slane %v5759_v62, %v3446_v21  ;;  %v5762_v63 = vld [vmem:[#allocation29_spill] sm:$0xff]  ;;  %5769 = vst [vmem:[#allocation20_spill] sm:$0xff] %v4268_v44 }
 0x183   : > { %v805_v58 = vsel %vm798_vm12, %v5763_v53, %v5762_v63  ;;  %v806_v59 = vsel %vm798_vm12, %v5762_v63, %v5763_v53  ;;  %v745_v49 = vadd.f32 %v743_v50, %v728_v46  ;;  %v746_v32 = vadd.f32 %v744_v1, %v729_v41  ;;  %1918 = vrot.lane.b32.xlu1 %v3229_v27, %s3045_s6  ;;  %v5796_v1 = vld [vmem:[#allocation55_spill] sm:$0xff] }
 0x184   : > { %v773_v7 = vmul.f32 %v5760_v16, %v753_v40  ;;  %v774_v42 = vmul.f32 %v5761_v22, %v752_v31  ;;  %v4254_v16 = vld [vmem:[#allocation6 + $0x33] ss:$8 sm:$0x3]  ;;  %v4262_v11 = vpop.permute.xlu1 %1226  ;;  %1916 = vrot.lane.b32.xlu0 %v3223_v24, %s3045_s6  ;;  %v5792_v46 = vrot.slane %v3610_v2, %v3444_v20  ;;  %v5797_v44 = vrot.slane %v5796_v1, %v3444_v20  ;;  %s2728_s6 = sshll.u32 %s3109_s3, 7 }
 0x185   : > { %5764 = vst [vmem:[#allocation45_spill] sm:$0xff] %v4254_v16  ;;  %v5765_v40 = vld [vmem:[#allocation50_spill] sm:$0xff]  ;;  %5768 = vst [vmem:[#allocation19_spill] sm:$0xff] %v4262_v11  ;;  %vm1537_vm11 = vcmp.lt.s32.totalorder %v3466_v17, 125  ;;  %vm1584_vm12 = vcmp.lt.s32.totalorder %v3466_v17, 115 }
 0x186   : > { %v5766_v31 = vrot.slane %v5765_v40, %v3444_v20  ;;  %v5767_v62 = vrot.slane %v5765_v40, %v3446_v21  ;;  %v5772_v40 = vrot.slane %v5770_v15, %v3446_v21  ;;  %v775_v15 = vadd.f32 %v773_v7, %v4102_v38 }
 0x187   : > { %v776_v50 = vadd.f32 %v774_v42, %v4104_v10  ;;  %1965 = vrot.lane.b32.xlu1 %v3229_v27, %s3046_s7 }
 0x188   : > { %v820_v14 = vmul.f32 %v5766_v31, %v800_v39  ;;  %v821_v22 = vmul.f32 %v5767_v62, %v799_v52  ;;  %v790_v39 = vmul.f32 %v5771_v28, %v759_v47  ;;  %v791_v52 = vmul.f32 %v5772_v40, %v758_v54  ;;  %v4276_v31 = vpop.permute.xlu0 %1224  ;;  %v5774_v62 = vld [vmem:[#allocation51_spill] sm:$0xff]  ;;  %v4309_v7 = vpop.permute.xlu1 %1266  ;;  %1963 = vrot.lane.b32.xlu0 %v3223_v24, %s3046_s7  ;;  %s243_s7 = scalar_lea.vmem [#allocation9], %s2716_s30 }
 0x189   : > { %5773 = vst [vmem:[#allocation46_spill] sm:$0xff] %v4276_v31  ;;  %v5775_v63 = vrot.slane %v5774_v62, %v3444_v20  ;;  %v5776_v53 = vrot.slane %v5774_v62, %v3446_v21  ;;  %v5777_v47 = vld [vmem:[#allocation31_spill] sm:$0xff] }
 0x18a   : > { %v822_v41 = vadd.f32 %v820_v14, %v4142_v6  ;;  %v823_v54 = vadd.f32 %v821_v22, %v4144_v51  ;;  %v792_v42 = vadd.f32 %v790_v39, %v775_v15  ;;  %v5780_v6 = vld [vmem:[#allocation36_spill] sm:$0xff]  ;;  %v5783_v15 = vld [vmem:[#allocation54_spill] sm:$0xff] }
 0x18b   : > { %v837_v11 = vmul.f32 %v5775_v63, %v806_v59  ;;  %v838_v43 = vmul.f32 %v5776_v53, %v805_v58  ;;  %v5778_v59 = vld [vmem:[#allocation32_spill] sm:$0xff]  ;;  %v793_v63 = vadd.f32 %v791_v52, %v776_v50  ;;  %v5779_v53 = vld [vmem:[#allocation35_spill] sm:$0xff]  ;;  %v5784_v50 = vrot.slane %v5783_v15, %v3444_v20  ;;  %2005 = vrot.lane.b32.xlu1 %v3233_v29, %s3047_s10 }
 0x18c   : > { %v846_v38 = vsel %vm845_vm13, %v5778_v59, %v5777_v47  ;;  %v847_v10 = vsel %vm845_vm13, %v5777_v47, %v5778_v59  ;;  %v893_v51 = vsel %vm892_vm14, %v5780_v6, %v5779_v53  ;;  %v894_v14 = vsel %vm892_vm14, %v5779_v53, %v5780_v6  ;;  %v4320_v22 = vpop.permute.xlu0 %1264  ;;  %v5781_v47 = vld [vmem:[#allocation33_spill] sm:$0xff]  ;;  %v5782_v59 = vld [vmem:[#allocation34_spill] sm:$0xff]  ;;  %2003 = vrot.lane.b32.xlu0 %v3225_v25, %s3047_s10 }
 0x18d   : > { %v839_v40 = vadd.f32 %v837_v11, %v822_v41  ;;  %v840_v62 = vadd.f32 %v838_v43, %v823_v54  ;;  %v852_v39 = vsel %vm845_vm13, %v5782_v59, %v5781_v47  ;;  %v853_v52 = vsel %vm845_vm13, %v5781_v47, %v5782_v59  ;;  %v5786_v41 = vld [vmem:[#allocation37_spill] sm:$0xff]  ;;  %v5787_v54 = vld [vmem:[#allocation38_spill] sm:$0xff] }
 0x18e   : > { %v867_v53 = vmul.f32 %v5784_v50, %v847_v10  ;;  %v5785_v11 = vrot.slane %v5783_v15, %v3446_v21  ;;  %v899_v6 = vsel %vm892_vm14, %v5787_v54, %v5786_v41  ;;  %v900_v47 = vsel %vm892_vm14, %v5786_v41, %v5787_v54  ;;  %v5790_v50 = vld [vmem:[#allocation43_spill] sm:$0xff]  ;;  %v4363_v54 = vpop.permute.xlu1 %1273 }
 0x18f   : > { %v5788_v10 = vrot.slane %v3620_v0, %v3444_v20  ;;  %2052 = vrot.lane.b32.xlu1 %v3233_v29, %s3048_s11  ;;  %vm1631_vm13 = vcmp.lt.s32.totalorder %v3466_v17, 114  ;;  %vm1678_vm14 = vcmp.lt.s32.totalorder %v3466_v17, 113 }
 0x190   : > { %v868_v43 = vmul.f32 %v5785_v11, %v846_v38  ;;  %v5789_v38 = vrot.slane %v3620_v0, %v3446_v21  ;;  %v5791_v11 = vld [vmem:[#allocation44_spill] sm:$0xff]  ;;  %v5793_v0 = vrot.slane %v3610_v2, %v3446_v21  ;;  %v5798_v2 = vrot.slane %v5796_v1, %v3446_v21  ;;  %2050 = vrot.lane.b32.xlu0 %v3225_v25, %s3048_s11 }
 0x191   : > { %v914_v59 = vmul.f32 %v5788_v10, %v894_v14  ;;  %v940_v58 = vsel %vm939_vm15, %v5791_v11, %v5790_v50  ;;  %v941_v41 = vsel %vm939_vm15, %v5790_v50, %v5791_v11  ;;  %v884_v14 = vmul.f32 %v5792_v46, %v853_v52  ;;  %v5794_v10 = vld [vmem:[#allocation52_spill] sm:$0xff]  ;;  %v4379_v11 = vpop.permute.xlu0 %1271  ;;  %v5799_v52 = vld [vmem:[#allocation58_spill] sm:$0xff] }
 0x192   : > { %v915_v15 = vmul.f32 %v5789_v38, %v893_v51  ;;  %v885_v51 = vmul.f32 %v5793_v0, %v852_v39  ;;  %v5795_v38 = vld [vmem:[#allocation53_spill] sm:$0xff]  ;;  %v931_v46 = vmul.f32 %v5797_v44, %v900_v47  ;;  %v932_v39 = vmul.f32 %v5798_v2, %v899_v6  ;;  %v5800_v0 = vld [vmem:[#allocation60_spill] sm:$0xff] }
 0x193   : > { %v946_v28 = vsel %vm939_vm15, %v5795_v38, %v5794_v10  ;;  %v947_v50 = vsel %vm939_vm15, %v5794_v10, %v5795_v38  ;;  %v987_v16 = vsel %vm986_vm0, %v5800_v0, %v5799_v52  ;;  %v988_v10 = vsel %vm986_vm0, %v5799_v52, %v5800_v0  ;;  %v5801_v1 = vld [vmem:[#allocation56_spill] sm:$0xff]  ;;  %2099 = vrot.lane.b32.xlu1 %v3233_v29, %s3049_s13 }
 0x194   : > { %v869_v44 = vadd.f32 %v867_v53, %v4182_v55  ;;  %v870_v47 = vadd.f32 %v868_v43, %v4184_v13  ;;  %v5802_v6 = vrot.slane %v5801_v1, %v3444_v20  ;;  %v5803_v2 = vrot.slane %v5801_v1, %v3446_v21  ;;  %v4413_v53 = vpop.permute.xlu1 %1313  ;;  %v5807_v43 = vld [vmem:[#allocation59_spill] sm:$0xff]  ;;  %2097 = vrot.lane.b32.xlu0 %v3225_v25, %s3049_s13 }
 0x195   : > { %v916_v52 = vadd.f32 %v914_v59, %v745_v49  ;;  %v917_v0 = vadd.f32 %v915_v15, %v746_v32  ;;  %v978_v19 = vmul.f32 %v5805_v57, %v947_v50  ;;  %v5806_v55 = vrot.slane %v5804_v35, %v3446_v21  ;;  %v5810_v32 = vld [vmem:[#allocation64_spill] sm:$0xff]  ;;  %v4430_v35 = vpop.permute.xlu0 %1311 }
 0x196   : > { %v961_v38 = vmul.f32 %v5802_v6, %v941_v41  ;;  %v962_v31 = vmul.f32 %v5803_v2, %v940_v58  ;;  %v5808_v41 = vrot.slane %v5807_v43, %v3444_v20  ;;  %v5809_v58 = vrot.slane %v5807_v43, %v3446_v21 }
 0x197   : > { %v979_v13 = vmul.f32 %v5806_v55, %v946_v28  ;;  %v993_v49 = vsel %vm986_vm0, %v5810_v32, %v3702_v61  ;;  %v994_v57 = vsel %vm986_vm0, %v3702_v61, %v5810_v32  ;;  %v886_v28 = vadd.f32 %v884_v14, %v869_v44  ;;  %2146 = vrot.lane.b32.xlu1 %v3233_v29, %s3050_s14 }
 0x198   : > { %v1008_v1 = vmul.f32 %v5808_v41, %v988_v10  ;;  %v1009_v6 = vmul.f32 %v5809_v58, %v987_v16  ;;  %v887_v59 = vadd.f32 %v885_v51, %v870_v47  ;;  %v933_v15 = vadd.f32 %v931_v46, %v916_v52  ;;  %v5811_v51 = vld [vmem:[#allocation61_spill] sm:$0xff]  ;;  %2144 = vrot.lane.b32.xlu0 %v3225_v25, %s3050_s14 }
 0x199   : > { %v934_v50 = vadd.f32 %v932_v39, %v917_v0  ;;  %v963_v16 = vadd.f32 %v961_v38, %v792_v42  ;;  %v964_v10 = vadd.f32 %v962_v31, %v793_v63  ;;  %v1034_v61 = vsel %vm1033_vm1, %v3766_v26, %v3764_v18  ;;  %v4461_v52 = vpop.permute.xlu0 %1318  ;;  %v5814_v0 = vld [vmem:[#allocation62_spill] sm:$0xff] }
 0x19a   : > { %v1035_v14 = vsel %vm1033_vm1, %v3764_v18, %v3766_v26  ;;  %v5812_v46 = vrot.slane %v5811_v51, %v3444_v20  ;;  %v5813_v31 = vrot.slane %v5811_v51, %v3446_v21  ;;  %v1081_v63 = vsel %vm1080_vm2, %v3891_v36, %v3883_v8  ;;  %v4459_v26 = vpop.permute.xlu1 %1320 }
 0x19b   : > { %v1082_v18 = vsel %vm1080_vm2, %v3883_v8, %v3891_v36  ;;  %v980_v44 = vadd.f32 %v978_v19, %v963_v16  ;;  %v981_v47 = vadd.f32 %v979_v13, %v964_v10  ;;  %v1010_v38 = vadd.f32 %v1008_v1, %v839_v40  ;;  %2012 = vrot.lane.b32.xlu1 %v3229_v27, %s3047_s10 }
 0x19c   : > { %v1025_v39 = vmul.f32 %v5812_v46, %v994_v57  ;;  %v1026_v42 = vmul.f32 %v5813_v31, %v993_v49  ;;  %v1011_v2 = vadd.f32 %v1009_v6, %v840_v62  ;;  %v5815_v55 = vrot.slane %v5814_v0, %v3444_v20  ;;  %v5817_v62 = vld [vmem:[#allocation65_spill] sm:$0xff]  ;;  %2010 = vrot.lane.b32.xlu0 %v3223_v24, %s3047_s10  ;;  %s2618_s10 = sshll.u32 %s243_s7, 4  ;;  %s2619_s10 = int_to_ptr.vmem [resolvable:$true] %s2618_s10 }
 0x19d   : > { %v5816_v41 = vrot.slane %v5814_v0, %v3446_v21  ;;  %v1128_v19 = vsel %vm1127_vm3, %v3992_v12, %v3988_v23  ;;  %v1129_v8 = vsel %vm1127_vm3, %v3988_v23, %v3992_v12  ;;  %v1040_v36 = vsel %vm1033_vm1, %v3823_v9, %v3821_v3 }
 0x19e   : > { %v1055_v43 = vmul.f32 %v5815_v55, %v1035_v14  ;;  %v1041_v40 = vsel %vm1033_vm1, %v3821_v3, %v3823_v9  ;;  %v5818_v13 = vrot.slane %v5817_v62, %v3444_v20  ;;  %v5819_v23 = vrot.slane %v5817_v62, %v3446_v21  ;;  %v4510_v49 = vpop.permute.xlu1 %1360 }
 0x19f   : > { %v1056_v58 = vmul.f32 %v5816_v41, %v1034_v61  ;;  %v4498_v6 = vadd.f32 %v1025_v39, %v1010_v38  ;;  %v4500_v32 = vadd.f32 %v1026_v42, %v1011_v2  ;;  %v1087_v3 = vsel %vm1080_vm2, %v3947_v33, %v3929_v48  ;;  %v5822_v39 = vld [vmem:[#allocation63_spill] sm:$0xff]  ;;  %2059 = vrot.lane.b32.xlu1 %v3229_v27, %s3048_s11 }
 0x1a0   : > { %v1102_v1 = vmul.f32 %v5818_v13, %v1082_v18  ;;  %v1103_v12 = vmul.f32 %v5819_v23, %v1081_v63  ;;  %v1088_v9 = vsel %vm1080_vm2, %v3929_v48, %v3947_v33  ;;  %v5820_v57 = vrot.slane %v3770_v37, %v3444_v20  ;;  %v4526_v33 = vpop.permute.xlu0 %1358  ;;  %2057 = vrot.lane.b32.xlu0 %v3223_v24, %s3048_s11 }
 0x1a1   : > { %v5821_v10 = vrot.slane %v3770_v37, %v3446_v21  ;;  %v1134_v14 = vsel %vm1127_vm3, %v4057_v5, %v4034_v4  ;;  %v1135_v48 = vsel %vm1127_vm3, %v4034_v4, %v4057_v5  ;;  %v4528_v51 = vadd.f32 %v1055_v43, %v886_v28 }
 0x1a2   : > { %v1149_v16 = vmul.f32 %v5820_v57, %v1129_v8  ;;  %v4530_v46 = vadd.f32 %v1056_v58, %v887_v59  ;;  %v5823_v37 = vrot.slane %v5822_v39, %v3444_v20  ;;  %v5824_v42 = vrot.slane %v5822_v39, %v3446_v21  ;;  %v1368_v43 = vpop.permute.xlu1 %1367 }
 0x1a3   : > { %v1150_v61 = vmul.f32 %v5821_v10, %v1128_v19  ;;  %v1104_v4 = vadd.f32 %v1102_v1, %v933_v15  ;;  %v1105_v5 = vadd.f32 %v1103_v12, %v934_v50  ;;  %v5825_v28 = vrot.slane %v3737_v34, %v3444_v20  ;;  %v5831_v1 = vld [vmem:[#allocation66_spill] sm:$0xff]  ;;  %v5835_v10 = vld [vmem:[#allocation16_spill] sm:$0xff]  ;;  %2106 = vrot.lane.b32.xlu1 %v3229_v27, %s3049_s13 }
 0x1a4   : > { %v4535_v31 = vmul.f32 %v5823_v37, %v1041_v40  ;;  %v4540_v63 = vmul.f32 %v5824_v42, %v1040_v36  ;;  %v5826_v18 = vrot.slane %v3737_v34, %v3446_v21  ;;  %v5827_v2 = vrot.slane %v3808_v30, %v3444_v20  ;;  %v1366_v8 = vpop.permute.xlu0 %1365  ;;  %2104 = vrot.lane.b32.xlu0 %v3223_v24, %s3049_s13 }
 0x1a5   : > { %v1119_v59 = vmul.f32 %v5825_v28, %v1088_v9  ;;  %v5828_v55 = vrot.slane %v3808_v30, %v3446_v21  ;;  %v1269_v50 = vsel %vm1268_vm4, %v4320_v22, %v4309_v7  ;;  %v1270_v34 = vsel %vm1268_vm4, %v4309_v7, %v4320_v22 }
 0x1a6   : > { %v1120_v38 = vmul.f32 %v5826_v18, %v1087_v3  ;;  %v1166_v0 = vmul.f32 %v5827_v2, %v1135_v48  ;;  %v1151_v41 = vadd.f32 %v1149_v16, %v980_v44  ;;  %v1152_v58 = vadd.f32 %v1150_v61, %v981_v47  ;;  %v1442_v57 = vpop.permute.xlu1 %1441  ;;  %v5834_v16 = vld [vmem:[#allocation40_spill] sm:$0xff] }
 0x1a7   : > { %v1167_v15 = vmul.f32 %v5828_v55, %v1134_v14  ;;  %v1175_v19 = vsel %vm1174_vm5, %v4112_v60, %v4100_v56  ;;  %v1176_v30 = vsel %vm1174_vm5, %v4100_v56, %v4112_v60  ;;  %v1275_v7 = vsel %vm1268_vm4, %v4379_v11, %v4363_v54  ;;  %v5836_v14 = vld [vmem:[#allocation71_spill] sm:$0xff]  ;;  %2153 = vrot.lane.b32.xlu1 %v3229_v27, %s3050_s14 }
 0x1a8   : > { %v1276_v22 = vsel %vm1268_vm4, %v4363_v54, %v4379_v11  ;;  %v4585_v44 = vsel %vm1362_vm6, %v1366_v8, %v1368_v43  ;;  %v4589_v60 = vsel %vm1362_vm6, %v1368_v43, %v1366_v8  ;;  %v1121_v56 = vadd.f32 %v1119_v59, %v1104_v4  ;;  %v1440_v4 = vpop.permute.xlu0 %1439  ;;  %v5842_v43 = vld [vmem:[#allocation67_spill] sm:$0xff]  ;;  %2151 = vrot.lane.b32.xlu0 %v3223_v24, %s3050_s14  ;;  %s2616_s14 = scalar_lea.hbm %s5498_s4, %s2728_s6 }
 0x1a9   : > { %v1122_v47 = vadd.f32 %v1120_v38, %v1105_v5  ;;  %v5829_v36 = vrot.slane %v3959_v45, %v3444_v20  ;;  %v5830_v54 = vrot.slane %v3959_v45, %v3446_v21  ;;  %v1168_v62 = vadd.f32 %v1166_v0, %v1151_v41  ;;  %v5839_v0 = vld [vmem:[#allocation14_spill] sm:$0xff] }
 0x1aa   : > { %v1169_v13 = vadd.f32 %v1167_v15, %v1152_v58  ;;  %v5832_v23 = vrot.slane %v5831_v1, %v3444_v20  ;;  %v5833_v3 = vrot.slane %v5831_v1, %v3446_v21  ;;  %v1181_v45 = vsel %vm1174_vm5, %v5835_v10, %v5834_v16  ;;  %v1449_v8 = vpop.permute.xlu1 %1448 }
 0x1ab   : > { %v1290_v40 = vmul.f32 %v5829_v36, %v1270_v34  ;;  %v1291_v11 = vmul.f32 %v5830_v54, %v1269_v50  ;;  %v1182_v61 = vsel %vm1174_vm5, %v5834_v16, %v5835_v10  ;;  %v5837_v48 = vrot.slane %v5836_v14, %v3444_v20  ;;  %2193 = vrot.lane.b32.xlu1 %v3233_v29, %s3051_s25 }
 0x1ac   : > { %v1196_v12 = vmul.f32 %v5832_v23, %v1176_v30  ;;  %v1197_v9 = vmul.f32 %v5833_v3, %v1175_v19  ;;  %v5838_v37 = vrot.slane %v5836_v14, %v3446_v21  ;;  %v1316_v5 = vsel %vm1315_vm7, %v4430_v35, %v4413_v53  ;;  %v5852_v14 = vld [vmem:[#allocation18_spill] sm:$0xff]  ;;  %2191 = vrot.lane.b32.xlu0 %v3225_v25, %s3051_s25 }
 0x1ad   : > { %v1307_v39 = vmul.f32 %v5837_v48, %v1276_v22  ;;  %v1317_v28 = vsel %vm1315_vm7, %v4413_v53, %v4430_v35  ;;  %v1444_v59 = vsel %vm1443_vm8, %v1440_v4, %v1442_v57  ;;  %v1445_v18 = vsel %vm1443_vm8, %v1442_v57, %v1440_v4 }
 0x1ae   : > { %v1308_v42 = vmul.f32 %v5838_v37, %v1275_v7  ;;  %v1292_v38 = vadd.f32 %v1290_v40, %v1121_v56  ;;  %v1293_v2 = vadd.f32 %v1291_v11, %v1122_v47  ;;  %v5840_v55 = vrot.slane %v5839_v0, %v3444_v20  ;;  %v5845_v56 = vld [vmem:[#allocation72_spill] sm:$0xff]  ;;  %v1489_v37 = vpop.permute.xlu1 %1488 }
 0x1af   : > { %v5841_v50 = vrot.slane %v5839_v0, %v3446_v21  ;;  %v1198_v53 = vadd.f32 %v1196_v12, %v4498_v6  ;;  %v1199_v35 = vadd.f32 %v1197_v9, %v4500_v32  ;;  %v5843_v41 = vrot.slane %v5842_v43, %v3444_v20  ;;  %v1447_v32 = vpop.permute.xlu0 %1446  ;;  %v5848_v9 = vld [vmem:[#allocation15_spill] sm:$0xff]  ;;  %2240 = vrot.lane.b32.xlu1 %v3233_v29, %s3052_s21 }
 0x1b0   : > { %v1465_v15 = vmul.f32 %v5840_v55, %v1444_v59  ;;  %v5844_v19 = vrot.slane %v5842_v43, %v3446_v21  ;;  %v1309_v7 = vadd.f32 %v1307_v39, %v1292_v38  ;;  %v1310_v22 = vadd.f32 %v1308_v42, %v1293_v2  ;;  %v5853_v42 = vld [vmem:[#allocation73_spill] sm:$0xff]  ;;  %2238 = vrot.lane.b32.xlu0 %v3225_v25, %s3052_s21 }
 0x1b1   : > { %v1466_v34 = vmul.f32 %v5841_v50, %v1445_v18  ;;  %v1213_v58 = vmul.f32 %v5843_v41, %v1182_v61  ;;  %v5846_v47 = vrot.slane %v5845_v56, %v3444_v20  ;;  %v5847_v6 = vrot.slane %v5845_v56, %v3446_v21  ;;  %v5851_v61 = vld [vmem:[#allocation17_spill] sm:$0xff] }
 0x1b2   : > { %v1214_v30 = vmul.f32 %v5844_v19, %v1181_v45  ;;  %v1322_v54 = vsel %vm1315_vm7, %v4461_v52, %v4459_v26  ;;  %v1323_v11 = vsel %vm1315_vm7, %v4459_v26, %v4461_v52  ;;  %v1450_v1 = vsel %vm1443_vm8, %v1447_v32, %v1449_v8 }
 0x1b3   : > { %v1337_v36 = vmul.f32 %v5846_v47, %v1317_v28  ;;  %v1338_v40 = vmul.f32 %v5847_v6, %v1316_v5  ;;  %v1451_v23 = vsel %vm1443_vm8, %v1449_v8, %v1447_v32  ;;  %v1467_v12 = vadd.f32 %v1465_v15, %v1309_v7  ;;  %v1487_v2 = vpop.permute.xlu0 %1486  ;;  %v5863_v7 = vld [vmem:[#allocation46_spill] sm:$0xff]  ;;  %v1496_v47 = vpop.permute.xlu1 %1495  ;;  %2287 = vrot.lane.b32.xlu1 %v3233_v29, %s3053_s26 }
 0x1b4   : > { %v1468_v3 = vadd.f32 %v1466_v34, %v1310_v22  ;;  %v5849_v57 = vrot.slane %v5848_v9, %v3444_v20  ;;  %v5850_v10 = vrot.slane %v5848_v9, %v3446_v21  ;;  %v1215_v26 = vadd.f32 %v1213_v58, %v1198_v53  ;;  %2285 = vrot.lane.b32.xlu0 %v3225_v25, %s3053_s26 }
 0x1b5   : > { %v1216_v52 = vadd.f32 %v1214_v30, %v1199_v35  ;;  %v1222_v48 = vsel %vm1221_vm9, %v5852_v14, %v5851_v61  ;;  %v1223_v39 = vsel %vm1221_vm9, %v5851_v61, %v5852_v14  ;;  %v5854_v4 = vrot.slane %v5853_v42, %v3444_v20  ;;  %v5856_v35 = vld [vmem:[#allocation41_spill] sm:$0xff] }
 0x1b6   : > { %v1482_v16 = vmul.f32 %v5849_v57, %v1450_v1  ;;  %v1483_v45 = vmul.f32 %v5850_v10, %v1451_v23  ;;  %v5855_v28 = vrot.slane %v5853_v42, %v3446_v21  ;;  %v1363_v0 = vsel %vm1362_vm6, %v4526_v33, %v4510_v49 }
 0x1b7   : > { %v1354_v5 = vmul.f32 %v5854_v4, %v1323_v11  ;;  %v1364_v55 = vsel %vm1362_vm6, %v4510_v49, %v4526_v33  ;;  %v1491_v15 = vsel %vm1490_vm10, %v1487_v2, %v1489_v37  ;;  %v1492_v50 = vsel %vm1490_vm10, %v1489_v37, %v1487_v2  ;;  %v5859_v49 = vld [vmem:[#allocation68_spill] sm:$0xff]  ;;  %v1494_v23 = vpop.permute.xlu0 %1493  ;;  %2334 = vrot.lane.b32.xlu1 %v3233_v29, %s3054_s27 }
 0x1b8   : > { %v1355_v59 = vmul.f32 %v5855_v28, %v1322_v54  ;;  %v4695_v18 = vadd.f32 %v1482_v16, %v1467_v12  ;;  %v4697_v38 = vadd.f32 %v1483_v45, %v1468_v3  ;;  %v1339_v34 = vadd.f32 %v1337_v36, %v1168_v62  ;;  %v5867_v12 = vld [vmem:[#allocation13_spill] sm:$0xff]  ;;  %2332 = vrot.lane.b32.xlu0 %v3225_v25, %s3054_s27 }
 0x1b9   : > { %v1340_v53 = vadd.f32 %v1338_v40, %v1169_v13  ;;  %v5857_v43 = vrot.slane %v5856_v35, %v3444_v20  ;;  %v5858_v58 = vrot.slane %v5856_v35, %v3446_v21  ;;  %v5860_v33 = vrot.slane %v5859_v49, %v3444_v20  ;;  %v5862_v13 = vld [vmem:[#allocation19_spill] sm:$0xff] }
 0x1ba   : > { %v5861_v8 = vrot.slane %v5859_v49, %v3446_v21  ;;  %v1228_v22 = vsel %vm1221_vm9, %v5863_v7, %v5862_v13  ;;  %v1229_v56 = vsel %vm1221_vm9, %v5862_v13, %v5863_v7  ;;  %v1356_v36 = vadd.f32 %v1354_v5, %v1339_v34  ;;  %v5864_v40 = vld [vmem:[#allocation39_spill] sm:$0xff]  ;;  %v5873_v5 = vld [vmem:[#allocation69_spill] sm:$0xff] }
 0x1bb   : > { %v1512_v41 = vmul.f32 %v5857_v43, %v1491_v15  ;;  %v1513_v19 = vmul.f32 %v5858_v58, %v1492_v50  ;;  %v1243_v30 = vmul.f32 %v5860_v33, %v1223_v39  ;;  %v1357_v6 = vadd.f32 %v1355_v59, %v1340_v53  ;;  %v1534_v35 = vpop.permute.xlu0 %1533  ;;  %2200 = vrot.lane.b32.xlu1 %v3229_v27, %s3051_s25 }
 0x1bc   : > { %v1244_v62 = vmul.f32 %v5861_v8, %v1222_v48  ;;  %v5865_v32 = vrot.slane %v5864_v40, %v3444_v20  ;;  %v5866_v11 = vrot.slane %v5864_v40, %v3446_v21  ;;  %v5868_v3 = vrot.slane %v5867_v12, %v3444_v20  ;;  %v5870_v48 = vld [vmem:[#allocation42_spill] sm:$0xff]  ;;  %2198 = vrot.lane.b32.xlu0 %v3223_v24, %s3051_s25  ;;  %s2604_s25 = scalar_lea.sflag [#allocation5], %s3206_s28 }
 0x1bd   : > { %v5869_v57 = vrot.slane %v5867_v12, %v3446_v21  ;;  %v1497_v10 = vsel %vm1490_vm10, %v1494_v23, %v1496_v47  ;;  %v1498_v45 = vsel %vm1490_vm10, %v1496_v47, %v1494_v23  ;;  %v1514_v61 = vadd.f32 %v1512_v41, %v1356_v36  ;;  %v5876_v41 = vld [vmem:[#allocation45_spill] sm:$0xff]  ;;  %v5882_v12 = vld [vmem:[#allocation20_spill] sm:$0xff] }
 0x1be   : > { %v1384_v54 = vmul.f32 %v5865_v32, %v1364_v55  ;;  %v1385_v1 = vmul.f32 %v5866_v11, %v1363_v0  ;;  %v1401_v9 = vmul.f32 %v5868_v3, %v4589_v60  ;;  %v1515_v14 = vadd.f32 %v1513_v19, %v1357_v6  ;;  %v1536_v55 = vpop.permute.xlu1 %1535  ;;  %v1594_v36 = vld [vmem:[#allocation6 + $0x34] ss:$8 sm:$0x3] }
 0x1bf   : > { %v1402_v16 = vmul.f32 %v5869_v57, %v4585_v44  ;;  %v5871_v60 = vrot.slane %v5870_v48, %v3444_v20  ;;  %v5872_v37 = vrot.slane %v5870_v48, %v3446_v21  ;;  %v1074_v42 = vadd.f32 %v4535_v31, %v4528_v51  ;;  %v1423_v51 = vld [vmem:[#allocation8 + $0x30] ss:$8 sm:$0x3]  ;;  %v1541_v11 = vpop.permute.xlu0 %1540  ;;  %2247 = vrot.lane.b32.xlu1 %v3229_v27, %s3052_s21 }
 0x1c0   : > { %v1075_v4 = vadd.f32 %v4540_v63, %v4530_v46  ;;  %v5874_v28 = vrot.slane %v5873_v5, %v3444_v20  ;;  %v5875_v2 = vrot.slane %v5873_v5, %v3446_v21  ;;  %v1386_v15 = vadd.f32 %v1384_v54, %v1215_v26  ;;  %2245 = vrot.lane.b32.xlu0 %v3223_v24, %s3052_s21  ;;  %s2936_s21 = scalar_lea.vmem %s2619_s10, 128 }
 0x1c1   : > { %v1529_v39 = vmul.f32 %v5871_v60, %v1497_v10  ;;  %v1530_v44 = vmul.f32 %v5872_v37, %v1498_v45  ;;  %v1387_v50 = vadd.f32 %v1385_v1, %v1216_v52  ;;  %v1245_v31 = vadd.f32 %v1243_v30, %v1074_v42  ;;  %v5879_v30 = vld [vmem:[#allocation70_spill] sm:$0xff]  ;;  %v1611_v60 = vld [vmem:[#allocation8 + $0x34] ss:$8 sm:$0x3]  ;;  %p2937_p11 = scmp.ne.s32.totalorder %s2619_s10, %s2936_s21 }
 0x1c2   : > { %v1260_v59 = vmul.f32 %v5874_v28, %v1229_v56  ;;  %v1261_v0 = vmul.f32 %v5875_v2, %v1228_v22  ;;  %v1246_v43 = vadd.f32 %v1244_v62, %v1075_v4  ;;  %v1538_v46 = vsel %vm1537_vm11, %v1534_v35, %v1536_v55  ;;  %v1543_v22 = vpop.permute.xlu1 %1542 }
 0x1c3   : > { %v4773_v34 = vadd.f32 %v1529_v39, %v1514_v61  ;;  %v4775_v53 = vadd.f32 %v1530_v44, %v1515_v14  ;;  %v1539_v63 = vsel %vm1537_vm11, %v1536_v55, %v1534_v35  ;;  %v1403_v26 = vadd.f32 %v1401_v9, %v1386_v15  ;;  %v1581_v4 = vpop.permute.xlu0 %1580  ;;  %v1641_v15 = vld [vmem:[#allocation6 + $0x35] ss:$8 sm:$0x3]  ;;  %2294 = vrot.lane.b32.xlu1 %v3229_v27, %s3053_s26  ;;  %p2938_p1 = pnand %p2937_p11, %p5910_p0 }
 0x1c4   : > { %v1404_v52 = vadd.f32 %v1402_v16, %v1387_v50  ;;  %v5877_v58 = vrot.slane %v5876_v41, %v3444_v20  ;;  %v5878_v49 = vrot.slane %v5876_v41, %v3446_v21  ;;  %v5880_v8 = vrot.slane %v5879_v30, %v3444_v20  ;;  %2292 = vrot.lane.b32.xlu0 %v3223_v24, %s3053_s26  ;;  %s3059_s26 = smov [#allocation9]  }
 0x1c5   : > { %v5881_v13 = vrot.slane %v5879_v30, %v3446_v21  ;;  %v1428_v56 = vrot.slane %v1423_v51, %v3444_v20  ;;  %v1432_v47 = vrot.slane %v1423_v51, %v3446_v21  ;;  %v1262_v6 = vadd.f32 %v1260_v59, %v1245_v31  ;;  %p2939_p2 = pneg %p2938_p1  ;;  %s2940_s3 = sshll.u32 %s3059_s26, 4  ;;  %s2941_s3 = int_to_ptr.vmem [resolvable:$false] %s2940_s3 }
 0x1c6   : > { %v1559_v19 = vmul.f32 %v5877_v58, %v1538_v46  ;;  %v1560_v33 = vmul.f32 %v5878_v49, %v1539_v63  ;;  %v1418_v62 = vmul.f32 %v5880_v8, %v3225_v25  ;;  %v1263_v40 = vadd.f32 %v1261_v0, %v1246_v43  ;;  %v1583_v61 = vpop.permute.xlu1 %1582  ;;  %s2942_s30 = scalar_lea.vmem %s2941_s3, 256  ;;  %p2943_p6 = scmp.lt.s32.totalorder %s2619_s10, %s2941_s3 }
 0x1c7   : > { %v1419_v7 = vmul.f32 %v5881_v13, %v3233_v29  ;;  %v1544_v1 = vsel %vm1537_vm11, %v1541_v11, %v1543_v22  ;;  %v1545_v23 = vsel %vm1537_vm11, %v1543_v22, %v1541_v11  ;;  %v5883_v3 = vrot.slane %v5882_v12, %v3444_v20  ;;  %v1588_v31 = vpop.permute.xlu0 %1587  ;;  %2341 = vrot.lane.b32.xlu1 %v3229_v27, %s3054_s27  ;;  %p2944_p12 = scmp.lt.s32.totalorder %s2942_s30, %s2936_s21 }
 0x1c8   : > { %v1561_v32 = vadd.f32 %v1559_v19, %v1403_v26  ;;  %v1562_v54 = vadd.f32 %v1560_v33, %v1404_v52  ;;  %v5884_v57 = vrot.slane %v5882_v12, %v3446_v21  ;;  %v1599_v10 = vrot.slane %v1594_v36, %v3444_v20  ;;  %v1658_v33 = vld [vmem:[#allocation8 + $0x35] ss:$8 sm:$0x3]  ;;  %2339 = vrot.lane.b32.xlu0 %v3223_v24, %s3054_s27 }
 0x1c9   : > { %v1576_v9 = vmul.f32 %v5883_v3, %v1544_v1  ;;  %v1603_v45 = vrot.slane %v1594_v36, %v3446_v21  ;;  %v1435_v14 = vmul.f32 %v1428_v56, %v3223_v24  ;;  %v1436_v48 = vmul.f32 %v1432_v47, %v3229_v27  ;;  %p2945_p7 = por %p2944_p12, %p2943_p6 }
 0x1ca   : > { %v1577_v16 = vmul.f32 %v5884_v57, %v1545_v23  ;;  %v1420_v39 = vadd.f32 %v1418_v62, %v1262_v6  ;;  %v1421_v37 = vadd.f32 %v1419_v7, %v1263_v40  ;;  %v1585_v5 = vsel %vm1584_vm12, %v1581_v4, %v1583_v61  ;;  %v1590_v50 = vpop.permute.xlu1 %1589  ;;  %v1688_v40 = vld [vmem:[#allocation6 + $0x36] ss:$8 sm:$0x3]  ;;  %v1705_v57 = vld [vmem:[#allocation8 + $0x36] ss:$8 sm:$0x3] }
 0x1cb   : > { %v4820_v44 = vadd.f32 %v1576_v9, %v1561_v32  ;;  %v1586_v28 = vsel %vm1584_vm12, %v1583_v61, %v1581_v4  ;;  %v1606_v59 = vmul.f32 %v1599_v10, %v1585_v5  ;;  %v1616_v0 = vrot.slane %v1611_v60, %v3444_v20  ;;  %v1628_v62 = vpop.permute.xlu0 %1627  ;;  %v1735_v5 = vld [vmem:[#allocation6 + $0x37] ss:$8 sm:$0x3]  ;;  %2381 = vrot.lane.b32.xlu1 %v3233_v29, %s3055_s8  ;;  %p2946_p9 = pnand %p2945_p7, %p2939_p2 }
 0x1cc   : > { %v4822_v42 = vadd.f32 %v1577_v16, %v1562_v54  ;;  %v1607_v2 = vmul.f32 %v1603_v45, %v1586_v28  ;;  %v1620_v55 = vrot.slane %v1611_v60, %v3446_v21  ;;  %v1437_v35 = vadd.f32 %v1435_v14, %v1420_v39  ;;  %2379 = vrot.lane.b32.xlu0 %v3225_v25, %s3055_s8 }
 0x1cd   : > { %v1438_v51 = vadd.f32 %v1436_v48, %v1421_v37  ;;  %v1591_v43 = vsel %vm1584_vm12, %v1588_v31, %v1590_v50  ;;  %v1592_v46 = vsel %vm1584_vm12, %v1590_v50, %v1588_v31  ;;  %v1646_v63 = vrot.slane %v1641_v15, %v3444_v20 }
 0x1ce   : > { %v1650_v26 = vrot.slane %v1641_v15, %v3446_v21  ;;  %v1608_v52 = vadd.f32 %v1606_v59, %v1437_v35  ;;  %v1623_v58 = vmul.f32 %v1616_v0, %v1591_v43  ;;  %v1624_v19 = vmul.f32 %v1620_v55, %v1592_v46  ;;  %v1630_v49 = vpop.permute.xlu1 %1629 }
 0x1cf   : > { %v1609_v41 = vadd.f32 %v1607_v2, %v1438_v51  ;;  %v1632_v13 = vsel %vm1631_vm13, %v1628_v62, %v1630_v49  ;;  %v1633_v7 = vsel %vm1631_vm13, %v1630_v49, %v1628_v62  ;;  %v1663_v47 = vrot.slane %v1658_v33, %v3444_v20  ;;  %v1635_v11 = vpop.permute.xlu0 %1634  ;;  %v1752_v51 = vld [vmem:[#allocation8 + $0x37] ss:$8 sm:$0x3]  ;;  %2428 = vrot.lane.b32.xlu1 %v3233_v29, %s3056_s22 }
 0x1d0   : > { %v4845_v30 = vadd.f32 %v1623_v58, %v1608_v52  ;;  %v1653_v22 = vmul.f32 %v1646_v63, %v1632_v13  ;;  %v1654_v56 = vmul.f32 %v1650_v26, %v1633_v7  ;;  %v1667_v36 = vrot.slane %v1658_v33, %v3446_v21  ;;  %2426 = vrot.lane.b32.xlu0 %v3225_v25, %s3056_s22  ;;  %v1782_v33 = vld [vmem:[#allocation6 + $0x40] ss:$8 sm:$0x3] }
 0x1d1   : > { %v4847_v8 = vadd.f32 %v1624_v19, %v1609_v41  ;;  %v1710_v39 = vrot.slane %v1705_v57, %v3444_v20  ;;  %v1714_v37 = vrot.slane %v1705_v57, %v3446_v21  ;;  %vm1725_vm15 = vcmp.lt.s32.totalorder %v3466_v17, 112  ;;  %v1829_v57 = vld [vmem:[#allocation6 + $0x41] ss:$8 sm:$0x3] }
 0x1d2   : > { %v1637_v6 = vpop.permute.xlu1 %1636  ;;  %v1655_v32 = vadd.f32 %v1653_v22, %v4695_v18  ;;  %v1656_v54 = vadd.f32 %v1654_v56, %v4697_v38  ;;  %v1693_v18 = vrot.slane %v1688_v40, %v3444_v20  ;;  %v1697_v38 = vrot.slane %v1688_v40, %v3446_v21  ;;  %v1799_v40 = vld [vmem:[#allocation8 + $0x40] ss:$8 sm:$0x3] }
 0x1d3   : > { %v1638_v1 = vsel %vm1631_vm13, %v1635_v11, %v1637_v6  ;;  %v1639_v23 = vsel %vm1631_vm13, %v1637_v6, %v1635_v11  ;;  %v1675_v45 = vpop.permute.xlu0 %1674  ;;  %v1757_v58 = vrot.slane %v1752_v51, %v3444_v20  ;;  %v1761_v19 = vrot.slane %v1752_v51, %v3446_v21  ;;  %2475 = vrot.lane.b32.xlu1 %v3233_v29, %s3057_s24 }
 0x1d4   : > { %v1670_v12 = vmul.f32 %v1663_v47, %v1638_v1  ;;  %v1671_v3 = vmul.f32 %v1667_v36, %v1639_v23  ;;  %vm1772_vm0 = vcmp.lt.s32.totalorder %v3466_v17, 111  ;;  %2473 = vrot.lane.b32.xlu0 %v3225_v25, %s3057_s24  ;;  %vm1819_vm1 = vcmp.lt.s32.totalorder %v3466_v17, 110 }
 0x1d5   : > { %vm1866_vm2 = vcmp.lt.s32.totalorder %v3466_v17, 109  ;;  %vm1913_vm3 = vcmp.lt.s32.totalorder %v3466_v17, 99  ;;  %vm1960_vm4 = vcmp.lt.s32.totalorder %v3466_v17, 98  ;;  %vm2007_vm5 = vcmp.lt.s32.totalorder %v3466_v17, 97 }
 0x1d6   : > { %v1677_v9 = vpop.permute.xlu1 %1676  ;;  %v4872_v16 = vadd.f32 %v1670_v12, %v1655_v32  ;;  %v4874_v10 = vadd.f32 %v1671_v3, %v1656_v54  ;;  %vm2054_vm6 = vcmp.lt.s32.totalorder %v3466_v17, 96  ;;  %vm2101_vm7 = vcmp.lt.s32.totalorder %v3466_v17, 95 }
 0x1d7   : > { %v1679_v61 = vsel %vm1678_vm14, %v1675_v45, %v1677_v9  ;;  %v1680_v14 = vsel %vm1678_vm14, %v1677_v9, %v1675_v45  ;;  %v1682_v2 = vpop.permute.xlu0 %1681  ;;  %2522 = vrot.lane.b32.xlu1 %v3233_v29, %s3058_s29  ;;  %vm2148_vm8 = vcmp.lt.s32.totalorder %v3466_v17, 94  ;;  %vm2195_vm9 = vcmp.lt.s32.totalorder %v3466_v17, 93 }
 0x1d8   : > { %v1700_v48 = vmul.f32 %v1693_v18, %v1679_v61  ;;  %v1701_v60 = vmul.f32 %v1697_v38, %v1680_v14  ;;  %2520 = vrot.lane.b32.xlu0 %v3225_v25, %s3058_s29  ;;  %v1804_v18 = vrot.slane %v1799_v40, %v3444_v20  ;;  %v1808_v38 = vrot.slane %v1799_v40, %v3446_v21 }
 0x1d9   : > { %vm2242_vm10 = vcmp.lt.s32.totalorder %v3466_v17, 83  ;;  %vm2289_vm11 = vcmp.lt.s32.totalorder %v3466_v17, 82  ;;  %vm2336_vm12 = vcmp.lt.s32.totalorder %v3466_v17, 81  ;;  %vm2430_vm13 = vcmp.lt.s32.totalorder %v3466_v17, 79 }
 0x1da   : > { %v1684_v4 = vpop.permute.xlu1 %1683  ;;  %v1702_v28 = vadd.f32 %v1700_v48, %v4773_v34  ;;  %v1703_v59 = vadd.f32 %v1701_v60, %v4775_v53  ;;  %v1740_v34 = vrot.slane %v1735_v5, %v3444_v20  ;;  %v1744_v53 = vrot.slane %v1735_v5, %v3446_v21 }
 0x1db   : > { %v1685_v0 = vsel %vm1678_vm14, %v1682_v2, %v1684_v4  ;;  %v1686_v55 = vsel %vm1678_vm14, %v1684_v4, %v1682_v2  ;;  %v1722_v46 = vpop.permute.xlu0 %1721  ;;  %2388 = vrot.lane.b32.xlu1 %v3229_v27, %s3055_s8  ;;  %vm2477_vm14 = vcmp.lt.s32.totalorder %v3466_v17, 78 }
 0x1dc   : > { %v1717_v15 = vmul.f32 %v1710_v39, %v1685_v0  ;;  %v1718_v50 = vmul.f32 %v1714_v37, %v1686_v55  ;;  %2386 = vrot.lane.b32.xlu0 %v3223_v24, %s3055_s8 }
 0x1de   : > { %v1724_v35 = vpop.permute.xlu1 %1723  ;;  %v4899_v31 = vadd.f32 %v1717_v15, %v1702_v28  ;;  %v4901_v43 = vadd.f32 %v1718_v50, %v1703_v59  ;;  %v1876_v15 = vld [vmem:[#allocation6 + $0x42] ss:$8 sm:$0x3] }
 0x1df   : > { %v1726_v63 = vsel %vm1725_vm15, %v1722_v46, %v1724_v35  ;;  %v1727_v26 = vsel %vm1725_vm15, %v1724_v35, %v1722_v46  ;;  %v1729_v7 = vpop.permute.xlu0 %1728  ;;  %2435 = vrot.lane.b32.xlu1 %v3229_v27, %s3056_s22  ;;  %v1881_v35 = vrot.slane %v1876_v15, %v3444_v20  ;;  %v1885_v51 = vrot.slane %v1876_v15, %v3446_v21 }
 0x1e0   : > { %v1747_v52 = vmul.f32 %v1740_v34, %v1726_v63  ;;  %v1748_v41 = vmul.f32 %v1744_v53, %v1727_v26  ;;  %2433 = vrot.lane.b32.xlu0 %v3223_v24, %s3056_s22  ;;  %v1923_v63 = vld [vmem:[#allocation6 + $0x43] ss:$8 sm:$0x3] }
 0x1e2   : > { %v1731_v49 = vpop.permute.xlu1 %1730  ;;  %v1749_v62 = vadd.f32 %v1747_v52, %v4820_v44  ;;  %v1750_v13 = vadd.f32 %v1748_v41, %v4822_v42  ;;  %v1787_v44 = vrot.slane %v1782_v33, %v3444_v20  ;;  %v1791_v42 = vrot.slane %v1782_v33, %v3446_v21  ;;  %v1846_v52 = vld [vmem:[#allocation8 + $0x41] ss:$8 sm:$0x3] }
 0x1e3   : > { %v1732_v22 = vsel %vm1725_vm15, %v1729_v7, %v1731_v49  ;;  %v1733_v56 = vsel %vm1725_vm15, %v1731_v49, %v1729_v7  ;;  %v1769_v11 = vpop.permute.xlu0 %1768  ;;  %2482 = vrot.lane.b32.xlu1 %v3229_v27, %s3057_s24  ;;  %v1932_v49 = vrot.slane %v1923_v63, %v3446_v21  ;;  %vm2383_vm15 = vcmp.lt.s32.totalorder %v3466_v17, 80 }
 0x1e4   : > { %v1764_v47 = vmul.f32 %v1757_v58, %v1732_v22  ;;  %v1765_v36 = vmul.f32 %v1761_v19, %v1733_v56  ;;  %2480 = vrot.lane.b32.xlu0 %v3223_v24, %s3057_s24  ;;  %v1928_v19 = vrot.slane %v1923_v63, %v3444_v20 }
 0x1e6   : > { %v1771_v6 = vpop.permute.xlu1 %1770  ;;  %v4926_v32 = vadd.f32 %v1764_v47, %v1749_v62  ;;  %v4928_v54 = vadd.f32 %v1765_v36, %v1750_v13  ;;  %v1970_v62 = vld [vmem:[#allocation6 + $0x44] ss:$8 sm:$0x3] }
 0x1e7   : > { %v1773_v1 = vsel %vm1772_vm0, %v1769_v11, %v1771_v6  ;;  %v1774_v23 = vsel %vm1772_vm0, %v1771_v6, %v1769_v11  ;;  %v1776_v14 = vpop.permute.xlu0 %1775  ;;  %2529 = vrot.lane.b32.xlu1 %v3229_v27, %s3058_s29  ;;  %v1851_v27 = vrot.slane %v1846_v52, %v3444_v20  ;;  %v1893_v6 = vld [vmem:[#allocation8 + $0x42] ss:$8 sm:$0x3] }
 0x1e8   : > { %v1794_v12 = vmul.f32 %v1787_v44, %v1773_v1  ;;  %v1795_v3 = vmul.f32 %v1791_v42, %v1774_v23  ;;  %2527 = vrot.lane.b32.xlu0 %v3223_v24, %s3058_s29  ;;  %v1855_v24 = vrot.slane %v1846_v52, %v3446_v21  ;;  %v1975_v42 = vrot.slane %v1970_v62, %v3444_v20 }
 0x1ea   : > { %v1778_v9 = vpop.permute.xlu1 %1777  ;;  %v1796_v45 = vadd.f32 %v1794_v12, %v4845_v30  ;;  %v1797_v61 = vadd.f32 %v1795_v3, %v4847_v8  ;;  %v1834_v30 = vrot.slane %v1829_v57, %v3444_v20  ;;  %v1838_v8 = vrot.slane %v1829_v57, %v3446_v21 }
 0x1eb   : > { %v1779_v48 = vsel %vm1772_vm0, %v1776_v14, %v1778_v9  ;;  %v1780_v29 = vsel %vm1772_vm0, %v1778_v9, %v1776_v14  ;;  %v1816_v5 = vpop.permute.xlu0 %1815  ;;  %vm2524_vm0 = vcmp.lt.s32.totalorder %v3466_v17, 77 }
 0x1ec   : > { %v1811_v25 = vmul.f32 %v1804_v18, %v1779_v48  ;;  %v1812_v60 = vmul.f32 %v1808_v38, %v1780_v29  ;;  %v1940_v29 = vld [vmem:[#allocation8 + $0x43] ss:$8 sm:$0x3] }
 0x1ee   : > { %v1818_v39 = vpop.permute.xlu1 %1817  ;;  %v4953_v37 = vadd.f32 %v1811_v25, %v1796_v45  ;;  %v4955_v4 = vadd.f32 %v1812_v60, %v1797_v61 }
 0x1ef   : > { %v1820_v28 = vsel %vm1819_vm1, %v1816_v5, %v1818_v39  ;;  %v1821_v59 = vsel %vm1819_vm1, %v1818_v39, %v1816_v5  ;;  %v1823_v53 = vpop.permute.xlu0 %1822 }
 0x1f0   : > { %v1841_v2 = vmul.f32 %v1834_v30, %v1820_v28  ;;  %v1842_v0 = vmul.f32 %v1838_v8, %v1821_v59  ;;  %v1945_v59 = vrot.slane %v1940_v29, %v3444_v20 }
 0x1f2   : > { %v1863_v55 = vpop.permute.xlu1 %1862  ;;  %v1843_v50 = vadd.f32 %v1841_v2, %v4872_v16  ;;  %v1844_v34 = vadd.f32 %v1842_v0, %v4874_v10  ;;  %v1949_v2 = vrot.slane %v1940_v29, %v3446_v21 }
 0x1f3   : > { %v1865_v26 = vpop.permute.xlu0 %1864 }
 0x1f4   : > { %v1867_v16 = vsel %vm1866_vm2, %v1863_v55, %v1865_v26  ;;  %v1868_v10 = vsel %vm1866_vm2, %v1865_v26, %v1863_v55  ;;  %v1987_v55 = vld [vmem:[#allocation8 + $0x44] ss:$8 sm:$0x3]  ;;  %v2017_v26 = vld [vmem:[#allocation6 + $0x45] ss:$8 sm:$0x3] }
 0x1f5   : > { %v1888_v41 = vmul.f32 %v1881_v35, %v1867_v16  ;;  %v1889_v58 = vmul.f32 %v1885_v51, %v1868_v10  ;;  %v1992_v51 = vrot.slane %v1987_v55, %v3444_v20 }
 0x1f6   : > { %v1910_v46 = vpop.permute.xlu1 %1909 }
 0x1f7   : > { %v1890_v13 = vadd.f32 %v1888_v41, %v4899_v31  ;;  %v1891_v7 = vadd.f32 %v1889_v58, %v4901_v43  ;;  %v1912_v22 = vpop.permute.xlu0 %1911  ;;  %v1979_v31 = vrot.slane %v1970_v62, %v3446_v21  ;;  %v2026_v62 = vrot.slane %v2017_v26, %v3446_v21 }
 0x1f8   : > { %v1914_v56 = vsel %vm1913_vm3, %v1910_v46, %v1912_v22  ;;  %v1915_v47 = vsel %vm1913_vm3, %v1912_v22, %v1910_v46  ;;  %v1996_v46 = vrot.slane %v1987_v55, %v3446_v21 }
 0x1f9   : > { %v1935_v36 = vmul.f32 %v1928_v19, %v1914_v56  ;;  %v1936_v44 = vmul.f32 %v1932_v49, %v1915_v47 }
 0x1fa   : > { %v1957_v33 = vpop.permute.xlu1 %1956 }
 0x1fb   : > { %v1937_v40 = vadd.f32 %v1935_v36, %v4926_v32  ;;  %v1938_v11 = vadd.f32 %v1936_v44, %v4928_v54  ;;  %v1959_v12 = vpop.permute.xlu0 %1958  ;;  %v1898_v32 = vrot.slane %v1893_v6, %v3444_v20  ;;  %v1902_v54 = vrot.slane %v1893_v6, %v3446_v21  ;;  %v2111_v6 = vld [vmem:[#allocation6 + $0x47] ss:$8 sm:$0x3] }
 0x1fc   : > { %v1961_v38 = vsel %vm1960_vm4, %v1957_v33, %v1959_v12  ;;  %v1962_v9 = vsel %vm1960_vm4, %v1959_v12, %v1957_v33  ;;  %v2022_v33 = vrot.slane %v2017_v26, %v3444_v20 }
 0x1fd   : > { %v1982_v57 = vmul.f32 %v1975_v42, %v1961_v38  ;;  %v1983_v45 = vmul.f32 %v1979_v31, %v1962_v9  ;;  %v2116_v38 = vrot.slane %v2111_v6, %v3444_v20  ;;  %v2120_v9 = vrot.slane %v2111_v6, %v3446_v21 }
 0x1fe   : > { %v1825_v43 = vpop.permute.xlu1 %1824 }
 0x1ff   : > { %v1826_v1 = vsel %vm1819_vm1, %v1823_v53, %v1825_v43  ;;  %v1827_v23 = vsel %vm1819_vm1, %v1825_v43, %v1823_v53  ;;  %v1984_v25 = vadd.f32 %v1982_v57, %v4953_v37  ;;  %v1985_v60 = vadd.f32 %v1983_v45, %v4955_v4  ;;  %v1870_v30 = vpop.permute.xlu0 %1869  ;;  %v2158_v45 = vld [vmem:[#allocation6 + $0x50] ss:$8 sm:$0x3] }
 0x200   : > { %v1858_v3 = vmul.f32 %v1851_v27, %v1826_v1  ;;  %v1859_v18 = vmul.f32 %v1855_v24, %v1827_v23 }
 0x202   : > { %v1860_v61 = vadd.f32 %v1858_v3, %v1843_v50  ;;  %v1861_v14 = vadd.f32 %v1859_v18, %v1844_v34  ;;  %v1872_v48 = vpop.permute.xlu1 %1871 }
 0x203   : > { %v1873_v8 = vsel %vm1866_vm2, %v1870_v30, %v1872_v48  ;;  %v1874_v39 = vsel %vm1866_vm2, %v1872_v48, %v1870_v30  ;;  %v1917_v37 = vpop.permute.xlu0 %1916  ;;  %v2167_v30 = vrot.slane %v2158_v45, %v3446_v21 }
 0x204   : > { %v1905_v5 = vmul.f32 %v1898_v32, %v1873_v8  ;;  %v1906_v28 = vmul.f32 %v1902_v54, %v1874_v39  ;;  %v2034_v39 = vld [vmem:[#allocation8 + $0x45] ss:$8 sm:$0x3] }
 0x206   : > { %v1919_v0 = vpop.permute.xlu1 %1918  ;;  %v1907_v15 = vadd.f32 %v1905_v5, %v1890_v13  ;;  %v1908_v50 = vadd.f32 %v1906_v28, %v1891_v7  ;;  %v2064_v7 = vld [vmem:[#allocation6 + $0x46] ss:$8 sm:$0x3] }
 0x207   : > { %v1920_v4 = vsel %vm1913_vm3, %v1917_v37, %v1919_v0  ;;  %v1921_v34 = vsel %vm1913_vm3, %v1919_v0, %v1917_v37  ;;  %v1964_v52 = vpop.permute.xlu0 %1963  ;;  %v2069_v42 = vrot.slane %v2064_v7, %v3444_v20  ;;  %v2073_v31 = vrot.slane %v2064_v7, %v3446_v21 }
 0x208   : > { %v1952_v53 = vmul.f32 %v1945_v59, %v1920_v4  ;;  %v1953_v35 = vmul.f32 %v1949_v2, %v1921_v34  ;;  %v2043_v37 = vrot.slane %v2034_v39, %v3446_v21  ;;  %v2081_v34 = vld [vmem:[#allocation8 + $0x46] ss:$8 sm:$0x3] }
 0x20a   : > { %v1966_v63 = vpop.permute.xlu1 %1965  ;;  %v1954_v16 = vadd.f32 %v1952_v53, %v1937_v40  ;;  %v1955_v10 = vadd.f32 %v1953_v35, %v1938_v11 }
 0x20b   : > { %v1967_v41 = vsel %vm1960_vm4, %v1964_v52, %v1966_v63  ;;  %v1968_v58 = vsel %vm1960_vm4, %v1966_v63, %v1964_v52  ;;  %v2004_v56 = vpop.permute.xlu0 %2003  ;;  %v2090_v52 = vrot.slane %v2081_v34, %v3446_v21 }
 0x20c   : > { %v1999_v19 = vmul.f32 %v1992_v51, %v1967_v41  ;;  %v2000_v49 = vmul.f32 %v1996_v46, %v1968_v58 }
 0x20e   : > { %v2006_v13 = vpop.permute.xlu1 %2005  ;;  %v2001_v22 = vadd.f32 %v1999_v19, %v1984_v25  ;;  %v2002_v27 = vadd.f32 %v2000_v49, %v1985_v60  ;;  %v2163_v60 = vrot.slane %v2158_v45, %v3444_v20 }
 0x20f   : > { %v2008_v47 = vsel %vm2007_vm5, %v2004_v56, %v2006_v13  ;;  %v2009_v24 = vsel %vm2007_vm5, %v2006_v13, %v2004_v56  ;;  %v2051_v1 = vpop.permute.xlu0 %2050 }
 0x210   : > { %v2029_v36 = vmul.f32 %v2022_v33, %v2008_v47  ;;  %v2030_v44 = vmul.f32 %v2026_v62, %v2009_v24 }
 0x212   : > { %v2053_v43 = vpop.permute.xlu1 %2052  ;;  %v2031_v40 = vadd.f32 %v2029_v36, %v1860_v61  ;;  %v2032_v11 = vadd.f32 %v2030_v44, %v1861_v14 }
 0x213   : > { %v2055_v23 = vsel %vm2054_vm6, %v2051_v1, %v2053_v43  ;;  %v2056_v12 = vsel %vm2054_vm6, %v2053_v43, %v2051_v1  ;;  %v2098_v61 = vpop.permute.xlu0 %2097 }
 0x214   : > { %v2076_v3 = vmul.f32 %v2069_v42, %v2055_v23  ;;  %v2077_v18 = vmul.f32 %v2073_v31, %v2056_v12 }
 0x216   : > { %v2100_v57 = vpop.permute.xlu1 %2099  ;;  %v2078_v32 = vadd.f32 %v2076_v3, %v1907_v15  ;;  %v2079_v54 = vadd.f32 %v2077_v18, %v1908_v50  ;;  %v2039_v50 = vrot.slane %v2034_v39, %v3444_v20 }
 0x217   : > { %v2102_v14 = vsel %vm2101_vm7, %v2098_v61, %v2100_v57  ;;  %v2103_v48 = vsel %vm2101_vm7, %v2100_v57, %v2098_v61  ;;  %v2145_v59 = vpop.permute.xlu0 %2144  ;;  %v5112_v57 = vld [vmem:[#allocation8 + $0x50] ss:$8 sm:$0x3]  ;;  %v5121_v61 = vld [vmem:[#allocation6 + $0x53] ss:$8 sm:$0x3] }
 0x218   : > { %v2123_v29 = vmul.f32 %v2116_v38, %v2102_v14  ;;  %v2124_v25 = vmul.f32 %v2120_v9, %v2103_v48  ;;  %v2128_v9 = vld [vmem:[#allocation8 + $0x47] ss:$8 sm:$0x3] }
 0x219   : > { %v2133_v14 = vrot.slane %v2128_v9, %v3444_v20  ;;  %v2137_v48 = vrot.slane %v2128_v9, %v3446_v21 }
 0x21a   : > { %v2147_v8 = vpop.permute.xlu1 %2146  ;;  %v5050_v5 = vadd.f32 %v2123_v29, %v1954_v16  ;;  %v5052_v28 = vadd.f32 %v2124_v25, %v1955_v10  ;;  %v2086_v10 = vrot.slane %v2081_v34, %v3444_v20  ;;  %v2180_v29 = vrot.slane %v5112_v57, %v3444_v20  ;;  %v5127_v25 = vld [vmem:[#allocation6 + $0x54] ss:$8 sm:$0x3]  ;;  %v5155_v34 = vld [vmem:[#allocation8 + $0x54] ss:$8 sm:$0x3] }
 0x21b   : > { %v2149_v2 = vsel %vm2148_vm8, %v2145_v59, %v2147_v8  ;;  %v2150_v0 = vsel %vm2148_vm8, %v2147_v8, %v2145_v59  ;;  %v2011_v51 = vpop.permute.xlu0 %2010  ;;  %v2184_v8 = vrot.slane %v5112_v57, %v3446_v21  ;;  %v5204_v57 = vld [vmem:[#allocation8 + $0x56] ss:$8 sm:$0x3] }
 0x21c   : > { %v2170_v55 = vmul.f32 %v2163_v60, %v2149_v2  ;;  %v2171_v15 = vmul.f32 %v2167_v30, %v2150_v0  ;;  %v5129_v60 = vld [vmem:[#allocation8 + $0x51] ss:$8 sm:$0x3]  ;;  %v5142_v0 = vld [vmem:[#allocation8 + $0x52] ss:$8 sm:$0x3] }
 0x21d   : > { %v5226_v2 = vld [vmem:[#allocation8 + $0x60] ss:$8 sm:$0x3] }
 0x21e   : > { %v2013_v4 = vpop.permute.xlu1 %2012  ;;  %v5060_v53 = vadd.f32 %v2170_v55, %v2001_v22  ;;  %v5062_v35 = vadd.f32 %v2171_v15, %v2002_v27  ;;  %v5144_v55 = vld [vmem:[#allocation8 + $0x53] ss:$8 sm:$0x3] }
 0x21f   : > { %v2014_v46 = vsel %vm2007_vm5, %v2011_v51, %v2013_v4  ;;  %v2015_v63 = vsel %vm2007_vm5, %v2013_v4, %v2011_v51  ;;  %v2058_v49 = vpop.permute.xlu0 %2057 }
 0x220   : > { %v2046_v26 = vmul.f32 %v2039_v50, %v2014_v46  ;;  %v2047_v16 = vmul.f32 %v2043_v37, %v2015_v63  ;;  %v5224_v50 = vld [vmem:[#allocation8 + $0x57] ss:$8 sm:$0x3] }
 0x222   : > { %v2060_v41 = vpop.permute.xlu1 %2059  ;;  %v5070_v58 = vadd.f32 %v2046_v26, %v2031_v40  ;;  %v5072_v19 = vadd.f32 %v2047_v16, %v2032_v11  ;;  %v5166_v16 = vld [vmem:[#allocation6 + $0x55] ss:$8 sm:$0x3] }
 0x223   : > { %v2061_v33 = vsel %vm2054_vm6, %v2058_v49, %v2060_v41  ;;  %v2062_v62 = vsel %vm2054_vm6, %v2060_v41, %v2058_v49  ;;  %v2105_v47 = vpop.permute.xlu0 %2104 }
 0x224   : > { %v2093_v13 = vmul.f32 %v2086_v10, %v2061_v33  ;;  %v2094_v7 = vmul.f32 %v2090_v52, %v2062_v62  ;;  %v5168_v10 = vld [vmem:[#allocation6 + $0x56] ss:$8 sm:$0x3]  ;;  %v5192_v52 = vld [vmem:[#allocation6 + $0x60] ss:$8 sm:$0x3] }
 0x226   : > { %v2107_v22 = vpop.permute.xlu1 %2106  ;;  %v5078_v27 = vadd.f32 %v2093_v13, %v2078_v32  ;;  %v5080_v56 = vadd.f32 %v2094_v7, %v2079_v54  ;;  %v5116_v32 = vld [vmem:[#allocation6 + $0x51] ss:$8 sm:$0x3]  ;;  %v5118_v54 = vld [vmem:[#allocation6 + $0x52] ss:$8 sm:$0x3] }
 0x227   : > { %v5084_v36 = vpop.permute.xlu0 %2151  ;;  %v2210_v39 = vrot.slane %v5116_v32, %v3444_v20  ;;  %v2214_v59 = vrot.slane %v5116_v32, %v3446_v21  ;;  %v5180_v13 = vld [vmem:[#allocation6 + $0x57] ss:$8 sm:$0x3]  ;;  %v2108_v7 = vsel %vm2101_vm7, %v2105_v47, %v2107_v22  ;;  %v2109_v9 = vsel %vm2101_vm7, %v2107_v22, %v2105_v47  ;;  %v5202_v47 = vld [vmem:[#allocation8 + $0x55] ss:$8 sm:$0x3] }
 0x228   : > { %v2492_v33 = vrot.slane %v5180_v13, %v3444_v20  ;;  %v2496_v22 = vrot.slane %v5180_v13, %v3446_v21  ;;  %v2140_v63 = vmul.f32 %v2133_v14, %v2108_v7  ;;  %v2141_v46 = vmul.f32 %v2137_v48, %v2109_v9 }
 0x229   : > { %v2462_v48 = vrot.slane %v5204_v57, %v3444_v20  ;;  %v2509_v14 = vrot.slane %v5224_v50, %v3444_v20 }
 0x22a   : > { %v5082_v24 = vpop.permute.xlu1 %2153 }
 0x22b   : > { %v5088_v42 = vpop.permute.xlu0 %2191  ;;  %v2155_v41 = vsel %vm2148_vm8, %v5084_v36, %v5082_v24  ;;  %v2156_v26 = vsel %vm2148_vm8, %v5082_v24, %v5084_v36 }
 0x22c   : > { %v2187_v9 = vmul.f32 %v2180_v29, %v2155_v41  ;;  %v2188_v4 = vmul.f32 %v2184_v8, %v2156_v26  ;;  %v2560_v8 = vrot.slane %v5226_v2, %v3446_v21  ;;  %v2142_v26 = vadd.f32 %v2140_v63, %v5050_v5 }
 0x22d   : > { %v2143_v41 = vadd.f32 %v2141_v46, %v5052_v28  ;;  %v5888_v63 = vrot.slane %v5121_v61, %v3446_v21 }
 0x22e   : > { %v5086_v44 = vpop.permute.xlu1 %2193 }
 0x22f   : > { %v5092_v43 = vpop.permute.xlu0 %2238  ;;  %v2196_v37 = vsel %vm2195_vm9, %v5088_v42, %v5086_v44  ;;  %v2197_v36 = vsel %vm2195_vm9, %v5086_v44, %v5088_v42 }
 0x230   : > { %v2217_v29 = vmul.f32 %v2210_v39, %v2196_v37  ;;  %v2218_v5 = vmul.f32 %v2214_v59, %v2197_v36  ;;  %v2190_v39 = vadd.f32 %v2188_v4, %v5062_v35 }
 0x232   : > { %v5090_v31 = vpop.permute.xlu1 %2240 }
 0x233   : > { %v5096_v40 = vpop.permute.xlu0 %2285  ;;  %v2243_v44 = vsel %vm2242_vm10, %v5092_v43, %v5090_v31  ;;  %v2244_v42 = vsel %vm2242_vm10, %v5090_v31, %v5092_v43  ;;  %v2189_v43 = vadd.f32 %v2187_v9, %v5060_v53  ;;  %v5886_v53 = vrot.slane %v5118_v54, %v3446_v21 }
 0x235   : > { %v2265_v35 = vmul.f32 %v5886_v53, %v2244_v42  ;;  %v5891_v53 = vrot.slane %v5129_v60, %v3444_v20 }
 0x236   : > { %v5094_v6 = vpop.permute.xlu1 %2287 }
 0x237   : > { %v5100_v1 = vpop.permute.xlu0 %2332  ;;  %v2290_v28 = vsel %vm2289_vm11, %v5096_v40, %v5094_v6  ;;  %v2291_v46 = vsel %vm2289_vm11, %v5094_v6, %v5096_v40  ;;  %v5885_v6 = vrot.slane %v5118_v54, %v3444_v20 }
 0x238   : > { %v2312_v36 = vmul.f32 %v5888_v63, %v2291_v46 }
 0x239   : > { %v2264_v40 = vmul.f32 %v5885_v6, %v2243_v44 }
 0x23a   : > { %v5098_v11 = vpop.permute.xlu1 %2334 }
 0x23b   : > { %v5104_v12 = vpop.permute.xlu0 %2198  ;;  %v2337_v32 = vsel %vm2336_vm12, %v5100_v1, %v5098_v11  ;;  %v2338_v59 = vsel %vm2336_vm12, %v5098_v11, %v5100_v1  ;;  %v5887_v1 = vrot.slane %v5121_v61, %v3444_v20  ;;  %v5889_v61 = vrot.slane %v5127_v25, %v3444_v20 }
 0x23d   : > { %v2311_v4 = vmul.f32 %v5887_v1, %v2290_v28  ;;  %v2358_v42 = vmul.f32 %v5889_v61, %v2337_v32  ;;  %v5890_v28 = vrot.slane %v5127_v25, %v3446_v21  ;;  %v5893_v25 = vrot.slane %v5142_v0, %v3444_v20 }
 0x23e   : > { %v5102_v23 = vpop.permute.xlu1 %2200 }
 0x23f   : > { %v5108_v18 = vpop.permute.xlu0 %2245  ;;  %v2202_v37 = vsel %vm2195_vm9, %v5104_v12, %v5102_v23  ;;  %v2203_v11 = vsel %vm2195_vm9, %v5102_v23, %v5104_v12  ;;  %v2219_v23 = vadd.f32 %v2217_v29, %v5070_v58  ;;  %v2220_v12 = vadd.f32 %v2218_v5, %v5072_v19 }
 0x240   : > { %v2359_v46 = vmul.f32 %v5890_v28, %v2338_v59  ;;  %v5894_v5 = vrot.slane %v5142_v0, %v3446_v21  ;;  %v5895_v0 = vrot.slane %v5144_v55, %v3444_v20 }
 0x242   : > { %v5106_v3 = vpop.permute.xlu1 %2247 }
 0x243   : > { %v5114_v45 = vpop.permute.xlu0 %2292  ;;  %v2249_v54 = vsel %vm2242_vm10, %v5108_v18, %v5106_v3  ;;  %v2250_v9 = vsel %vm2242_vm10, %v5106_v3, %v5108_v18  ;;  %v2234_v3 = vmul.f32 %v5891_v53, %v2202_v37  ;;  %v5892_v18 = vrot.slane %v5129_v60, %v3446_v21 }
 0x244   : > { %v2281_v29 = vmul.f32 %v5893_v25, %v2249_v54  ;;  %v2282_v32 = vmul.f32 %v5894_v5, %v2250_v9  ;;  %v2313_v37 = vadd.f32 %v2311_v4, %v2142_v26  ;;  %v5896_v9 = vrot.slane %v5144_v55, %v3446_v21 }
 0x245   : > { %v2235_v1 = vmul.f32 %v5892_v18, %v2203_v11  ;;  %v2314_v11 = vadd.f32 %v2312_v36, %v2143_v41  ;;  %v5897_v26 = vrot.slane %v5155_v34, %v3444_v20  ;;  %v5899_v18 = vrot.slane %v5168_v10, %v3444_v20 }
 0x246   : > { %v5110_v38 = vpop.permute.xlu1 %2294 }
 0x247   : > { %v5146_v15 = vpop.permute.xlu0 %2339  ;;  %v2296_v58 = vsel %vm2289_vm11, %v5114_v45, %v5110_v38  ;;  %v2297_v19 = vsel %vm2289_vm11, %v5110_v38, %v5114_v45  ;;  %v2266_v38 = vadd.f32 %v2264_v40, %v5078_v27  ;;  %v2267_v45 = vadd.f32 %v2265_v35, %v5080_v56 }
 0x248   : > { %v2328_v54 = vmul.f32 %v5895_v0, %v2296_v58  ;;  %v2329_v61 = vmul.f32 %v5896_v9, %v2297_v19  ;;  %v5898_v40 = vrot.slane %v5155_v34, %v3446_v21  ;;  %v2236_v35 = vadd.f32 %v2234_v3, %v2219_v23 }
 0x249   : > { %v2237_v4 = vadd.f32 %v2235_v1, %v2220_v12  ;;  %v2283_v36 = vadd.f32 %v2281_v29, %v2266_v38  ;;  %v2284_v53 = vadd.f32 %v2282_v32, %v2267_v45  ;;  %v5901_v29 = vrot.slane %v5166_v16, %v3444_v20 }
 0x24a   : > { %v5131_v30 = vpop.permute.xlu1 %2341  ;;  %v2331_v23 = vadd.f32 %v2329_v61, %v2314_v11  ;;  %v5902_v32 = vrot.slane %v5166_v16, %v3446_v21  ;;  %v5904_v16 = vrot.slane %v5192_v52, %v3444_v20  ;;  %v5905_v0 = vrot.slane %v5192_v52, %v3446_v21 }
 0x24b   : > { %v5190_v49 = vpop.permute.xlu0 %2379  ;;  %v2343_v60 = vsel %vm2336_vm12, %v5146_v15, %v5131_v30  ;;  %v2344_v59 = vsel %vm2336_vm12, %v5131_v30, %v5146_v15  ;;  %v2360_v30 = vadd.f32 %v2358_v42, %v2189_v43  ;;  %v2361_v15 = vadd.f32 %v2359_v46, %v2190_v39 }
 0x24c   : > { %v2375_v41 = vmul.f32 %v5897_v26, %v2343_v60  ;;  %v2376_v55 = vmul.f32 %v5898_v40, %v2344_v59  ;;  %v2330_v42 = vadd.f32 %v2328_v54, %v2313_v37  ;;  %v5907_v52 = vrot.slane %v5202_v47, %v3444_v20 }
 0x24d   : > { %v5908_v26 = vrot.slane %v5202_v47, %v3446_v21  ;;  %v5909_v47 = vrot.slane %v5226_v2, %v3444_v20 }
 0x24e   : > { %v5178_v62 = vpop.permute.xlu1 %2381  ;;  %v2377_v3 = vadd.f32 %v2375_v41, %v2360_v30  ;;  %v2378_v1 = vadd.f32 %v2376_v55, %v2361_v15 }
 0x24f   : > { %v2427_v24 = vpop.permute.xlu0 %2426  ;;  %v2384_v12 = vsel %vm2383_vm15, %v5190_v49, %v5178_v62 }
 0x250   : > { %v2405_v5 = vmul.f32 %v5901_v29, %v2384_v12 }
 0x252   : > { %v5218_v51 = vpop.permute.xlu1 %2428 }
 0x253   : > { %v2474_v31 = vpop.permute.xlu0 %2473  ;;  %v2431_v28 = vsel %vm2430_vm13, %v2427_v24, %v5218_v51  ;;  %v2432_v27 = vsel %vm2430_vm13, %v5218_v51, %v2427_v24  ;;  %v5900_v51 = vrot.slane %v5168_v10, %v3446_v21  ;;  %v2385_v10 = vsel %vm2383_vm15, %v5178_v62, %v5190_v49 }
 0x254   : > { %v2452_v58 = vmul.f32 %v5899_v18, %v2431_v28  ;;  %v2406_v60 = vmul.f32 %v5902_v32, %v2385_v10  ;;  %v5906_v28 = vrot.slane %v5224_v50, %v3446_v21 }
 0x255   : > { %v2453_v24 = vmul.f32 %v5900_v51, %v2432_v27 }
 0x256   : > { %v2476_v7 = vpop.permute.xlu1 %2475  ;;  %v2454_v59 = vadd.f32 %v2452_v58, %v2283_v36  ;;  %v2408_v30 = vadd.f32 %v2406_v60, %v2237_v4 }
 0x257   : > { %v2521_v6 = vpop.permute.xlu0 %2520  ;;  %v2478_v43 = vsel %vm2477_vm14, %v2474_v31, %v2476_v7  ;;  %v2479_v39 = vsel %vm2477_vm14, %v2476_v7, %v2474_v31 }
 0x258   : > { %v2499_v31 = vmul.f32 %v2492_v33, %v2478_v43  ;;  %v2500_v25 = vmul.f32 %v2496_v22, %v2479_v39  ;;  %v2455_v33 = vadd.f32 %v2453_v24, %v2284_v53 }
 0x25a   : > { %v2523_v44 = vpop.permute.xlu1 %2522  ;;  %v2502_v61 = vadd.f32 %v2500_v25, %v2331_v23 }
 0x25b   : > { %v2387_v56 = vpop.permute.xlu0 %2386  ;;  %v2525_v49 = vsel %vm2524_vm0, %v2521_v6, %v2523_v44  ;;  %v2526_v62 = vsel %vm2524_vm0, %v2523_v44, %v2521_v6  ;;  %v5903_v6 = vrot.slane %v5204_v57, %v3446_v21 }
 0x25c   : > { %v2546_v11 = vmul.f32 %v5904_v16, %v2525_v49  ;;  %v2547_v54 = vmul.f32 %v5905_v0, %v2526_v62 }
 0x25e   : > { %v2389_v63 = vpop.permute.xlu1 %2388  ;;  %v2548_v58 = vadd.f32 %v2546_v11, %v2377_v3  ;;  %v2549_v50 = vadd.f32 %v2547_v54, %v2378_v1  ;;  %v2574_v3 = vstv %s2573_s5 }
 0x25f   : > { %v2434_v46 = vpop.permute.xlu0 %2433  ;;  %v2390_v13 = vsel %vm2383_vm15, %v2387_v56, %v2389_v63  ;;  %v2391_v22 = vsel %vm2383_vm15, %v2389_v63, %v2387_v56  ;;  %v2407_v56 = vadd.f32 %v2405_v5, %v2236_v35 }
 0x260   : > { %v2422_v15 = vmul.f32 %v5907_v52, %v2390_v13  ;;  %v2423_v41 = vmul.f32 %v5908_v26, %v2391_v22 }
 0x262   : > { %v2436_v34 = vpop.permute.xlu1 %2435 }
 0x263   : > { %v2437_v19 = vsel %vm2430_vm13, %v2434_v46, %v2436_v34  ;;  %v2438_v7 = vsel %vm2430_vm13, %v2436_v34, %v2434_v46  ;;  %v2481_v37 = vpop.permute.xlu0 %2480  ;;  %v2424_v34 = vadd.f32 %v2422_v15, %v2407_v56 }
 0x264   : > { %v2469_v44 = vmul.f32 %v2462_v48, %v2437_v19  ;;  %v2470_v45 = vmul.f32 %v5903_v6, %v2438_v7  ;;  %v2501_v48 = vadd.f32 %v2499_v31, %v2330_v42  ;;  %v2425_v42 = vadd.f32 %v2423_v41, %v2408_v30 }
 0x266   : > { %v2483_v38 = vpop.permute.xlu1 %2482  ;;  %v2471_v55 = vadd.f32 %v2469_v44, %v2454_v59  ;;  %v2472_v36 = vadd.f32 %v2470_v45, %v2455_v33  ;;  %v2855_v59 = vld [vmem:[%s3212_s9] sm:$0xff] }
 0x267   : > { %v2484_v63 = vsel %vm2477_vm14, %v2481_v37, %v2483_v38  ;;  %v2485_v9 = vsel %vm2477_vm14, %v2483_v38, %v2481_v37  ;;  %v2528_v18 = vpop.permute.xlu0 %2527 }
 0x268   : > { %v2516_v57 = vmul.f32 %v2509_v14, %v2484_v63  ;;  %v2517_v27 = vmul.f32 %v5906_v28, %v2485_v9 }
 0x26a   : > { %v2530_v40 = vpop.permute.xlu1 %2529  ;;  %v2518_v53 = vadd.f32 %v2516_v57, %v2501_v48  ;;  %v2519_v14 = vadd.f32 %v2517_v27, %v2502_v61 }
 0x26b   : > { %v2531_v35 = vsel %vm2524_vm0, %v2528_v18, %v2530_v40  ;;  %v2532_v4 = vsel %vm2524_vm0, %v2530_v40, %v2528_v18 }
 0x26c   : > { %v2569_v51 = vadd.f32 %v2518_v53, %v2471_v55  ;;  %v2570_v24 = vadd.f32 %v2519_v14, %v2472_v36  ;;  %v2563_v43 = vmul.f32 %v5909_v47, %v2531_v35  ;;  %v2564_v39 = vmul.f32 %v2560_v8, %v2532_v4 }
 0x26e   : > { %v2565_v23 = vadd.f32 %v2563_v43, %v2548_v58  ;;  %v2566_v12 = vadd.f32 %v2564_v39, %v2549_v50 }
 0x270   : > { %v2567_v10 = vadd.f32 %v2565_v23, %v2424_v34  ;;  %v2568_v46 = vadd.f32 %v2566_v12, %v2425_v42 }
 0x272   : > { %v2571_v1 = vadd.f32 %v2569_v51, %v2567_v10  ;;  %v2572_v17 = vadd.f32 %v2570_v24, %v2568_v46 }
 0x274   : > { %v2575_v19 = vadd.f32 %v2574_v3, %v2571_v1  ;;  %v2576_v7 = vadd.f32 %v2574_v3, %v2572_v17 }
 0x276   : > { %v2720_v31 = vmul.f32 -1.442695, %v2575_v19  ;;  %v2721_v25 = vmul.f32 -1.442695, %v2576_v7 }
 0x278   : > { %2847 = vpow2.f32 %v2720_v31 }
 0x279   : > { %2849 = vpow2.f32 %v2721_v25 }
 0x285   : > { %v2848_v21 = vpop.eup %2847 }
 0x286   : > { %v2850_v2 = vpop.eup %2849  ;;  %v2583_v8 = vadd.f32 1.0, %v2848_v21 }
 0x287   : > { %v2584_v49 = vadd.f32 1.0, %v2850_v2 }
 0x288   : > { %2851 = vrcp.f32 %v2583_v8 }
 0x289   : > { %2853 = vrcp.f32 %v2584_v49 }
 0x295   : > { %v2852_v62 = vpop.eup %2851 }
 0x296   : > { %v2854_v29 = vpop.eup %2853  ;;  %v2592_v5 = vrot.slane %v2852_v62, %v3444_v20 }
 0x297   : > { %v2596_v32 = vrot.slane %v2854_v29, %v3444_v20 }
 0x299   : > { %v2599_v60 = vcombine.low %v2592_v5, %v2596_v32 }
 0x29b   : > { %v2601_v33 = vmul.f32 %v2855_v59, %v2599_v60 }
 0x29d   : > { %2602 = vst [vmem:[%s243_s7] sm:$0xff] %v2601_v33 }
 0x29e   : > { %2949 = shalt.err (!%p2946_p9)
}
 0x29f   : > { %s2950_s9 = scalar_lea.hbm %s2616_s14, 128  ;;  %s2954_s8 = scalar_lea.hbm %s5498_s4, 256 }
 0x2a0   : > { %p2951_p13 = scmp.ne.s32.totalorder %s2616_s14, %s2950_s9  ;;  %p2955_p4 = scmp.lt.s32.totalorder %s2616_s14, %s5498_s4 }
 0x2a1   : > { %p2956_p8 = scmp.lt.s32.totalorder %s2954_s8, %s2950_s9 }
 0x2a2   : > { %p2952_p5 = pnand %p2951_p13, %p5910_p0 }
 0x2a3   : > { %p2957_p3 = por %p2956_p8, %p2955_p4 }
 0x2a4   : > { %p2953_p10 = pneg %p2952_p5 }
 0x2a6   : > { %p2958_p11 = pnand %p2957_p3, %p2953_p10 }
 0x2a8   : > { %2961 = shalt.err (!%p2958_p11)
}
 0x2a9   : > { %2739 = dma.vmem_to_hbm [thread:$0]  (%p5910_p0), %s2619_s10, 128, %s2616_s14, %s2604_s25  }
 0x2aa PF: > { %s2630_s29 = sand.u32 1, %s2992_s17   ;;  %p5911_p1 = scmp.ne.s32.totalorder %s5615_s23, 0 }
 0x2ab   : > { %p5912_p2 = scmp.ge.s32.totalorder %s3004_s20, 2  ;;  %s2631_s5 = scalar_lea.sflag [#allocation5], %s2630_s29 }
 0x2ad   : > { %p2753_p6 = pnand %p5912_p2, %p5911_p1 }
 0x2af   : > { %p2754_p12 = pneg %p2753_p6 }
 0x2b1   : > { %2987 = dma.done.wait (%p2754_p12), %s2631_s5, 128  }
 0x2b2   : > { %2989 = vsyncadd (%p2754_p12), %s2631_s5, 4294967168  ;;  %p19_p7 = scmp.ge.s32.totalorder %s3160_s12, 4   ;;  %s5913_s17 = smov %s2996_s18 }
 0x2b3   : > { %s5914_s18 = smov %s3000_s19  ;;  %s5915_s19 = smov %s3176_s16 }
 0x2b4   : > { %s5916_s20 = smov %s3160_s12  ;;  %21 = sbr.rel (!%p19_p7) target bundleno = 8 (0x8), region = 185 }
 0x2b9   :  { %2636 = vsyncpa [#allocation4], 1 }
 0x2ba   :  { %2638 = vsyncpa [#allocation4 + $0x1], 1 }
 0x2bb   :  { %2639 = vsyncpa [#allocation7], 1 }
 0x2bc   :  { %2640 = vsyncpa [#allocation5], 1 }
 0x2bd   :  { %2642 = vsyncpa [#allocation5 + $0x1], 1 }

</bundles_post_ra>
